<compile_context>
chip_gen: v6e
topology: v6e:2x2x1
jax: 0.10.0
libtpu: 0.0.40
codegen_flags: <defaults>
</compile_context>

<pallas_src>
import jax
import jax.numpy as jnp
from jax.experimental import pallas as pl
from jax.experimental.pallas import tpu as pltpu

_LANES = 128
_SUBLANES = 8
_TILE_ROWS = 4096                              # (4096, 128) f32 block = 2 MiB
_ALIGN = _SUBLANES * _LANES                    # 1024-element (8x128) alignment
_MIN_PALLAS_N = 2 * _TILE_ROWS * _LANES        # >= 2 grid steps (~4 MiB f32) before Pallas pays off


def _linreg_kernel(w_ref, b_ref, x_ref, o_ref):
    # w_ref, b_ref: (1,) f32 scalars in SMEM (scalar path, off the vector load slots).
    # x_ref, o_ref: (_TILE_ROWS, _LANES) tiles in VMEM (lane-dense, full vregs).
    w = w_ref[0]
    b = b_ref[0]
    o_ref[...] = (x_ref[...] * w + b).astype(o_ref.dtype)


def _linreg_pallas(x2d, w, b):
    rows, lanes = x2d.shape                    # lanes == _LANES, rows % 8 == 0
    n_elems = rows * lanes
    grid = (pl.cdiv(rows, _TILE_ROWS),)        # ragged last block handled by Pallas
    return pl.pallas_call(
        _linreg_kernel,
        out_shape=jax.ShapeDtypeStruct((rows, lanes), x2d.dtype),
        grid=grid,
        in_specs=[
            pl.BlockSpec(memory_space=pltpu.MemorySpace.SMEM),     # weight scalar
            pl.BlockSpec(memory_space=pltpu.MemorySpace.SMEM),     # bias scalar
            pl.BlockSpec((_TILE_ROWS, _LANES), lambda i: (i, 0)),  # x tile
        ],
        out_specs=pl.BlockSpec((_TILE_ROWS, _LANES), lambda i: (i, 0)),
        compiler_params=pltpu.CompilerParams(
            dimension_semantics=("parallel",),       # shard grid across TCs (v7x megacore)
            vmem_limit_bytes=32 * 1024 * 1024,       # 2 MiB blocks, double-buffered in+out = 8 MiB
        ),
        cost_estimate=pl.CostEstimate(
            flops=2 * n_elems, transcendentals=0, bytes_accessed=2 * 4 * n_elems),
    )(w, b, x2d)


def linear_regression_forward(x, weight, bias):
    """Pallas equivalent of torch.nn.Linear(1, 1).forward(x).

    Args:
      x:      (N, 1) float32
      weight: (1, 1) float32  (torch Linear weight shape [out_features, in_features])
      bias:   (1,)   float32
    Returns:
      (N, 1) float32
    """
    n = x.shape[0]
    dt = x.dtype
    # Keep SMEM scalars in 32-bit (SMEM is a 32-bit scalar path).
    w32 = jnp.reshape(weight, (1,)).astype(jnp.float32)
    b32 = jnp.reshape(bias, (1,)).astype(jnp.float32)

    if n < _MIN_PALLAS_N:
        # Small/medium batch: fused XLA is already at HBM roofline; the kernel
        # launch + per-step overhead would only slow it down.
        return (x.astype(jnp.float32) * w32[0] + b32[0]).astype(dt)

    n_main = (n // _ALIGN) * _ALIGN            # 8x128-aligned prefix for the kernel
    tail = n - n_main                          # < 1024 leftover elements -> XLA

    if tail == 0:
        # Contiguous (N,1) -> (rows,128) reshape is a free bitcast: exactly one
        # HBM read of x and one HBM write of the output, nothing else.
        x2d = jnp.reshape(x, (n // _LANES, _LANES))
        out2d = _linreg_pallas(x2d, w32, b32)
        return jnp.reshape(out2d, (n, 1))

    # Unaligned N: run the aligned prefix through Pallas and the tiny tail
    # through plain XLA (no whole-array pad, no whole-array output slice).
    flat = jnp.reshape(x, (n,))
    x2d = jnp.reshape(flat[:n_main], (n_main // _LANES, _LANES))
    main = jnp.reshape(_linreg_pallas(x2d, w32, b32), (n_main,))
    tail_out = (flat[n_main:].astype(jnp.float32) * w32[0] + b32[0]).astype(dt)
    return jnp.reshape(jnp.concatenate([main, tail_out], axis=0), (n, 1))


if __name__ == "__main__":
    key = jax.random.PRNGKey(0)
    k_x, k_x2, k_w, k_b = jax.random.split(key, 4)

    # Parameters mimicking torch Linear's U(-1/sqrt(in), 1/sqrt(in)), in_features=1 -> U(-1, 1).
    weight = jax.random.uniform(k_w, (1, 1), dtype=jnp.float32, minval=-1.0, maxval=1.0)
    bias = jax.random.uniform(k_b, (1,), dtype=jnp.float32, minval=-1.0, maxval=1.0)

    # 1) Tiny batch (the module's typical use) -> fused-XLA fallback path.
    N_small = 8
    x_small = jax.random.normal(k_x, (N_small, 1), dtype=jnp.float32)
    out_small = jax.block_until_ready(linear_regression_forward(x_small, weight, bias))
    ref_small = x_small @ weight.T + bias
    assert out_small.shape == (N_small, 1)
    assert jnp.allclose(out_small, ref_small, atol=1e-6), "small-N mismatch vs reference"

    # 2) Batch above the Pallas crossover: 5 grid steps (last one ragged) plus a
    #    128-unaligned tail of 333 elements routed through the XLA path.
    N_large = 4 * _TILE_ROWS * _LANES + _TILE_ROWS * _LANES // 2 + 333
    x_large = jax.random.normal(k_x2, (N_large, 1), dtype=jnp.float32)
    out_large = jax.block_until_ready(linear_regression_forward(x_large, weight, bias))
    ref_large = x_large @ weight.T + bias
    assert out_large.shape == (N_large, 1)
    assert jnp.allclose(out_large, ref_large, atol=1e-6), "large-N mismatch vs reference"

    print("KERNEL_OK")
</pallas_src>

<mosaic_0001>
module attributes {stable_mosaic.version = 11 : i64} {
  func.func @_linreg_kernel(%arg0: i32, %arg1: memref<1xf32, #tpu.memory_space<smem>>, %arg2: memref<1xf32, #tpu.memory_space<smem>>, %arg3: memref<4096x128xf32, #tpu.memory_space<vmem>>, %arg4: memref<4096x128xf32, #tpu.memory_space<vmem>>) attributes {dimension_semantics = [#tpu.dimension_semantics<parallel>], iteration_bounds = array<i64: 5>, scalar_prefetch = 0 : i64, scratch_operands = 0 : i64, tpu.core_type = #tpu.core_type<tc>, window_params = [{transform_indices = @transform_0, window_bounds = array<i64: 1>}, {transform_indices = @transform_1, window_bounds = array<i64: 1>}, {transform_indices = @transform_2, window_bounds = array<i64: 4096, 128>}, {transform_indices = @transform_3, window_bounds = array<i64: 4096, 128>}]} {
    %c0 = arith.constant 0 : index
    %0 = memref.load %arg1[%c0] : memref<1xf32, #tpu.memory_space<smem>>
    %c0_0 = arith.constant 0 : index
    %1 = memref.load %arg2[%c0_0] : memref<1xf32, #tpu.memory_space<smem>>
    %c0_1 = arith.constant 0 : index
    %c0_2 = arith.constant 0 : index
    %2 = vector.load %arg3[%c0_1, %c0_2] : memref<4096x128xf32, #tpu.memory_space<vmem>>, vector<4096x128xf32>
    %3 = vector.broadcast %0 : f32 to vector<4096x128xf32>
    %4 = arith.mulf %2, %3 : vector<4096x128xf32>
    %5 = vector.broadcast %1 : f32 to vector<4096x128xf32>
    %6 = arith.addf %4, %5 : vector<4096x128xf32>
    %c0_3 = arith.constant 0 : index
    %c0_4 = arith.constant 0 : index
    %7 = vector.load %arg4[%c0_3, %c0_4] : memref<4096x128xf32, #tpu.memory_space<vmem>>, vector<4096x128xf32>
    tpu.vector_store %arg4[%c0_3, %c0_4], %6 {strides = array<i32>} : memref<4096x128xf32, #tpu.memory_space<vmem>>, vector<4096x128xf32>,
    return
  }
  func.func @transform_0(%arg0: i32) -> i32 {
    %c0_i32 = arith.constant 0 : i32
    %c0_i32_0 = arith.constant 0 : i32
    return %c0_i32 : i32
  }
  func.func @transform_1(%arg0: i32) -> i32 {
    %c0_i32 = arith.constant 0 : i32
    %c0_i32_0 = arith.constant 0 : i32
    return %c0_i32 : i32
  }
  func.func @transform_2(%arg0: i32) -> (i32, i32) {
    %c0_i32 = arith.constant 0 : i32
    %c0_i32_0 = arith.constant 0 : i32
    return %arg0, %c0_i32 : i32, i32
  }
  func.func @transform_3(%arg0: i32) -> (i32, i32) {
    %c0_i32 = arith.constant 0 : i32
    %c0_i32_0 = arith.constant 0 : i32
    return %arg0, %c0_i32 : i32, i32
  }
}

</mosaic_0001>

<bundles_post_ra>
// kernel: tpu_custom_call.1
= control target key start
LH: loop header
LB: loop body
LE: loop exit
PB: predicated region body
PF: predicated region fallthrough
CT: control target
= control target key end

     0   :  { %s4769_s0 = inlined_call_operand.<no memory space> [shape: f32[1], index: 0, kind: input, shape index: {}]   ;;  %s4770_s1 = inlined_call_operand.<no memory space> [shape: f32[1], index: 1, kind: input, shape index: {}]   ;;  %s4771_s2 = inlined_call_operand.hbm [shape: f32[18432,128], index: 2, kind: input, shape index: {}]   ;;  %s4772_s3 = inlined_call_operand.hbm [shape: f32[18432,128], index: 3, kind: output, shape index: {}]  }
   0x1   :  { %8 = sst [smem:[#allocation2]] %s4769_s0 }
   0x2   :  { %9 = sst [smem:[#allocation3]] %s4770_s1 }
   0x3   :  { %10 = vsyncpa [#allocation5], 0 }
   0x4   :  { %12 = vsyncpa [#allocation5 + $0x1], 0 }
   0x5   :  { %13 = vsyncpa [#allocation6], 0 }
   0x6   :  { %15 = vsyncpa [#allocation6 + $0x1], 0  ;;  %s2543_s16 = smov 0   ;;  %s2545_s17 = smov 0  }
   0x7   :  { %s2547_s18 = smov 0   ;;  %s2549_s19 = smov 0  }
   0x8 LB: > { %s2564_s0 = sadd.s32 4294967295, %s2509_s19   ;;  %s2352_s1 = sadd.s32 4294967294, %s2509_s19   ;;  %s2509_s19 = sphi %s2549_s19, %s4780_s19   ;;  %s2505_s18 = sphi %s2547_s18, %s4779_s18   ;;  %s2501_s17 = sphi %s2545_s17, %s4778_s17   ;;  %s2497_s16 = sphi %s2543_s16, %s4777_s16  }
   0x9   : > { %s2568_s20 = sadd.s32 1, %s2509_s19   ;;  %s70_s21 = sadd.s32 1, %s2505_s18 }
   0xa   : > { %s67_s22 = ssub.s32 %s2509_s19, %s2568_s20  ;;  %p77_p0 = scmp.ne.s32.totalorder %s2505_s18, %s2501_s17 }
   0xb   : > { %p68_p1 = scmp.eq.s32.totalorder %s67_s22, 0  ;;  %p78_p2 = scmp.eq.s32.totalorder %s2509_s19, 0 }
   0xc   : > { %p83_p3 = scmp.ne.s32.totalorder %s2501_s17, %s2497_s16  ;;  %p84_p4 = scmp.eq.s32.totalorder %s2564_s0, 0 }
   0xd   : > { %s2580_s23 = scalar_select %p68_p1, %s2505_s18, %s70_s21  }
   0xe   : > { %p79_p5 = por %p78_p2, %p77_p0  ;;  %p2582_p6 = por %p84_p4, %p83_p3 }
   0xf   : > { %p107_p7 = scmp.eq.s32.totalorder %s2564_s0, 4  ;;  %p113_p8 = scmp.eq.s32.totalorder %s2352_s1, 4 }
  0x10   : > { %p2354_p11 = scmp.ge.s32.totalorder %s2509_s19, 5 }
  0x11   : > { %p2587_p9 = por %p107_p7, %p77_p0  ;;  %p2591_p10 = por %p113_p8, %p83_p3 }
  0x12   : > { %135 = sbr.rel (%p2354_p11) target bundleno = 55 (0x37), region = 24 }
  0x13   : > { %s4775_s26 = scalar_select %p2591_p10, 1, 0 }
  0x17   : > { %138 = sbr.rel (!%p79_p5) target bundleno = 55 (0x37), region = 28  ;;  %s139_s27 = sand.u32 (%p79_p5), 1, %s2505_s18  }
  0x18   : > { %s2356_s28 = sshll.u32 (%p79_p5), %s2509_s19, 9  ;;  %s2355_s29 = sshll.u32 (%p79_p5), %s139_s27, 12 }
  0x19   : > { %s145_s30 = ssub.s32 (%p79_p5), 2304, %s2356_s28  ;;  %s2601_s6 = scalar_lea.sflag (%p79_p5), [#allocation5], %s139_s27 }
  0x1a   : > { %p146_p12 = scmp.lt.s32.totalorder (%p79_p5), %s145_s30, 512  ;;  %s143_s7 = scalar_lea.vmem (%p79_p5), [#allocation4], %s2355_s29 }
  0x1c   : > { %s4782_s30 = smov (!%p146_p12, %s145_s30), 512 }
  0x1d   : > { %s2598_s4 = sshll.u32 %s4782_s30, 7 }
  0x1e   : > { %s150_s5 = ssub.s32 65536, %s2598_s4 }
  0x1f   : > { %151 = vsyncadd %s2601_s6, %s150_s5  ;;  %p2358_p13 = scmp.ne.s32.totalorder %s2598_s4, 0  ;;  %s2374_s8 = sshll.u32 %s2509_s19, 16 }
  0x20   : > { %s2609_s11 = scalar_lea.hbm %s4771_s2, %s2374_s8  ;;  %s156_s12 = sshll.u32 %s143_s7, 4  ;;  %s2611_s12 = int_to_ptr.vmem [resolvable:$true] %s156_s12 }
  0x21   : > { %s2419_s13 = scalar_lea.hbm %s2609_s11, %s2598_s4  ;;  %s2423_s1 = scalar_lea.hbm %s4771_s2, 294912 }
  0x22   : > { %p2420_p0 = scmp.ne.s32.totalorder %s2609_s11, %s2419_s13  ;;  %p2424_p3 = scmp.lt.s32.totalorder %s2609_s11, %s4771_s2 }
  0x23   : > { %p2425_p4 = scmp.lt.s32.totalorder %s2423_s1, %s2419_s13 }
  0x24   : > { %p2421_p1 = pnand %p2420_p0, %p2358_p13 }
  0x25   : > { %p2426_p5 = por %p2425_p4, %p2424_p3 }
  0x26   : > { %p2422_p2 = pneg %p2421_p1 }
  0x28   : > { %p2427_p7 = pnand %p2426_p5, %p2422_p2 }
  0x2a   : > { %2430 = shalt.err (!%p2427_p7)
}
  0x2b   : > { %s2431_s27 = scalar_lea.vmem %s2611_s12, %s2598_s4  ;;  %s2511_s28 = smov [#allocation4]  }
  0x2c   : > { %p2432_p8 = scmp.ne.s32.totalorder %s2611_s12, %s2431_s27  ;;  %s2435_s29 = sshll.u32 %s2511_s28, 4  ;;  %s2436_s29 = int_to_ptr.vmem [resolvable:$false] %s2435_s29 }
  0x2d   : > { %s2437_s30 = scalar_lea.vmem %s2436_s29, 131072  ;;  %p2438_p0 = scmp.lt.s32.totalorder %s2611_s12, %s2436_s29 }
  0x2e   : > { %p2433_p11 = pnand %p2432_p8, %p2358_p13  ;;  %p2439_p1 = scmp.lt.s32.totalorder %s2437_s30, %s2431_s27 }
  0x30   : > { %p2434_p12 = pneg %p2433_p11  ;;  %p2440_p10 = por %p2439_p1, %p2438_p0 }
  0x32   : > { %p2441_p3 = pnand %p2440_p10, %p2434_p12 }
  0x34   : > { %2444 = shalt.err (!%p2441_p3)
}
  0x35   : > { %s2512_s5 = smov 128   ;;  %s2513_s7 = smov 8  }
  0x36   : > { %162 = dma.hbm_to_vmem [thread:$0]  (%p2358_p13), %s2609_s11, %s2598_s4, %s2611_s12, %s2601_s6, %s2512_s5, %s2512_s5, %s2513_s7  }
  0x37 PF: > { %p2362_p2 = scmp.ge.s32.totalorder %s2509_s19, 1  ;;  %p164_p4 = scmp.lt.s32.totalorder %s2509_s19, 6 }
  0x39   : > { %p165_p5 = pnand %p2362_p2, %p164_p4 }
  0x3a   : > { %s2640_s8 = sand.u32 (!%p165_p5), 1, %s2501_s17  }
  0x3b   : > { %168 = sbr.rel (%p165_p5) target bundleno = 409 (0x199), region = 32  ;;  %s2363_s9 = sshll.u32 (!%p165_p5), %s2640_s8, 12 }
  0x3c   : > { %s171_s10 = scalar_lea.sflag (!%p165_p5), [#allocation5], %s2640_s8  ;;  %s2646_s13 = scalar_lea.vmem (!%p165_p5), [#allocation4], %s2363_s9 }
  0x40   : > { %2488 = dma.done.wait (%p2582_p6), %s171_s10, 65536  }
  0x41   : > { %2490 = vsyncadd (%p2582_p6), %s171_s10, 4294901760  ;;  %s207_s4 = sld [smem:[#allocation2]]  ;;  %v209_v0 = vld [vmem:[%s2646_s13] sm:$0xff]  ;;  %v210_v2 = vld [vmem:[%s2646_s13 + $0x8] sm:$0xff]  ;;  %s2687_s24 = scalar_lea.vmem [#allocation7], %s2363_s9 }
  0x42   : > { %s208_s6 = sld [smem:[#allocation3]]  ;;  %v211_v3 = vld [vmem:[%s2646_s13 + $0x10] sm:$0xff]  ;;  %v212_v8 = vld [vmem:[%s2646_s13 + $0x18] sm:$0xff]  ;;  %v213_v9 = vld [vmem:[%s2646_s13 + $0x20] sm:$0xff]  ;;  %s2260_s11 = scalar_lea.sflag [#allocation6], %s2640_s8 }
  0x43   : > { %v214_v10 = vld [vmem:[%s2646_s13 + $0x28] sm:$0xff]  ;;  %v215_v14 = vld [vmem:[%s2646_s13 + $0x30] sm:$0xff]  ;;  %v216_v15 = vld [vmem:[%s2646_s13 + $0x38] sm:$0xff]  ;;  %s2366_s12 = sshll.u32 (%p2587_p9), %s2564_s0, 9 }
  0x44   : > { %v217_v16 = vld [vmem:[%s2646_s13 + $0x40] sm:$0xff]  ;;  %v218_v21 = vld [vmem:[%s2646_s13 + $0x48] sm:$0xff]  ;;  %v219_v22 = vld [vmem:[%s2646_s13 + $0x50] sm:$0xff]  ;;  %s2268_s14 = ssub.s32 (%p2587_p9), 2304, %s2366_s12 }
  0x45   : > { %v220_v23 = vld [vmem:[%s2646_s13 + $0x58] sm:$0xff]  ;;  %v221_v28 = vld [vmem:[%s2646_s13 + $0x60] sm:$0xff]  ;;  %v222_v29 = vld [vmem:[%s2646_s13 + $0x68] sm:$0xff]  ;;  %p2269_p6 = scmp.lt.s32.totalorder (%p2587_p9), %s2268_s14, 512 }
  0x46   : > { %v223_v30 = vld [vmem:[%s2646_s13 + $0x70] sm:$0xff]  ;;  %v224_v35 = vld [vmem:[%s2646_s13 + $0x78] sm:$0xff]  ;;  %v225_v40 = vld [vmem:[%s2646_s13 + $0x80] sm:$0xff] }
  0x47   : > { %v2653_v1 = vstv %s207_s4  ;;  %v226_v41 = vld [vmem:[%s2646_s13 + $0x88] sm:$0xff]  ;;  %v227_v42 = vld [vmem:[%s2646_s13 + $0x90] sm:$0xff]  ;;  %v228_v47 = vld [vmem:[%s2646_s13 + $0x98] sm:$0xff] }
  0x48   : > { %v722_v4 = vmul.f32 %v2653_v1, %v209_v0  ;;  %v2658_v5 = vstv %s208_s6  ;;  %v723_v6 = vmul.f32 %v2653_v1, %v210_v2  ;;  %v724_v7 = vmul.f32 %v2653_v1, %v211_v3  ;;  %v229_v48 = vld [vmem:[%s2646_s13 + $0xa0] sm:$0xff]  ;;  %v230_v49 = vld [vmem:[%s2646_s13 + $0xa8] sm:$0xff]  ;;  %v231_v54 = vld [vmem:[%s2646_s13 + $0xb0] sm:$0xff] }
  0x49   : > { %v725_v11 = vmul.f32 %v2653_v1, %v212_v8  ;;  %v726_v12 = vmul.f32 %v2653_v1, %v213_v9  ;;  %v727_v13 = vmul.f32 %v2653_v1, %v214_v10  ;;  %v728_v20 = vmul.f32 %v2653_v1, %v215_v14  ;;  %v232_v59 = vld [vmem:[%s2646_s13 + $0xb8] sm:$0xff]  ;;  %v233_v0 = vld [vmem:[%s2646_s13 + $0xc0] sm:$0xff]  ;;  %v234_v2 = vld [vmem:[%s2646_s13 + $0xc8] sm:$0xff] }
  0x4a   : > { %v1235_v17 = vadd.f32 %v2658_v5, %v722_v4  ;;  %v1236_v18 = vadd.f32 %v2658_v5, %v723_v6  ;;  %v1237_v19 = vadd.f32 %v2658_v5, %v724_v7  ;;  %v729_v27 = vmul.f32 %v2653_v1, %v216_v15  ;;  %v235_v3 = vld [vmem:[%s2646_s13 + $0xd0] sm:$0xff]  ;;  %v236_v9 = vld [vmem:[%s2646_s13 + $0xd8] sm:$0xff]  ;;  %v237_v10 = vld [vmem:[%s2646_s13 + $0xe0] sm:$0xff] }
  0x4b   : > { %v1238_v24 = vadd.f32 %v2658_v5, %v725_v11  ;;  %v1239_v25 = vadd.f32 %v2658_v5, %v726_v12  ;;  %v1240_v26 = vadd.f32 %v2658_v5, %v727_v13  ;;  %v1241_v31 = vadd.f32 %v2658_v5, %v728_v20  ;;  %v238_v11 = vld [vmem:[%s2646_s13 + $0xe8] sm:$0xff] }
  0x4c   : > { %1747 = vst [vmem:[%s2687_s24] sm:$0xff] %v1235_v17  ;;  %1748 = vst [vmem:[%s2687_s24 + $0x8] sm:$0xff] %v1236_v18  ;;  %v730_v32 = vmul.f32 %v2653_v1, %v217_v16  ;;  %v731_v33 = vmul.f32 %v2653_v1, %v218_v21  ;;  %v732_v34 = vmul.f32 %v2653_v1, %v219_v22  ;;  %v239_v16 = vld [vmem:[%s2646_s13 + $0xf0] sm:$0xff]  ;;  %v240_v21 = vld [vmem:[%s2646_s13 + $0xf8] sm:$0xff] }
  0x4d   : > { %1749 = vst [vmem:[%s2687_s24 + $0x10] sm:$0xff] %v1237_v19  ;;  %1750 = vst [vmem:[%s2687_s24 + $0x18] sm:$0xff] %v1238_v24  ;;  %v1242_v36 = vadd.f32 %v2658_v5, %v729_v27  ;;  %v733_v37 = vmul.f32 %v2653_v1, %v220_v23  ;;  %v734_v38 = vmul.f32 %v2653_v1, %v221_v28  ;;  %v242_v27 = vld [vmem:[%s2646_s13 + $0x108] sm:$0xff]  ;;  %v243_v28 = vld [vmem:[%s2646_s13 + $0x110] sm:$0xff] }
  0x4e   : > { %1751 = vst [vmem:[%s2687_s24 + $0x20] sm:$0xff] %v1239_v25  ;;  %1752 = vst [vmem:[%s2687_s24 + $0x28] sm:$0xff] %v1240_v26  ;;  %v735_v39 = vmul.f32 %v2653_v1, %v222_v29  ;;  %v1243_v43 = vadd.f32 %v2658_v5, %v730_v32  ;;  %v1244_v44 = vadd.f32 %v2658_v5, %v731_v33  ;;  %v241_v26 = vld [vmem:[%s2646_s13 + $0x100] sm:$0xff]  ;;  %v244_v33 = vld [vmem:[%s2646_s13 + $0x118] sm:$0xff] }
  0x4f   : > { %1753 = vst [vmem:[%s2687_s24 + $0x30] sm:$0xff] %v1241_v31  ;;  %v1245_v45 = vadd.f32 %v2658_v5, %v732_v34  ;;  %v736_v46 = vmul.f32 %v2653_v1, %v223_v30  ;;  %1754 = vst [vmem:[%s2687_s24 + $0x38] sm:$0xff] %v1242_v36  ;;  %v1246_v50 = vadd.f32 %v2658_v5, %v733_v37  ;;  %v245_v34 = vld [vmem:[%s2646_s13 + $0x120] sm:$0xff] }
  0x50   : > { %v1247_v51 = vadd.f32 %v2658_v5, %v734_v38  ;;  %v1248_v52 = vadd.f32 %v2658_v5, %v735_v39  ;;  %v737_v53 = vmul.f32 %v2653_v1, %v224_v35  ;;  %1755 = vst [vmem:[%s2687_s24 + $0x40] sm:$0xff] %v1243_v43  ;;  %1756 = vst [vmem:[%s2687_s24 + $0x48] sm:$0xff] %v1244_v44  ;;  %v246_v35 = vld [vmem:[%s2646_s13 + $0x128] sm:$0xff] }
  0x51   : > { %1757 = vst [vmem:[%s2687_s24 + $0x50] sm:$0xff] %v1245_v45  ;;  %v1249_v55 = vadd.f32 %v2658_v5, %v736_v46  ;;  %v738_v56 = vmul.f32 %v2653_v1, %v225_v40  ;;  %v739_v57 = vmul.f32 %v2653_v1, %v226_v41  ;;  %v740_v58 = vmul.f32 %v2653_v1, %v227_v42  ;;  %v247_v40 = vld [vmem:[%s2646_s13 + $0x130] sm:$0xff]  ;;  %v248_v45 = vld [vmem:[%s2646_s13 + $0x138] sm:$0xff] }
  0x52   : > { %1758 = vst [vmem:[%s2687_s24 + $0x58] sm:$0xff] %v1246_v50  ;;  %1759 = vst [vmem:[%s2687_s24 + $0x60] sm:$0xff] %v1247_v51  ;;  %v1250_v60 = vadd.f32 %v2658_v5, %v737_v53  ;;  %v741_v61 = vmul.f32 %v2653_v1, %v228_v47  ;;  %v742_v62 = vmul.f32 %v2653_v1, %v229_v48  ;;  %v249_v50 = vld [vmem:[%s2646_s13 + $0x140] sm:$0xff]  ;;  %v250_v51 = vld [vmem:[%s2646_s13 + $0x148] sm:$0xff] }
  0x53   : > { %1760 = vst [vmem:[%s2687_s24 + $0x68] sm:$0xff] %v1248_v52  ;;  %v743_v63 = vmul.f32 %v2653_v1, %v230_v49  ;;  %1761 = vst [vmem:[%s2687_s24 + $0x70] sm:$0xff] %v1249_v55  ;;  %v1251_v4 = vadd.f32 %v2658_v5, %v738_v56  ;;  %v1252_v6 = vadd.f32 %v2658_v5, %v739_v57  ;;  %v251_v52 = vld [vmem:[%s2646_s13 + $0x150] sm:$0xff]  ;;  %v252_v57 = vld [vmem:[%s2646_s13 + $0x158] sm:$0xff] }
  0x54   : > { %v1253_v7 = vadd.f32 %v2658_v5, %v740_v58  ;;  %v744_v8 = vmul.f32 %v2653_v1, %v231_v54  ;;  %1762 = vst [vmem:[%s2687_s24 + $0x78] sm:$0xff] %v1250_v60  ;;  %v1254_v12 = vadd.f32 %v2658_v5, %v741_v61  ;;  %v1255_v13 = vadd.f32 %v2658_v5, %v742_v62  ;;  %v253_v58 = vld [vmem:[%s2646_s13 + $0x160] sm:$0xff] }
  0x55   : > { %v1256_v14 = vadd.f32 %v2658_v5, %v743_v63  ;;  %v745_v15 = vmul.f32 %v2653_v1, %v232_v59  ;;  %1763 = vst [vmem:[%s2687_s24 + $0x80] sm:$0xff] %v1251_v4  ;;  %1764 = vst [vmem:[%s2687_s24 + $0x88] sm:$0xff] %v1252_v6  ;;  %v746_v18 = vmul.f32 %v2653_v1, %v233_v0  ;;  %v254_v59 = vld [vmem:[%s2646_s13 + $0x168] sm:$0xff]  ;;  %v255_v0 = vld [vmem:[%s2646_s13 + $0x170] sm:$0xff] }
  0x56   : > { %1765 = vst [vmem:[%s2687_s24 + $0x90] sm:$0xff] %v1253_v7  ;;  %v1257_v17 = vadd.f32 %v2658_v5, %v744_v8  ;;  %v747_v19 = vmul.f32 %v2653_v1, %v234_v2  ;;  %v748_v20 = vmul.f32 %v2653_v1, %v235_v3  ;;  %1766 = vst [vmem:[%s2687_s24 + $0x98] sm:$0xff] %v1254_v12  ;;  %v256_v7 = vld [vmem:[%s2646_s13 + $0x178] sm:$0xff]  ;;  %v257_v12 = vld [vmem:[%s2646_s13 + $0x180] sm:$0xff] }
  0x57   : > { %1767 = vst [vmem:[%s2687_s24 + $0xa0] sm:$0xff] %v1255_v13  ;;  %1768 = vst [vmem:[%s2687_s24 + $0xa8] sm:$0xff] %v1256_v14  ;;  %v1258_v22 = vadd.f32 %v2658_v5, %v745_v15  ;;  %v749_v23 = vmul.f32 %v2653_v1, %v236_v9  ;;  %v750_v24 = vmul.f32 %v2653_v1, %v237_v10  ;;  %v258_v13 = vld [vmem:[%s2646_s13 + $0x188] sm:$0xff]  ;;  %v259_v14 = vld [vmem:[%s2646_s13 + $0x190] sm:$0xff] }
  0x58   : > { %v751_v25 = vmul.f32 %v2653_v1, %v238_v11  ;;  %1769 = vst [vmem:[%s2687_s24 + $0xb0] sm:$0xff] %v1257_v17  ;;  %v1259_v29 = vadd.f32 %v2658_v5, %v746_v18  ;;  %v1260_v30 = vadd.f32 %v2658_v5, %v747_v19  ;;  %v1261_v31 = vadd.f32 %v2658_v5, %v748_v20  ;;  %v260_v19 = vld [vmem:[%s2646_s13 + $0x198] sm:$0xff]  ;;  %v261_v20 = vld [vmem:[%s2646_s13 + $0x1a0] sm:$0xff] }
  0x59   : > { %v752_v32 = vmul.f32 %v2653_v1, %v239_v16  ;;  %1770 = vst [vmem:[%s2687_s24 + $0xb8] sm:$0xff] %v1258_v22  ;;  %v1262_v36 = vadd.f32 %v2658_v5, %v749_v23  ;;  %v1263_v37 = vadd.f32 %v2658_v5, %v750_v24  ;;  %v753_v39 = vmul.f32 %v2653_v1, %v240_v21  ;;  %v262_v21 = vld [vmem:[%s2646_s13 + $0x1a8] sm:$0xff] }
  0x5a   : > { %v1264_v38 = vadd.f32 %v2658_v5, %v751_v25  ;;  %1771 = vst [vmem:[%s2687_s24 + $0xc0] sm:$0xff] %v1259_v29  ;;  %1772 = vst [vmem:[%s2687_s24 + $0xc8] sm:$0xff] %v1260_v30  ;;  %v754_v42 = vmul.f32 %v2653_v1, %v241_v26  ;;  %v755_v43 = vmul.f32 %v2653_v1, %v242_v27  ;;  %v263_v26 = vld [vmem:[%s2646_s13 + $0x1b0] sm:$0xff] }
  0x5b   : > { %1773 = vst [vmem:[%s2687_s24 + $0xd0] sm:$0xff] %v1261_v31  ;;  %v1265_v41 = vadd.f32 %v2658_v5, %v752_v32  ;;  %v756_v44 = vmul.f32 %v2653_v1, %v243_v28  ;;  %1774 = vst [vmem:[%s2687_s24 + $0xd8] sm:$0xff] %v1262_v36  ;;  %v1266_v46 = vadd.f32 %v2658_v5, %v753_v39  ;;  %v264_v31 = vld [vmem:[%s2646_s13 + $0x1b8] sm:$0xff]  ;;  %v265_v36 = vld [vmem:[%s2646_s13 + $0x1c0] sm:$0xff] }
  0x5c   : > { %1775 = vst [vmem:[%s2687_s24 + $0xe0] sm:$0xff] %v1263_v37  ;;  %1776 = vst [vmem:[%s2687_s24 + $0xe8] sm:$0xff] %v1264_v38  ;;  %v757_v47 = vmul.f32 %v2653_v1, %v244_v33  ;;  %v758_v48 = vmul.f32 %v2653_v1, %v245_v34  ;;  %v759_v49 = vmul.f32 %v2653_v1, %v246_v35  ;;  %v266_v37 = vld [vmem:[%s2646_s13 + $0x1c8] sm:$0xff]  ;;  %v267_v38 = vld [vmem:[%s2646_s13 + $0x1d0] sm:$0xff] }
  0x5d   : > { %1777 = vst [vmem:[%s2687_s24 + $0xf0] sm:$0xff] %v1265_v41  ;;  %v1267_v53 = vadd.f32 %v2658_v5, %v754_v42  ;;  %v1268_v54 = vadd.f32 %v2658_v5, %v755_v43  ;;  %v1269_v55 = vadd.f32 %v2658_v5, %v756_v44  ;;  %v760_v56 = vmul.f32 %v2653_v1, %v247_v40  ;;  %v268_v43 = vld [vmem:[%s2646_s13 + $0x1d8] sm:$0xff]  ;;  %v269_v44 = vld [vmem:[%s2646_s13 + $0x1e0] sm:$0xff] }
  0x5e   : > { %1778 = vst [vmem:[%s2687_s24 + $0xf8] sm:$0xff] %v1266_v46  ;;  %v1270_v60 = vadd.f32 %v2658_v5, %v757_v47  ;;  %v1271_v61 = vadd.f32 %v2658_v5, %v758_v48  ;;  %v1272_v62 = vadd.f32 %v2658_v5, %v759_v49  ;;  %v761_v63 = vmul.f32 %v2653_v1, %v248_v45  ;;  %v270_v45 = vld [vmem:[%s2646_s13 + $0x1e8] sm:$0xff] }
  0x5f   : > { %1779 = vst [vmem:[%s2687_s24 + $0x100] sm:$0xff] %v1267_v53  ;;  %1780 = vst [vmem:[%s2687_s24 + $0x108] sm:$0xff] %v1268_v54  ;;  %v1273_v2 = vadd.f32 %v2658_v5, %v760_v56  ;;  %v762_v3 = vmul.f32 %v2653_v1, %v249_v50  ;;  %v763_v4 = vmul.f32 %v2653_v1, %v250_v51  ;;  %v271_v50 = vld [vmem:[%s2646_s13 + $0x1f0] sm:$0xff] }
  0x60   : > { %1781 = vst [vmem:[%s2687_s24 + $0x110] sm:$0xff] %v1269_v55  ;;  %v764_v6 = vmul.f32 %v2653_v1, %v251_v52  ;;  %1782 = vst [vmem:[%s2687_s24 + $0x118] sm:$0xff] %v1270_v60  ;;  %v1274_v8 = vadd.f32 %v2658_v5, %v761_v63  ;;  %v765_v9 = vmul.f32 %v2653_v1, %v252_v57  ;;  %v272_v55 = vld [vmem:[%s2646_s13 + $0x1f8] sm:$0xff]  ;;  %v273_v60 = vld [vmem:[%s2646_s13 + $0x200] sm:$0xff] }
  0x61   : > { %1783 = vst [vmem:[%s2687_s24 + $0x120] sm:$0xff] %v1271_v61  ;;  %1784 = vst [vmem:[%s2687_s24 + $0x128] sm:$0xff] %v1272_v62  ;;  %v766_v10 = vmul.f32 %v2653_v1, %v253_v58  ;;  %v767_v11 = vmul.f32 %v2653_v1, %v254_v59  ;;  %v1275_v15 = vadd.f32 %v2658_v5, %v762_v3  ;;  %v274_v61 = vld [vmem:[%s2646_s13 + $0x208] sm:$0xff]  ;;  %v275_v62 = vld [vmem:[%s2646_s13 + $0x210] sm:$0xff] }
  0x62   : > { %1785 = vst [vmem:[%s2687_s24 + $0x130] sm:$0xff] %v1273_v2  ;;  %v1276_v16 = vadd.f32 %v2658_v5, %v763_v4  ;;  %v1277_v17 = vadd.f32 %v2658_v5, %v764_v6  ;;  %v768_v18 = vmul.f32 %v2653_v1, %v255_v0  ;;  %1786 = vst [vmem:[%s2687_s24 + $0x138] sm:$0xff] %v1274_v8  ;;  %v276_v4 = vld [vmem:[%s2646_s13 + $0x218] sm:$0xff]  ;;  %v277_v6 = vld [vmem:[%s2646_s13 + $0x220] sm:$0xff] }
  0x63   : > { %v1278_v22 = vadd.f32 %v2658_v5, %v765_v9  ;;  %v1279_v23 = vadd.f32 %v2658_v5, %v766_v10  ;;  %v1280_v24 = vadd.f32 %v2658_v5, %v767_v11  ;;  %v769_v25 = vmul.f32 %v2653_v1, %v256_v7  ;;  %1787 = vst [vmem:[%s2687_s24 + $0x140] sm:$0xff] %v1275_v15  ;;  %v278_v7 = vld [vmem:[%s2646_s13 + $0x228] sm:$0xff] }
  0x64   : > { %1788 = vst [vmem:[%s2687_s24 + $0x148] sm:$0xff] %v1276_v16  ;;  %1789 = vst [vmem:[%s2687_s24 + $0x150] sm:$0xff] %v1277_v17  ;;  %v1281_v27 = vadd.f32 %v2658_v5, %v768_v18  ;;  %v770_v28 = vmul.f32 %v2653_v1, %v257_v12  ;;  %v771_v29 = vmul.f32 %v2653_v1, %v258_v13  ;;  %v279_v12 = vld [vmem:[%s2646_s13 + $0x230] sm:$0xff]  ;;  %v280_v17 = vld [vmem:[%s2646_s13 + $0x238] sm:$0xff] }
  0x65   : > { %v772_v30 = vmul.f32 %v2653_v1, %v259_v14  ;;  %1790 = vst [vmem:[%s2687_s24 + $0x158] sm:$0xff] %v1278_v22  ;;  %1791 = vst [vmem:[%s2687_s24 + $0x160] sm:$0xff] %v1279_v23  ;;  %v1282_v32 = vadd.f32 %v2658_v5, %v769_v25  ;;  %v773_v33 = vmul.f32 %v2653_v1, %v260_v19  ;;  %v281_v22 = vld [vmem:[%s2646_s13 + $0x240] sm:$0xff]  ;;  %v282_v23 = vld [vmem:[%s2646_s13 + $0x248] sm:$0xff] }
  0x66   : > { %1792 = vst [vmem:[%s2687_s24 + $0x168] sm:$0xff] %v1280_v24  ;;  %v774_v34 = vmul.f32 %v2653_v1, %v261_v20  ;;  %v775_v35 = vmul.f32 %v2653_v1, %v262_v21  ;;  %1793 = vst [vmem:[%s2687_s24 + $0x170] sm:$0xff] %v1281_v27  ;;  %v1283_v39 = vadd.f32 %v2658_v5, %v770_v28  ;;  %v283_v24 = vld [vmem:[%s2646_s13 + $0x250] sm:$0xff] }
  0x67   : > { %v1284_v40 = vadd.f32 %v2658_v5, %v771_v29  ;;  %v1285_v41 = vadd.f32 %v2658_v5, %v772_v30  ;;  %v776_v42 = vmul.f32 %v2653_v1, %v263_v26  ;;  %1794 = vst [vmem:[%s2687_s24 + $0x178] sm:$0xff] %v1282_v32  ;;  %v1286_v46 = vadd.f32 %v2658_v5, %v773_v33  ;;  %v284_v29 = vld [vmem:[%s2646_s13 + $0x258] sm:$0xff]  ;;  %v285_v30 = vld [vmem:[%s2646_s13 + $0x260] sm:$0xff] }
  0x68   : > { %v1287_v47 = vadd.f32 %v2658_v5, %v774_v34  ;;  %v1288_v48 = vadd.f32 %v2658_v5, %v775_v35  ;;  %v777_v49 = vmul.f32 %v2653_v1, %v264_v31  ;;  %1795 = vst [vmem:[%s2687_s24 + $0x180] sm:$0xff] %v1283_v39  ;;  %v778_v52 = vmul.f32 %v2653_v1, %v265_v36  ;;  %v286_v31 = vld [vmem:[%s2646_s13 + $0x268] sm:$0xff]  ;;  %v287_v36 = vld [vmem:[%s2646_s13 + $0x270] sm:$0xff] }
  0x69   : > { %1796 = vst [vmem:[%s2687_s24 + $0x188] sm:$0xff] %v1284_v40  ;;  %1797 = vst [vmem:[%s2687_s24 + $0x190] sm:$0xff] %v1285_v41  ;;  %v1289_v51 = vadd.f32 %v2658_v5, %v776_v42  ;;  %v779_v53 = vmul.f32 %v2653_v1, %v266_v37  ;;  %v780_v54 = vmul.f32 %v2653_v1, %v267_v38  ;;  %v288_v41 = vld [vmem:[%s2646_s13 + $0x278] sm:$0xff] }
  0x6a   : > { %1798 = vst [vmem:[%s2687_s24 + $0x198] sm:$0xff] %v1286_v46  ;;  %1799 = vst [vmem:[%s2687_s24 + $0x1a0] sm:$0xff] %v1287_v47  ;;  %v1290_v56 = vadd.f32 %v2658_v5, %v777_v49  ;;  %v781_v57 = vmul.f32 %v2653_v1, %v268_v43  ;;  %v782_v58 = vmul.f32 %v2653_v1, %v269_v44  ;;  %v289_v46 = vld [vmem:[%s2646_s13 + $0x280] sm:$0xff]  ;;  %v290_v47 = vld [vmem:[%s2646_s13 + $0x288] sm:$0xff] }
  0x6b   : > { %1800 = vst [vmem:[%s2687_s24 + $0x1a8] sm:$0xff] %v1288_v48  ;;  %v783_v59 = vmul.f32 %v2653_v1, %v270_v45  ;;  %1801 = vst [vmem:[%s2687_s24 + $0x1b0] sm:$0xff] %v1289_v51  ;;  %v1291_v63 = vadd.f32 %v2658_v5, %v778_v52  ;;  %v1292_v0 = vadd.f32 %v2658_v5, %v779_v53  ;;  %v291_v48 = vld [vmem:[%s2646_s13 + $0x290] sm:$0xff]  ;;  %v292_v53 = vld [vmem:[%s2646_s13 + $0x298] sm:$0xff] }
  0x6c   : > { %v1293_v2 = vadd.f32 %v2658_v5, %v780_v54  ;;  %v784_v3 = vmul.f32 %v2653_v1, %v271_v50  ;;  %1802 = vst [vmem:[%s2687_s24 + $0x1b8] sm:$0xff] %v1290_v56  ;;  %v1294_v8 = vadd.f32 %v2658_v5, %v781_v57  ;;  %v1295_v9 = vadd.f32 %v2658_v5, %v782_v58  ;;  %v293_v54 = vld [vmem:[%s2646_s13 + $0x2a0] sm:$0xff] }
  0x6d   : > { %v1296_v10 = vadd.f32 %v2658_v5, %v783_v59  ;;  %v785_v11 = vmul.f32 %v2653_v1, %v272_v55  ;;  %1803 = vst [vmem:[%s2687_s24 + $0x1c0] sm:$0xff] %v1291_v63  ;;  %1804 = vst [vmem:[%s2687_s24 + $0x1c8] sm:$0xff] %v1292_v0  ;;  %v786_v14 = vmul.f32 %v2653_v1, %v273_v60  ;;  %v294_v55 = vld [vmem:[%s2646_s13 + $0x2a8] sm:$0xff]  ;;  %v295_v60 = vld [vmem:[%s2646_s13 + $0x2b0] sm:$0xff] }
  0x6e   : > { %1805 = vst [vmem:[%s2687_s24 + $0x1d0] sm:$0xff] %v1293_v2  ;;  %v1297_v13 = vadd.f32 %v2658_v5, %v784_v3  ;;  %v787_v15 = vmul.f32 %v2653_v1, %v274_v61  ;;  %v788_v16 = vmul.f32 %v2653_v1, %v275_v62  ;;  %1806 = vst [vmem:[%s2687_s24 + $0x1d8] sm:$0xff] %v1294_v8  ;;  %v296_v2 = vld [vmem:[%s2646_s13 + $0x2b8] sm:$0xff]  ;;  %v297_v8 = vld [vmem:[%s2646_s13 + $0x2c0] sm:$0xff] }
  0x6f   : > { %1807 = vst [vmem:[%s2687_s24 + $0x1e0] sm:$0xff] %v1295_v9  ;;  %1808 = vst [vmem:[%s2687_s24 + $0x1e8] sm:$0xff] %v1296_v10  ;;  %v1298_v18 = vadd.f32 %v2658_v5, %v785_v11  ;;  %v789_v19 = vmul.f32 %v2653_v1, %v276_v4  ;;  %v790_v20 = vmul.f32 %v2653_v1, %v277_v6  ;;  %v298_v9 = vld [vmem:[%s2646_s13 + $0x2c8] sm:$0xff]  ;;  %v299_v10 = vld [vmem:[%s2646_s13 + $0x2d0] sm:$0xff] }
  0x70   : > { %v791_v21 = vmul.f32 %v2653_v1, %v278_v7  ;;  %1809 = vst [vmem:[%s2687_s24 + $0x1f0] sm:$0xff] %v1297_v13  ;;  %v1299_v25 = vadd.f32 %v2658_v5, %v786_v14  ;;  %v1300_v26 = vadd.f32 %v2658_v5, %v787_v15  ;;  %v1301_v27 = vadd.f32 %v2658_v5, %v788_v16  ;;  %v300_v15 = vld [vmem:[%s2646_s13 + $0x2d8] sm:$0xff]  ;;  %v301_v16 = vld [vmem:[%s2646_s13 + $0x2e0] sm:$0xff] }
  0x71   : > { %v792_v28 = vmul.f32 %v2653_v1, %v279_v12  ;;  %1810 = vst [vmem:[%s2687_s24 + $0x1f8] sm:$0xff] %v1298_v18  ;;  %v1302_v32 = vadd.f32 %v2658_v5, %v789_v19  ;;  %v1303_v33 = vadd.f32 %v2658_v5, %v790_v20  ;;  %v793_v35 = vmul.f32 %v2653_v1, %v280_v17  ;;  %v302_v17 = vld [vmem:[%s2646_s13 + $0x2e8] sm:$0xff] }
  0x72   : > { %v1304_v34 = vadd.f32 %v2658_v5, %v791_v21  ;;  %1811 = vst [vmem:[%s2687_s24 + $0x200] sm:$0xff] %v1299_v25  ;;  %1812 = vst [vmem:[%s2687_s24 + $0x208] sm:$0xff] %v1300_v26  ;;  %v794_v38 = vmul.f32 %v2653_v1, %v281_v22  ;;  %v795_v39 = vmul.f32 %v2653_v1, %v282_v23  ;;  %v303_v22 = vld [vmem:[%s2646_s13 + $0x2f0] sm:$0xff] }
  0x73   : > { %1813 = vst [vmem:[%s2687_s24 + $0x210] sm:$0xff] %v1301_v27  ;;  %v1305_v37 = vadd.f32 %v2658_v5, %v792_v28  ;;  %v796_v40 = vmul.f32 %v2653_v1, %v283_v24  ;;  %1814 = vst [vmem:[%s2687_s24 + $0x218] sm:$0xff] %v1302_v32  ;;  %v1306_v42 = vadd.f32 %v2658_v5, %v793_v35  ;;  %v304_v27 = vld [vmem:[%s2646_s13 + $0x2f8] sm:$0xff]  ;;  %v305_v32 = vld [vmem:[%s2646_s13 + $0x300] sm:$0xff] }
  0x74   : > { %1815 = vst [vmem:[%s2687_s24 + $0x220] sm:$0xff] %v1303_v33  ;;  %1816 = vst [vmem:[%s2687_s24 + $0x228] sm:$0xff] %v1304_v34  ;;  %v797_v43 = vmul.f32 %v2653_v1, %v284_v29  ;;  %v798_v44 = vmul.f32 %v2653_v1, %v285_v30  ;;  %v799_v45 = vmul.f32 %v2653_v1, %v286_v31  ;;  %v306_v33 = vld [vmem:[%s2646_s13 + $0x308] sm:$0xff]  ;;  %v307_v34 = vld [vmem:[%s2646_s13 + $0x310] sm:$0xff] }
  0x75   : > { %1817 = vst [vmem:[%s2687_s24 + $0x230] sm:$0xff] %v1305_v37  ;;  %v1307_v49 = vadd.f32 %v2658_v5, %v794_v38  ;;  %v1308_v50 = vadd.f32 %v2658_v5, %v795_v39  ;;  %v1309_v51 = vadd.f32 %v2658_v5, %v796_v40  ;;  %v800_v52 = vmul.f32 %v2653_v1, %v287_v36  ;;  %v308_v39 = vld [vmem:[%s2646_s13 + $0x318] sm:$0xff]  ;;  %v309_v40 = vld [vmem:[%s2646_s13 + $0x320] sm:$0xff] }
  0x76   : > { %1818 = vst [vmem:[%s2687_s24 + $0x238] sm:$0xff] %v1306_v42  ;;  %v1310_v56 = vadd.f32 %v2658_v5, %v797_v43  ;;  %v1311_v57 = vadd.f32 %v2658_v5, %v798_v44  ;;  %v1312_v58 = vadd.f32 %v2658_v5, %v799_v45  ;;  %v801_v59 = vmul.f32 %v2653_v1, %v288_v41  ;;  %v310_v41 = vld [vmem:[%s2646_s13 + $0x328] sm:$0xff] }
  0x77   : > { %1819 = vst [vmem:[%s2687_s24 + $0x240] sm:$0xff] %v1307_v49  ;;  %1820 = vst [vmem:[%s2687_s24 + $0x248] sm:$0xff] %v1308_v50  ;;  %v1313_v61 = vadd.f32 %v2658_v5, %v800_v52  ;;  %v802_v62 = vmul.f32 %v2653_v1, %v289_v46  ;;  %v803_v63 = vmul.f32 %v2653_v1, %v290_v47  ;;  %v311_v46 = vld [vmem:[%s2646_s13 + $0x330] sm:$0xff] }
  0x78   : > { %1821 = vst [vmem:[%s2687_s24 + $0x250] sm:$0xff] %v1309_v51  ;;  %v804_v0 = vmul.f32 %v2653_v1, %v291_v48  ;;  %1822 = vst [vmem:[%s2687_s24 + $0x258] sm:$0xff] %v1310_v56  ;;  %v1314_v3 = vadd.f32 %v2658_v5, %v801_v59  ;;  %v805_v4 = vmul.f32 %v2653_v1, %v292_v53  ;;  %v312_v51 = vld [vmem:[%s2646_s13 + $0x338] sm:$0xff]  ;;  %v313_v56 = vld [vmem:[%s2646_s13 + $0x340] sm:$0xff] }
  0x79   : > { %1823 = vst [vmem:[%s2687_s24 + $0x260] sm:$0xff] %v1311_v57  ;;  %1824 = vst [vmem:[%s2687_s24 + $0x268] sm:$0xff] %v1312_v58  ;;  %v806_v6 = vmul.f32 %v2653_v1, %v293_v54  ;;  %v807_v7 = vmul.f32 %v2653_v1, %v294_v55  ;;  %v1315_v11 = vadd.f32 %v2658_v5, %v802_v62  ;;  %v314_v57 = vld [vmem:[%s2646_s13 + $0x348] sm:$0xff]  ;;  %v315_v58 = vld [vmem:[%s2646_s13 + $0x350] sm:$0xff] }
  0x7a   : > { %1825 = vst [vmem:[%s2687_s24 + $0x270] sm:$0xff] %v1313_v61  ;;  %v1316_v12 = vadd.f32 %v2658_v5, %v803_v63  ;;  %v1317_v13 = vadd.f32 %v2658_v5, %v804_v0  ;;  %v808_v14 = vmul.f32 %v2653_v1, %v295_v60  ;;  %1826 = vst [vmem:[%s2687_s24 + $0x278] sm:$0xff] %v1314_v3  ;;  %v316_v63 = vld [vmem:[%s2646_s13 + $0x358] sm:$0xff]  ;;  %v317_v0 = vld [vmem:[%s2646_s13 + $0x360] sm:$0xff] }
  0x7b   : > { %v1318_v18 = vadd.f32 %v2658_v5, %v805_v4  ;;  %v1319_v19 = vadd.f32 %v2658_v5, %v806_v6  ;;  %v1320_v20 = vadd.f32 %v2658_v5, %v807_v7  ;;  %v809_v21 = vmul.f32 %v2653_v1, %v296_v2  ;;  %1827 = vst [vmem:[%s2687_s24 + $0x280] sm:$0xff] %v1315_v11  ;;  %v318_v2 = vld [vmem:[%s2646_s13 + $0x368] sm:$0xff] }
  0x7c   : > { %1828 = vst [vmem:[%s2687_s24 + $0x288] sm:$0xff] %v1316_v12  ;;  %1829 = vst [vmem:[%s2687_s24 + $0x290] sm:$0xff] %v1317_v13  ;;  %v1321_v23 = vadd.f32 %v2658_v5, %v808_v14  ;;  %v810_v24 = vmul.f32 %v2653_v1, %v297_v8  ;;  %v811_v25 = vmul.f32 %v2653_v1, %v298_v9  ;;  %v319_v8 = vld [vmem:[%s2646_s13 + $0x370] sm:$0xff]  ;;  %v320_v13 = vld [vmem:[%s2646_s13 + $0x378] sm:$0xff] }
  0x7d   : > { %v812_v26 = vmul.f32 %v2653_v1, %v299_v10  ;;  %1830 = vst [vmem:[%s2687_s24 + $0x298] sm:$0xff] %v1318_v18  ;;  %1831 = vst [vmem:[%s2687_s24 + $0x2a0] sm:$0xff] %v1319_v19  ;;  %v1322_v28 = vadd.f32 %v2658_v5, %v809_v21  ;;  %v813_v29 = vmul.f32 %v2653_v1, %v300_v15  ;;  %v321_v18 = vld [vmem:[%s2646_s13 + $0x380] sm:$0xff]  ;;  %v322_v19 = vld [vmem:[%s2646_s13 + $0x388] sm:$0xff] }
  0x7e   : > { %1832 = vst [vmem:[%s2687_s24 + $0x2a8] sm:$0xff] %v1320_v20  ;;  %v814_v30 = vmul.f32 %v2653_v1, %v301_v16  ;;  %v815_v31 = vmul.f32 %v2653_v1, %v302_v17  ;;  %1833 = vst [vmem:[%s2687_s24 + $0x2b0] sm:$0xff] %v1321_v23  ;;  %v1323_v35 = vadd.f32 %v2658_v5, %v810_v24  ;;  %v323_v20 = vld [vmem:[%s2646_s13 + $0x390] sm:$0xff] }
  0x7f   : > { %v1324_v36 = vadd.f32 %v2658_v5, %v811_v25  ;;  %v1325_v37 = vadd.f32 %v2658_v5, %v812_v26  ;;  %v816_v38 = vmul.f32 %v2653_v1, %v303_v22  ;;  %1834 = vst [vmem:[%s2687_s24 + $0x2b8] sm:$0xff] %v1322_v28  ;;  %v1326_v42 = vadd.f32 %v2658_v5, %v813_v29  ;;  %v324_v25 = vld [vmem:[%s2646_s13 + $0x398] sm:$0xff]  ;;  %v325_v26 = vld [vmem:[%s2646_s13 + $0x3a0] sm:$0xff] }
  0x80   : > { %v1327_v43 = vadd.f32 %v2658_v5, %v814_v30  ;;  %v1328_v44 = vadd.f32 %v2658_v5, %v815_v31  ;;  %v817_v45 = vmul.f32 %v2653_v1, %v304_v27  ;;  %1835 = vst [vmem:[%s2687_s24 + $0x2c0] sm:$0xff] %v1323_v35  ;;  %v818_v48 = vmul.f32 %v2653_v1, %v305_v32  ;;  %v326_v27 = vld [vmem:[%s2646_s13 + $0x3a8] sm:$0xff]  ;;  %v327_v32 = vld [vmem:[%s2646_s13 + $0x3b0] sm:$0xff] }
  0x81   : > { %1836 = vst [vmem:[%s2687_s24 + $0x2c8] sm:$0xff] %v1324_v36  ;;  %1837 = vst [vmem:[%s2687_s24 + $0x2d0] sm:$0xff] %v1325_v37  ;;  %v1329_v47 = vadd.f32 %v2658_v5, %v816_v38  ;;  %v819_v49 = vmul.f32 %v2653_v1, %v306_v33  ;;  %v820_v50 = vmul.f32 %v2653_v1, %v307_v34  ;;  %v328_v37 = vld [vmem:[%s2646_s13 + $0x3b8] sm:$0xff] }
  0x82   : > { %1838 = vst [vmem:[%s2687_s24 + $0x2d8] sm:$0xff] %v1326_v42  ;;  %1839 = vst [vmem:[%s2687_s24 + $0x2e0] sm:$0xff] %v1327_v43  ;;  %v1330_v52 = vadd.f32 %v2658_v5, %v817_v45  ;;  %v821_v53 = vmul.f32 %v2653_v1, %v308_v39  ;;  %v822_v54 = vmul.f32 %v2653_v1, %v309_v40  ;;  %v329_v42 = vld [vmem:[%s2646_s13 + $0x3c0] sm:$0xff]  ;;  %v330_v43 = vld [vmem:[%s2646_s13 + $0x3c8] sm:$0xff] }
  0x83   : > { %1840 = vst [vmem:[%s2687_s24 + $0x2e8] sm:$0xff] %v1328_v44  ;;  %v823_v55 = vmul.f32 %v2653_v1, %v310_v41  ;;  %1841 = vst [vmem:[%s2687_s24 + $0x2f0] sm:$0xff] %v1329_v47  ;;  %v1331_v59 = vadd.f32 %v2658_v5, %v818_v48  ;;  %v1332_v60 = vadd.f32 %v2658_v5, %v819_v49  ;;  %v331_v44 = vld [vmem:[%s2646_s13 + $0x3d0] sm:$0xff]  ;;  %v332_v49 = vld [vmem:[%s2646_s13 + $0x3d8] sm:$0xff] }
  0x84   : > { %v1333_v61 = vadd.f32 %v2658_v5, %v820_v50  ;;  %v824_v62 = vmul.f32 %v2653_v1, %v311_v46  ;;  %1842 = vst [vmem:[%s2687_s24 + $0x2f8] sm:$0xff] %v1330_v52  ;;  %v1334_v3 = vadd.f32 %v2658_v5, %v821_v53  ;;  %v1335_v4 = vadd.f32 %v2658_v5, %v822_v54  ;;  %v333_v50 = vld [vmem:[%s2646_s13 + $0x3e0] sm:$0xff] }
  0x85   : > { %v1336_v6 = vadd.f32 %v2658_v5, %v823_v55  ;;  %v825_v7 = vmul.f32 %v2653_v1, %v312_v51  ;;  %1843 = vst [vmem:[%s2687_s24 + $0x300] sm:$0xff] %v1331_v59  ;;  %1844 = vst [vmem:[%s2687_s24 + $0x308] sm:$0xff] %v1332_v60  ;;  %v826_v10 = vmul.f32 %v2653_v1, %v313_v56  ;;  %v334_v51 = vld [vmem:[%s2646_s13 + $0x3e8] sm:$0xff]  ;;  %v335_v56 = vld [vmem:[%s2646_s13 + $0x3f0] sm:$0xff] }
  0x86   : > { %1845 = vst [vmem:[%s2687_s24 + $0x310] sm:$0xff] %v1333_v61  ;;  %v1337_v9 = vadd.f32 %v2658_v5, %v824_v62  ;;  %v827_v11 = vmul.f32 %v2653_v1, %v314_v57  ;;  %v828_v12 = vmul.f32 %v2653_v1, %v315_v58  ;;  %1846 = vst [vmem:[%s2687_s24 + $0x318] sm:$0xff] %v1334_v3  ;;  %v336_v61 = vld [vmem:[%s2646_s13 + $0x3f8] sm:$0xff]  ;;  %v337_v3 = vld [vmem:[%s2646_s13 + $0x400] sm:$0xff] }
  0x87   : > { %1847 = vst [vmem:[%s2687_s24 + $0x320] sm:$0xff] %v1335_v4  ;;  %1848 = vst [vmem:[%s2687_s24 + $0x328] sm:$0xff] %v1336_v6  ;;  %v1338_v14 = vadd.f32 %v2658_v5, %v825_v7  ;;  %v829_v15 = vmul.f32 %v2653_v1, %v316_v63  ;;  %v830_v16 = vmul.f32 %v2653_v1, %v317_v0  ;;  %v338_v4 = vld [vmem:[%s2646_s13 + $0x408] sm:$0xff]  ;;  %v339_v6 = vld [vmem:[%s2646_s13 + $0x410] sm:$0xff] }
  0x88   : > { %v831_v17 = vmul.f32 %v2653_v1, %v318_v2  ;;  %1849 = vst [vmem:[%s2687_s24 + $0x330] sm:$0xff] %v1337_v9  ;;  %v1339_v21 = vadd.f32 %v2658_v5, %v826_v10  ;;  %v1340_v22 = vadd.f32 %v2658_v5, %v827_v11  ;;  %v1341_v23 = vadd.f32 %v2658_v5, %v828_v12  ;;  %v340_v11 = vld [vmem:[%s2646_s13 + $0x418] sm:$0xff]  ;;  %v341_v12 = vld [vmem:[%s2646_s13 + $0x420] sm:$0xff] }
  0x89   : > { %v832_v24 = vmul.f32 %v2653_v1, %v319_v8  ;;  %1850 = vst [vmem:[%s2687_s24 + $0x338] sm:$0xff] %v1338_v14  ;;  %v1342_v28 = vadd.f32 %v2658_v5, %v829_v15  ;;  %v1343_v29 = vadd.f32 %v2658_v5, %v830_v16  ;;  %v833_v31 = vmul.f32 %v2653_v1, %v320_v13  ;;  %v342_v13 = vld [vmem:[%s2646_s13 + $0x428] sm:$0xff] }
  0x8a   : > { %v1344_v30 = vadd.f32 %v2658_v5, %v831_v17  ;;  %1851 = vst [vmem:[%s2687_s24 + $0x340] sm:$0xff] %v1339_v21  ;;  %1852 = vst [vmem:[%s2687_s24 + $0x348] sm:$0xff] %v1340_v22  ;;  %v834_v34 = vmul.f32 %v2653_v1, %v321_v18  ;;  %v835_v35 = vmul.f32 %v2653_v1, %v322_v19  ;;  %v343_v18 = vld [vmem:[%s2646_s13 + $0x430] sm:$0xff] }
  0x8b   : > { %1853 = vst [vmem:[%s2687_s24 + $0x350] sm:$0xff] %v1341_v23  ;;  %v1345_v33 = vadd.f32 %v2658_v5, %v832_v24  ;;  %v836_v36 = vmul.f32 %v2653_v1, %v323_v20  ;;  %1854 = vst [vmem:[%s2687_s24 + $0x358] sm:$0xff] %v1342_v28  ;;  %v1346_v38 = vadd.f32 %v2658_v5, %v833_v31  ;;  %v344_v23 = vld [vmem:[%s2646_s13 + $0x438] sm:$0xff]  ;;  %v345_v28 = vld [vmem:[%s2646_s13 + $0x440] sm:$0xff] }
  0x8c   : > { %1855 = vst [vmem:[%s2687_s24 + $0x360] sm:$0xff] %v1343_v29  ;;  %1856 = vst [vmem:[%s2687_s24 + $0x368] sm:$0xff] %v1344_v30  ;;  %v837_v39 = vmul.f32 %v2653_v1, %v324_v25  ;;  %v838_v40 = vmul.f32 %v2653_v1, %v325_v26  ;;  %v839_v41 = vmul.f32 %v2653_v1, %v326_v27  ;;  %v346_v29 = vld [vmem:[%s2646_s13 + $0x448] sm:$0xff]  ;;  %v347_v30 = vld [vmem:[%s2646_s13 + $0x450] sm:$0xff] }
  0x8d   : > { %1857 = vst [vmem:[%s2687_s24 + $0x370] sm:$0xff] %v1345_v33  ;;  %v1347_v45 = vadd.f32 %v2658_v5, %v834_v34  ;;  %v1348_v46 = vadd.f32 %v2658_v5, %v835_v35  ;;  %v1349_v47 = vadd.f32 %v2658_v5, %v836_v36  ;;  %v840_v48 = vmul.f32 %v2653_v1, %v327_v32  ;;  %v348_v35 = vld [vmem:[%s2646_s13 + $0x458] sm:$0xff]  ;;  %v349_v36 = vld [vmem:[%s2646_s13 + $0x460] sm:$0xff] }
  0x8e   : > { %1858 = vst [vmem:[%s2687_s24 + $0x378] sm:$0xff] %v1346_v38  ;;  %v1350_v52 = vadd.f32 %v2658_v5, %v837_v39  ;;  %v1351_v53 = vadd.f32 %v2658_v5, %v838_v40  ;;  %v1352_v54 = vadd.f32 %v2658_v5, %v839_v41  ;;  %v841_v55 = vmul.f32 %v2653_v1, %v328_v37  ;;  %v350_v37 = vld [vmem:[%s2646_s13 + $0x468] sm:$0xff] }
  0x8f   : > { %1859 = vst [vmem:[%s2687_s24 + $0x380] sm:$0xff] %v1347_v45  ;;  %1860 = vst [vmem:[%s2687_s24 + $0x388] sm:$0xff] %v1348_v46  ;;  %v1353_v57 = vadd.f32 %v2658_v5, %v840_v48  ;;  %v842_v58 = vmul.f32 %v2653_v1, %v329_v42  ;;  %v843_v59 = vmul.f32 %v2653_v1, %v330_v43  ;;  %v351_v42 = vld [vmem:[%s2646_s13 + $0x470] sm:$0xff] }
  0x90   : > { %1861 = vst [vmem:[%s2687_s24 + $0x390] sm:$0xff] %v1349_v47  ;;  %v844_v60 = vmul.f32 %v2653_v1, %v331_v44  ;;  %1862 = vst [vmem:[%s2687_s24 + $0x398] sm:$0xff] %v1350_v52  ;;  %v1354_v62 = vadd.f32 %v2658_v5, %v841_v55  ;;  %v845_v63 = vmul.f32 %v2653_v1, %v332_v49  ;;  %v352_v47 = vld [vmem:[%s2646_s13 + $0x478] sm:$0xff]  ;;  %v353_v52 = vld [vmem:[%s2646_s13 + $0x480] sm:$0xff] }
  0x91   : > { %1863 = vst [vmem:[%s2687_s24 + $0x3a0] sm:$0xff] %v1351_v53  ;;  %1864 = vst [vmem:[%s2687_s24 + $0x3a8] sm:$0xff] %v1352_v54  ;;  %v846_v0 = vmul.f32 %v2653_v1, %v333_v50  ;;  %v847_v2 = vmul.f32 %v2653_v1, %v334_v51  ;;  %v1355_v7 = vadd.f32 %v2658_v5, %v842_v58  ;;  %v354_v53 = vld [vmem:[%s2646_s13 + $0x488] sm:$0xff]  ;;  %v355_v54 = vld [vmem:[%s2646_s13 + $0x490] sm:$0xff] }
  0x92   : > { %1865 = vst [vmem:[%s2687_s24 + $0x3b0] sm:$0xff] %v1353_v57  ;;  %v1356_v8 = vadd.f32 %v2658_v5, %v843_v59  ;;  %v1357_v9 = vadd.f32 %v2658_v5, %v844_v60  ;;  %v848_v10 = vmul.f32 %v2653_v1, %v335_v56  ;;  %1866 = vst [vmem:[%s2687_s24 + $0x3b8] sm:$0xff] %v1354_v62  ;;  %v356_v59 = vld [vmem:[%s2646_s13 + $0x498] sm:$0xff]  ;;  %v357_v60 = vld [vmem:[%s2646_s13 + $0x4a0] sm:$0xff] }
  0x93   : > { %v1358_v14 = vadd.f32 %v2658_v5, %v845_v63  ;;  %v1359_v15 = vadd.f32 %v2658_v5, %v846_v0  ;;  %v1360_v16 = vadd.f32 %v2658_v5, %v847_v2  ;;  %v849_v17 = vmul.f32 %v2653_v1, %v336_v61  ;;  %1867 = vst [vmem:[%s2687_s24 + $0x3c0] sm:$0xff] %v1355_v7  ;;  %v358_v61 = vld [vmem:[%s2646_s13 + $0x4a8] sm:$0xff] }
  0x94   : > { %1868 = vst [vmem:[%s2687_s24 + $0x3c8] sm:$0xff] %v1356_v8  ;;  %1869 = vst [vmem:[%s2687_s24 + $0x3d0] sm:$0xff] %v1357_v9  ;;  %v1361_v19 = vadd.f32 %v2658_v5, %v848_v10  ;;  %v850_v20 = vmul.f32 %v2653_v1, %v337_v3  ;;  %v851_v21 = vmul.f32 %v2653_v1, %v338_v4  ;;  %v359_v3 = vld [vmem:[%s2646_s13 + $0x4b0] sm:$0xff]  ;;  %v360_v9 = vld [vmem:[%s2646_s13 + $0x4b8] sm:$0xff] }
  0x95   : > { %v852_v22 = vmul.f32 %v2653_v1, %v339_v6  ;;  %1870 = vst [vmem:[%s2687_s24 + $0x3d8] sm:$0xff] %v1358_v14  ;;  %1871 = vst [vmem:[%s2687_s24 + $0x3e0] sm:$0xff] %v1359_v15  ;;  %v1362_v24 = vadd.f32 %v2658_v5, %v849_v17  ;;  %v853_v25 = vmul.f32 %v2653_v1, %v340_v11  ;;  %v361_v14 = vld [vmem:[%s2646_s13 + $0x4c0] sm:$0xff]  ;;  %v362_v15 = vld [vmem:[%s2646_s13 + $0x4c8] sm:$0xff] }
  0x96   : > { %1872 = vst [vmem:[%s2687_s24 + $0x3e8] sm:$0xff] %v1360_v16  ;;  %v854_v26 = vmul.f32 %v2653_v1, %v341_v12  ;;  %v855_v27 = vmul.f32 %v2653_v1, %v342_v13  ;;  %1873 = vst [vmem:[%s2687_s24 + $0x3f0] sm:$0xff] %v1361_v19  ;;  %v1363_v31 = vadd.f32 %v2658_v5, %v850_v20  ;;  %v363_v16 = vld [vmem:[%s2646_s13 + $0x4d0] sm:$0xff] }
  0x97   : > { %v1364_v32 = vadd.f32 %v2658_v5, %v851_v21  ;;  %v1365_v33 = vadd.f32 %v2658_v5, %v852_v22  ;;  %v856_v34 = vmul.f32 %v2653_v1, %v343_v18  ;;  %1874 = vst [vmem:[%s2687_s24 + $0x3f8] sm:$0xff] %v1362_v24  ;;  %v1366_v38 = vadd.f32 %v2658_v5, %v853_v25  ;;  %v364_v21 = vld [vmem:[%s2646_s13 + $0x4d8] sm:$0xff]  ;;  %v365_v22 = vld [vmem:[%s2646_s13 + $0x4e0] sm:$0xff] }
  0x98   : > { %v1367_v39 = vadd.f32 %v2658_v5, %v854_v26  ;;  %v1368_v40 = vadd.f32 %v2658_v5, %v855_v27  ;;  %v857_v41 = vmul.f32 %v2653_v1, %v344_v23  ;;  %1875 = vst [vmem:[%s2687_s24 + $0x400] sm:$0xff] %v1363_v31  ;;  %v858_v44 = vmul.f32 %v2653_v1, %v345_v28  ;;  %v366_v23 = vld [vmem:[%s2646_s13 + $0x4e8] sm:$0xff]  ;;  %v367_v28 = vld [vmem:[%s2646_s13 + $0x4f0] sm:$0xff] }
  0x99   : > { %1876 = vst [vmem:[%s2687_s24 + $0x408] sm:$0xff] %v1364_v32  ;;  %1877 = vst [vmem:[%s2687_s24 + $0x410] sm:$0xff] %v1365_v33  ;;  %v1369_v43 = vadd.f32 %v2658_v5, %v856_v34  ;;  %v859_v45 = vmul.f32 %v2653_v1, %v346_v29  ;;  %v860_v46 = vmul.f32 %v2653_v1, %v347_v30  ;;  %v368_v33 = vld [vmem:[%s2646_s13 + $0x4f8] sm:$0xff] }
  0x9a   : > { %1878 = vst [vmem:[%s2687_s24 + $0x418] sm:$0xff] %v1366_v38  ;;  %1879 = vst [vmem:[%s2687_s24 + $0x420] sm:$0xff] %v1367_v39  ;;  %v1370_v48 = vadd.f32 %v2658_v5, %v857_v41  ;;  %v861_v49 = vmul.f32 %v2653_v1, %v348_v35  ;;  %v862_v50 = vmul.f32 %v2653_v1, %v349_v36  ;;  %v369_v38 = vld [vmem:[%s2646_s13 + $0x500] sm:$0xff]  ;;  %v370_v39 = vld [vmem:[%s2646_s13 + $0x508] sm:$0xff] }
  0x9b   : > { %1880 = vst [vmem:[%s2687_s24 + $0x428] sm:$0xff] %v1368_v40  ;;  %v863_v51 = vmul.f32 %v2653_v1, %v350_v37  ;;  %1881 = vst [vmem:[%s2687_s24 + $0x430] sm:$0xff] %v1369_v43  ;;  %v1371_v55 = vadd.f32 %v2658_v5, %v858_v44  ;;  %v1372_v56 = vadd.f32 %v2658_v5, %v859_v45  ;;  %v371_v40 = vld [vmem:[%s2646_s13 + $0x510] sm:$0xff]  ;;  %v372_v45 = vld [vmem:[%s2646_s13 + $0x518] sm:$0xff] }
  0x9c   : > { %v1373_v57 = vadd.f32 %v2658_v5, %v860_v46  ;;  %v864_v58 = vmul.f32 %v2653_v1, %v351_v42  ;;  %1882 = vst [vmem:[%s2687_s24 + $0x438] sm:$0xff] %v1370_v48  ;;  %v1374_v62 = vadd.f32 %v2658_v5, %v861_v49  ;;  %v1375_v63 = vadd.f32 %v2658_v5, %v862_v50  ;;  %v373_v46 = vld [vmem:[%s2646_s13 + $0x520] sm:$0xff] }
  0x9d   : > { %v1376_v0 = vadd.f32 %v2658_v5, %v863_v51  ;;  %v865_v2 = vmul.f32 %v2653_v1, %v352_v47  ;;  %1883 = vst [vmem:[%s2687_s24 + $0x440] sm:$0xff] %v1371_v55  ;;  %1884 = vst [vmem:[%s2687_s24 + $0x448] sm:$0xff] %v1372_v56  ;;  %v866_v6 = vmul.f32 %v2653_v1, %v353_v52  ;;  %v374_v47 = vld [vmem:[%s2646_s13 + $0x528] sm:$0xff]  ;;  %v375_v52 = vld [vmem:[%s2646_s13 + $0x530] sm:$0xff] }
  0x9e   : > { %1885 = vst [vmem:[%s2687_s24 + $0x450] sm:$0xff] %v1373_v57  ;;  %v1377_v4 = vadd.f32 %v2658_v5, %v864_v58  ;;  %v867_v7 = vmul.f32 %v2653_v1, %v354_v53  ;;  %v868_v8 = vmul.f32 %v2653_v1, %v355_v54  ;;  %1886 = vst [vmem:[%s2687_s24 + $0x458] sm:$0xff] %v1374_v62  ;;  %v376_v57 = vld [vmem:[%s2646_s13 + $0x538] sm:$0xff]  ;;  %v377_v62 = vld [vmem:[%s2646_s13 + $0x540] sm:$0xff] }
  0x9f   : > { %1887 = vst [vmem:[%s2687_s24 + $0x460] sm:$0xff] %v1375_v63  ;;  %1888 = vst [vmem:[%s2687_s24 + $0x468] sm:$0xff] %v1376_v0  ;;  %v1378_v10 = vadd.f32 %v2658_v5, %v865_v2  ;;  %v869_v11 = vmul.f32 %v2653_v1, %v356_v59  ;;  %v870_v12 = vmul.f32 %v2653_v1, %v357_v60  ;;  %v378_v63 = vld [vmem:[%s2646_s13 + $0x548] sm:$0xff]  ;;  %v379_v0 = vld [vmem:[%s2646_s13 + $0x550] sm:$0xff] }
  0xa0   : > { %v871_v13 = vmul.f32 %v2653_v1, %v358_v61  ;;  %1889 = vst [vmem:[%s2687_s24 + $0x470] sm:$0xff] %v1377_v4  ;;  %v1379_v17 = vadd.f32 %v2658_v5, %v866_v6  ;;  %v1380_v18 = vadd.f32 %v2658_v5, %v867_v7  ;;  %v1381_v19 = vadd.f32 %v2658_v5, %v868_v8  ;;  %v380_v7 = vld [vmem:[%s2646_s13 + $0x558] sm:$0xff]  ;;  %v381_v8 = vld [vmem:[%s2646_s13 + $0x560] sm:$0xff] }
  0xa1   : > { %v872_v20 = vmul.f32 %v2653_v1, %v359_v3  ;;  %1890 = vst [vmem:[%s2687_s24 + $0x478] sm:$0xff] %v1378_v10  ;;  %v1382_v24 = vadd.f32 %v2658_v5, %v869_v11  ;;  %v1383_v25 = vadd.f32 %v2658_v5, %v870_v12  ;;  %v873_v27 = vmul.f32 %v2653_v1, %v360_v9  ;;  %v382_v9 = vld [vmem:[%s2646_s13 + $0x568] sm:$0xff] }
  0xa2   : > { %v1384_v26 = vadd.f32 %v2658_v5, %v871_v13  ;;  %1891 = vst [vmem:[%s2687_s24 + $0x480] sm:$0xff] %v1379_v17  ;;  %1892 = vst [vmem:[%s2687_s24 + $0x488] sm:$0xff] %v1380_v18  ;;  %v874_v30 = vmul.f32 %v2653_v1, %v361_v14  ;;  %v875_v31 = vmul.f32 %v2653_v1, %v362_v15  ;;  %v383_v14 = vld [vmem:[%s2646_s13 + $0x570] sm:$0xff] }
  0xa3   : > { %1893 = vst [vmem:[%s2687_s24 + $0x490] sm:$0xff] %v1381_v19  ;;  %v1385_v29 = vadd.f32 %v2658_v5, %v872_v20  ;;  %v876_v32 = vmul.f32 %v2653_v1, %v363_v16  ;;  %1894 = vst [vmem:[%s2687_s24 + $0x498] sm:$0xff] %v1382_v24  ;;  %v1386_v34 = vadd.f32 %v2658_v5, %v873_v27  ;;  %v384_v19 = vld [vmem:[%s2646_s13 + $0x578] sm:$0xff]  ;;  %v385_v24 = vld [vmem:[%s2646_s13 + $0x580] sm:$0xff] }
  0xa4   : > { %1895 = vst [vmem:[%s2687_s24 + $0x4a0] sm:$0xff] %v1383_v25  ;;  %1896 = vst [vmem:[%s2687_s24 + $0x4a8] sm:$0xff] %v1384_v26  ;;  %v877_v35 = vmul.f32 %v2653_v1, %v364_v21  ;;  %v878_v36 = vmul.f32 %v2653_v1, %v365_v22  ;;  %v879_v37 = vmul.f32 %v2653_v1, %v366_v23  ;;  %v386_v25 = vld [vmem:[%s2646_s13 + $0x588] sm:$0xff]  ;;  %v387_v26 = vld [vmem:[%s2646_s13 + $0x590] sm:$0xff] }
  0xa5   : > { %1897 = vst [vmem:[%s2687_s24 + $0x4b0] sm:$0xff] %v1385_v29  ;;  %v1387_v41 = vadd.f32 %v2658_v5, %v874_v30  ;;  %v1388_v42 = vadd.f32 %v2658_v5, %v875_v31  ;;  %v1389_v43 = vadd.f32 %v2658_v5, %v876_v32  ;;  %v880_v44 = vmul.f32 %v2653_v1, %v367_v28  ;;  %v388_v31 = vld [vmem:[%s2646_s13 + $0x598] sm:$0xff]  ;;  %v389_v32 = vld [vmem:[%s2646_s13 + $0x5a0] sm:$0xff] }
  0xa6   : > { %1898 = vst [vmem:[%s2687_s24 + $0x4b8] sm:$0xff] %v1386_v34  ;;  %v1390_v48 = vadd.f32 %v2658_v5, %v877_v35  ;;  %v1391_v49 = vadd.f32 %v2658_v5, %v878_v36  ;;  %v1392_v50 = vadd.f32 %v2658_v5, %v879_v37  ;;  %v881_v51 = vmul.f32 %v2653_v1, %v368_v33  ;;  %v390_v33 = vld [vmem:[%s2646_s13 + $0x5a8] sm:$0xff] }
  0xa7   : > { %1899 = vst [vmem:[%s2687_s24 + $0x4c0] sm:$0xff] %v1387_v41  ;;  %1900 = vst [vmem:[%s2687_s24 + $0x4c8] sm:$0xff] %v1388_v42  ;;  %v1393_v53 = vadd.f32 %v2658_v5, %v880_v44  ;;  %v882_v54 = vmul.f32 %v2653_v1, %v369_v38  ;;  %v883_v55 = vmul.f32 %v2653_v1, %v370_v39  ;;  %v391_v38 = vld [vmem:[%s2646_s13 + $0x5b0] sm:$0xff] }
  0xa8   : > { %1901 = vst [vmem:[%s2687_s24 + $0x4d0] sm:$0xff] %v1389_v43  ;;  %v884_v56 = vmul.f32 %v2653_v1, %v371_v40  ;;  %1902 = vst [vmem:[%s2687_s24 + $0x4d8] sm:$0xff] %v1390_v48  ;;  %v1394_v58 = vadd.f32 %v2658_v5, %v881_v51  ;;  %v885_v59 = vmul.f32 %v2653_v1, %v372_v45  ;;  %v392_v43 = vld [vmem:[%s2646_s13 + $0x5b8] sm:$0xff]  ;;  %v393_v48 = vld [vmem:[%s2646_s13 + $0x5c0] sm:$0xff] }
  0xa9   : > { %1903 = vst [vmem:[%s2687_s24 + $0x4e0] sm:$0xff] %v1391_v49  ;;  %1904 = vst [vmem:[%s2687_s24 + $0x4e8] sm:$0xff] %v1392_v50  ;;  %v886_v60 = vmul.f32 %v2653_v1, %v373_v46  ;;  %v887_v61 = vmul.f32 %v2653_v1, %v374_v47  ;;  %v1395_v2 = vadd.f32 %v2658_v5, %v882_v54  ;;  %v394_v49 = vld [vmem:[%s2646_s13 + $0x5c8] sm:$0xff]  ;;  %v395_v50 = vld [vmem:[%s2646_s13 + $0x5d0] sm:$0xff] }
  0xaa   : > { %1905 = vst [vmem:[%s2687_s24 + $0x4f0] sm:$0xff] %v1393_v53  ;;  %v1396_v3 = vadd.f32 %v2658_v5, %v883_v55  ;;  %v1397_v4 = vadd.f32 %v2658_v5, %v884_v56  ;;  %v888_v6 = vmul.f32 %v2653_v1, %v375_v52  ;;  %1906 = vst [vmem:[%s2687_s24 + $0x4f8] sm:$0xff] %v1394_v58  ;;  %v396_v55 = vld [vmem:[%s2646_s13 + $0x5d8] sm:$0xff]  ;;  %v397_v56 = vld [vmem:[%s2646_s13 + $0x5e0] sm:$0xff] }
  0xab   : > { %v1398_v10 = vadd.f32 %v2658_v5, %v885_v59  ;;  %v1399_v11 = vadd.f32 %v2658_v5, %v886_v60  ;;  %v1400_v12 = vadd.f32 %v2658_v5, %v887_v61  ;;  %v889_v13 = vmul.f32 %v2653_v1, %v376_v57  ;;  %1907 = vst [vmem:[%s2687_s24 + $0x500] sm:$0xff] %v1395_v2  ;;  %v398_v57 = vld [vmem:[%s2646_s13 + $0x5e8] sm:$0xff] }
  0xac   : > { %1908 = vst [vmem:[%s2687_s24 + $0x508] sm:$0xff] %v1396_v3  ;;  %1909 = vst [vmem:[%s2687_s24 + $0x510] sm:$0xff] %v1397_v4  ;;  %v1401_v15 = vadd.f32 %v2658_v5, %v888_v6  ;;  %v890_v16 = vmul.f32 %v2653_v1, %v377_v62  ;;  %v891_v17 = vmul.f32 %v2653_v1, %v378_v63  ;;  %v399_v62 = vld [vmem:[%s2646_s13 + $0x5f0] sm:$0xff]  ;;  %v400_v4 = vld [vmem:[%s2646_s13 + $0x5f8] sm:$0xff] }
  0xad   : > { %v892_v18 = vmul.f32 %v2653_v1, %v379_v0  ;;  %1910 = vst [vmem:[%s2687_s24 + $0x518] sm:$0xff] %v1398_v10  ;;  %1911 = vst [vmem:[%s2687_s24 + $0x520] sm:$0xff] %v1399_v11  ;;  %v1402_v20 = vadd.f32 %v2658_v5, %v889_v13  ;;  %v893_v21 = vmul.f32 %v2653_v1, %v380_v7  ;;  %v401_v10 = vld [vmem:[%s2646_s13 + $0x600] sm:$0xff]  ;;  %v402_v11 = vld [vmem:[%s2646_s13 + $0x608] sm:$0xff] }
  0xae   : > { %1912 = vst [vmem:[%s2687_s24 + $0x528] sm:$0xff] %v1400_v12  ;;  %v894_v22 = vmul.f32 %v2653_v1, %v381_v8  ;;  %v895_v23 = vmul.f32 %v2653_v1, %v382_v9  ;;  %1913 = vst [vmem:[%s2687_s24 + $0x530] sm:$0xff] %v1401_v15  ;;  %v1403_v27 = vadd.f32 %v2658_v5, %v890_v16  ;;  %v403_v12 = vld [vmem:[%s2646_s13 + $0x610] sm:$0xff] }
  0xaf   : > { %v1404_v28 = vadd.f32 %v2658_v5, %v891_v17  ;;  %v1405_v29 = vadd.f32 %v2658_v5, %v892_v18  ;;  %v896_v30 = vmul.f32 %v2653_v1, %v383_v14  ;;  %1914 = vst [vmem:[%s2687_s24 + $0x538] sm:$0xff] %v1402_v20  ;;  %v1406_v34 = vadd.f32 %v2658_v5, %v893_v21  ;;  %v404_v17 = vld [vmem:[%s2646_s13 + $0x618] sm:$0xff]  ;;  %v405_v18 = vld [vmem:[%s2646_s13 + $0x620] sm:$0xff] }
  0xb0   : > { %v1407_v35 = vadd.f32 %v2658_v5, %v894_v22  ;;  %v1408_v36 = vadd.f32 %v2658_v5, %v895_v23  ;;  %v897_v37 = vmul.f32 %v2653_v1, %v384_v19  ;;  %1915 = vst [vmem:[%s2687_s24 + $0x540] sm:$0xff] %v1403_v27  ;;  %v898_v40 = vmul.f32 %v2653_v1, %v385_v24  ;;  %v406_v19 = vld [vmem:[%s2646_s13 + $0x628] sm:$0xff]  ;;  %v407_v24 = vld [vmem:[%s2646_s13 + $0x630] sm:$0xff] }
  0xb1   : > { %1916 = vst [vmem:[%s2687_s24 + $0x548] sm:$0xff] %v1404_v28  ;;  %1917 = vst [vmem:[%s2687_s24 + $0x550] sm:$0xff] %v1405_v29  ;;  %v1409_v39 = vadd.f32 %v2658_v5, %v896_v30  ;;  %v899_v41 = vmul.f32 %v2653_v1, %v386_v25  ;;  %v900_v42 = vmul.f32 %v2653_v1, %v387_v26  ;;  %v408_v29 = vld [vmem:[%s2646_s13 + $0x638] sm:$0xff] }
  0xb2   : > { %1918 = vst [vmem:[%s2687_s24 + $0x558] sm:$0xff] %v1406_v34  ;;  %1919 = vst [vmem:[%s2687_s24 + $0x560] sm:$0xff] %v1407_v35  ;;  %v1410_v44 = vadd.f32 %v2658_v5, %v897_v37  ;;  %v901_v45 = vmul.f32 %v2653_v1, %v388_v31  ;;  %v902_v46 = vmul.f32 %v2653_v1, %v389_v32  ;;  %v409_v34 = vld [vmem:[%s2646_s13 + $0x640] sm:$0xff]  ;;  %v410_v35 = vld [vmem:[%s2646_s13 + $0x648] sm:$0xff] }
  0xb3   : > { %1920 = vst [vmem:[%s2687_s24 + $0x568] sm:$0xff] %v1408_v36  ;;  %v903_v47 = vmul.f32 %v2653_v1, %v390_v33  ;;  %1921 = vst [vmem:[%s2687_s24 + $0x570] sm:$0xff] %v1409_v39  ;;  %v1411_v51 = vadd.f32 %v2658_v5, %v898_v40  ;;  %v1412_v52 = vadd.f32 %v2658_v5, %v899_v41  ;;  %v411_v36 = vld [vmem:[%s2646_s13 + $0x650] sm:$0xff]  ;;  %v412_v41 = vld [vmem:[%s2646_s13 + $0x658] sm:$0xff] }
  0xb4   : > { %v1413_v53 = vadd.f32 %v2658_v5, %v900_v42  ;;  %v904_v54 = vmul.f32 %v2653_v1, %v391_v38  ;;  %1922 = vst [vmem:[%s2687_s24 + $0x578] sm:$0xff] %v1410_v44  ;;  %v1414_v58 = vadd.f32 %v2658_v5, %v901_v45  ;;  %v1415_v59 = vadd.f32 %v2658_v5, %v902_v46  ;;  %v413_v42 = vld [vmem:[%s2646_s13 + $0x660] sm:$0xff] }
  0xb5   : > { %v1416_v60 = vadd.f32 %v2658_v5, %v903_v47  ;;  %v905_v61 = vmul.f32 %v2653_v1, %v392_v43  ;;  %1923 = vst [vmem:[%s2687_s24 + $0x580] sm:$0xff] %v1411_v51  ;;  %1924 = vst [vmem:[%s2687_s24 + $0x588] sm:$0xff] %v1412_v52  ;;  %v906_v0 = vmul.f32 %v2653_v1, %v393_v48  ;;  %v414_v43 = vld [vmem:[%s2646_s13 + $0x668] sm:$0xff]  ;;  %v415_v48 = vld [vmem:[%s2646_s13 + $0x670] sm:$0xff] }
  0xb6   : > { %1925 = vst [vmem:[%s2687_s24 + $0x590] sm:$0xff] %v1413_v53  ;;  %v1417_v63 = vadd.f32 %v2658_v5, %v904_v54  ;;  %v907_v2 = vmul.f32 %v2653_v1, %v394_v49  ;;  %v908_v3 = vmul.f32 %v2653_v1, %v395_v50  ;;  %1926 = vst [vmem:[%s2687_s24 + $0x598] sm:$0xff] %v1414_v58  ;;  %v416_v53 = vld [vmem:[%s2646_s13 + $0x678] sm:$0xff]  ;;  %v417_v58 = vld [vmem:[%s2646_s13 + $0x680] sm:$0xff] }
  0xb7   : > { %1927 = vst [vmem:[%s2687_s24 + $0x5a0] sm:$0xff] %v1415_v59  ;;  %1928 = vst [vmem:[%s2687_s24 + $0x5a8] sm:$0xff] %v1416_v60  ;;  %v1418_v6 = vadd.f32 %v2658_v5, %v905_v61  ;;  %v909_v7 = vmul.f32 %v2653_v1, %v396_v55  ;;  %v910_v8 = vmul.f32 %v2653_v1, %v397_v56  ;;  %v418_v59 = vld [vmem:[%s2646_s13 + $0x688] sm:$0xff]  ;;  %v419_v60 = vld [vmem:[%s2646_s13 + $0x690] sm:$0xff] }
  0xb8   : > { %v911_v9 = vmul.f32 %v2653_v1, %v398_v57  ;;  %1929 = vst [vmem:[%s2687_s24 + $0x5b0] sm:$0xff] %v1417_v63  ;;  %v1419_v13 = vadd.f32 %v2658_v5, %v906_v0  ;;  %v1420_v14 = vadd.f32 %v2658_v5, %v907_v2  ;;  %v1421_v15 = vadd.f32 %v2658_v5, %v908_v3  ;;  %v420_v2 = vld [vmem:[%s2646_s13 + $0x698] sm:$0xff]  ;;  %v421_v3 = vld [vmem:[%s2646_s13 + $0x6a0] sm:$0xff] }
  0xb9   : > { %v912_v16 = vmul.f32 %v2653_v1, %v399_v62  ;;  %1930 = vst [vmem:[%s2687_s24 + $0x5b8] sm:$0xff] %v1418_v6  ;;  %v1422_v20 = vadd.f32 %v2658_v5, %v909_v7  ;;  %v1423_v21 = vadd.f32 %v2658_v5, %v910_v8  ;;  %v913_v23 = vmul.f32 %v2653_v1, %v400_v4  ;;  %v422_v4 = vld [vmem:[%s2646_s13 + $0x6a8] sm:$0xff] }
  0xba   : > { %v1424_v22 = vadd.f32 %v2658_v5, %v911_v9  ;;  %1931 = vst [vmem:[%s2687_s24 + $0x5c0] sm:$0xff] %v1419_v13  ;;  %1932 = vst [vmem:[%s2687_s24 + $0x5c8] sm:$0xff] %v1420_v14  ;;  %v914_v26 = vmul.f32 %v2653_v1, %v401_v10  ;;  %v915_v27 = vmul.f32 %v2653_v1, %v402_v11  ;;  %v423_v10 = vld [vmem:[%s2646_s13 + $0x6b0] sm:$0xff] }
  0xbb   : > { %1933 = vst [vmem:[%s2687_s24 + $0x5d0] sm:$0xff] %v1421_v15  ;;  %v1425_v25 = vadd.f32 %v2658_v5, %v912_v16  ;;  %v916_v28 = vmul.f32 %v2653_v1, %v403_v12  ;;  %1934 = vst [vmem:[%s2687_s24 + $0x5d8] sm:$0xff] %v1422_v20  ;;  %v1426_v30 = vadd.f32 %v2658_v5, %v913_v23  ;;  %v424_v15 = vld [vmem:[%s2646_s13 + $0x6b8] sm:$0xff]  ;;  %v425_v20 = vld [vmem:[%s2646_s13 + $0x6c0] sm:$0xff] }
  0xbc   : > { %1935 = vst [vmem:[%s2687_s24 + $0x5e0] sm:$0xff] %v1423_v21  ;;  %1936 = vst [vmem:[%s2687_s24 + $0x5e8] sm:$0xff] %v1424_v22  ;;  %v917_v31 = vmul.f32 %v2653_v1, %v404_v17  ;;  %v918_v32 = vmul.f32 %v2653_v1, %v405_v18  ;;  %v919_v33 = vmul.f32 %v2653_v1, %v406_v19  ;;  %v426_v21 = vld [vmem:[%s2646_s13 + $0x6c8] sm:$0xff]  ;;  %v427_v22 = vld [vmem:[%s2646_s13 + $0x6d0] sm:$0xff] }
  0xbd   : > { %1937 = vst [vmem:[%s2687_s24 + $0x5f0] sm:$0xff] %v1425_v25  ;;  %v1427_v37 = vadd.f32 %v2658_v5, %v914_v26  ;;  %v1428_v38 = vadd.f32 %v2658_v5, %v915_v27  ;;  %v1429_v39 = vadd.f32 %v2658_v5, %v916_v28  ;;  %v920_v40 = vmul.f32 %v2653_v1, %v407_v24  ;;  %v428_v27 = vld [vmem:[%s2646_s13 + $0x6d8] sm:$0xff]  ;;  %v429_v28 = vld [vmem:[%s2646_s13 + $0x6e0] sm:$0xff] }
  0xbe   : > { %1938 = vst [vmem:[%s2687_s24 + $0x5f8] sm:$0xff] %v1426_v30  ;;  %v1430_v44 = vadd.f32 %v2658_v5, %v917_v31  ;;  %v1431_v45 = vadd.f32 %v2658_v5, %v918_v32  ;;  %v1432_v46 = vadd.f32 %v2658_v5, %v919_v33  ;;  %v921_v47 = vmul.f32 %v2653_v1, %v408_v29  ;;  %v430_v29 = vld [vmem:[%s2646_s13 + $0x6e8] sm:$0xff] }
  0xbf   : > { %1939 = vst [vmem:[%s2687_s24 + $0x600] sm:$0xff] %v1427_v37  ;;  %1940 = vst [vmem:[%s2687_s24 + $0x608] sm:$0xff] %v1428_v38  ;;  %v1433_v49 = vadd.f32 %v2658_v5, %v920_v40  ;;  %v922_v50 = vmul.f32 %v2653_v1, %v409_v34  ;;  %v923_v51 = vmul.f32 %v2653_v1, %v410_v35  ;;  %v431_v34 = vld [vmem:[%s2646_s13 + $0x6f0] sm:$0xff] }
  0xc0   : > { %1941 = vst [vmem:[%s2687_s24 + $0x610] sm:$0xff] %v1429_v39  ;;  %v924_v52 = vmul.f32 %v2653_v1, %v411_v36  ;;  %1942 = vst [vmem:[%s2687_s24 + $0x618] sm:$0xff] %v1430_v44  ;;  %v1434_v54 = vadd.f32 %v2658_v5, %v921_v47  ;;  %v925_v55 = vmul.f32 %v2653_v1, %v412_v41  ;;  %v432_v39 = vld [vmem:[%s2646_s13 + $0x6f8] sm:$0xff]  ;;  %v433_v44 = vld [vmem:[%s2646_s13 + $0x700] sm:$0xff] }
  0xc1   : > { %1943 = vst [vmem:[%s2687_s24 + $0x620] sm:$0xff] %v1431_v45  ;;  %1944 = vst [vmem:[%s2687_s24 + $0x628] sm:$0xff] %v1432_v46  ;;  %v926_v56 = vmul.f32 %v2653_v1, %v413_v42  ;;  %v927_v57 = vmul.f32 %v2653_v1, %v414_v43  ;;  %v1435_v61 = vadd.f32 %v2658_v5, %v922_v50  ;;  %v434_v45 = vld [vmem:[%s2646_s13 + $0x708] sm:$0xff]  ;;  %v435_v46 = vld [vmem:[%s2646_s13 + $0x710] sm:$0xff] }
  0xc2   : > { %1945 = vst [vmem:[%s2687_s24 + $0x630] sm:$0xff] %v1433_v49  ;;  %v1436_v62 = vadd.f32 %v2658_v5, %v923_v51  ;;  %v1437_v63 = vadd.f32 %v2658_v5, %v924_v52  ;;  %v928_v0 = vmul.f32 %v2653_v1, %v415_v48  ;;  %1946 = vst [vmem:[%s2687_s24 + $0x638] sm:$0xff] %v1434_v54  ;;  %v436_v51 = vld [vmem:[%s2646_s13 + $0x718] sm:$0xff]  ;;  %v437_v52 = vld [vmem:[%s2646_s13 + $0x720] sm:$0xff] }
  0xc3   : > { %v1438_v6 = vadd.f32 %v2658_v5, %v925_v55  ;;  %v1439_v7 = vadd.f32 %v2658_v5, %v926_v56  ;;  %v1440_v8 = vadd.f32 %v2658_v5, %v927_v57  ;;  %v929_v9 = vmul.f32 %v2653_v1, %v416_v53  ;;  %1947 = vst [vmem:[%s2687_s24 + $0x640] sm:$0xff] %v1435_v61  ;;  %v438_v53 = vld [vmem:[%s2646_s13 + $0x728] sm:$0xff] }
  0xc4   : > { %1948 = vst [vmem:[%s2687_s24 + $0x648] sm:$0xff] %v1436_v62  ;;  %1949 = vst [vmem:[%s2687_s24 + $0x650] sm:$0xff] %v1437_v63  ;;  %v1441_v11 = vadd.f32 %v2658_v5, %v928_v0  ;;  %v930_v12 = vmul.f32 %v2653_v1, %v417_v58  ;;  %v931_v13 = vmul.f32 %v2653_v1, %v418_v59  ;;  %v439_v58 = vld [vmem:[%s2646_s13 + $0x730] sm:$0xff]  ;;  %v440_v63 = vld [vmem:[%s2646_s13 + $0x738] sm:$0xff] }
  0xc5   : > { %v932_v14 = vmul.f32 %v2653_v1, %v419_v60  ;;  %1950 = vst [vmem:[%s2687_s24 + $0x658] sm:$0xff] %v1438_v6  ;;  %1951 = vst [vmem:[%s2687_s24 + $0x660] sm:$0xff] %v1439_v7  ;;  %v1442_v16 = vadd.f32 %v2658_v5, %v929_v9  ;;  %v933_v17 = vmul.f32 %v2653_v1, %v420_v2  ;;  %v441_v6 = vld [vmem:[%s2646_s13 + $0x740] sm:$0xff]  ;;  %v442_v7 = vld [vmem:[%s2646_s13 + $0x748] sm:$0xff] }
  0xc6   : > { %1952 = vst [vmem:[%s2687_s24 + $0x668] sm:$0xff] %v1440_v8  ;;  %v934_v18 = vmul.f32 %v2653_v1, %v421_v3  ;;  %v935_v19 = vmul.f32 %v2653_v1, %v422_v4  ;;  %1953 = vst [vmem:[%s2687_s24 + $0x670] sm:$0xff] %v1441_v11  ;;  %v1443_v23 = vadd.f32 %v2658_v5, %v930_v12  ;;  %v443_v8 = vld [vmem:[%s2646_s13 + $0x750] sm:$0xff] }
  0xc7   : > { %v1444_v24 = vadd.f32 %v2658_v5, %v931_v13  ;;  %v1445_v25 = vadd.f32 %v2658_v5, %v932_v14  ;;  %v936_v26 = vmul.f32 %v2653_v1, %v423_v10  ;;  %1954 = vst [vmem:[%s2687_s24 + $0x678] sm:$0xff] %v1442_v16  ;;  %v1446_v30 = vadd.f32 %v2658_v5, %v933_v17  ;;  %v444_v13 = vld [vmem:[%s2646_s13 + $0x758] sm:$0xff]  ;;  %v445_v14 = vld [vmem:[%s2646_s13 + $0x760] sm:$0xff] }
  0xc8   : > { %v1447_v31 = vadd.f32 %v2658_v5, %v934_v18  ;;  %v1448_v32 = vadd.f32 %v2658_v5, %v935_v19  ;;  %v937_v33 = vmul.f32 %v2653_v1, %v424_v15  ;;  %1955 = vst [vmem:[%s2687_s24 + $0x680] sm:$0xff] %v1443_v23  ;;  %v938_v36 = vmul.f32 %v2653_v1, %v425_v20  ;;  %v446_v15 = vld [vmem:[%s2646_s13 + $0x768] sm:$0xff]  ;;  %v447_v20 = vld [vmem:[%s2646_s13 + $0x770] sm:$0xff] }
  0xc9   : > { %1956 = vst [vmem:[%s2687_s24 + $0x688] sm:$0xff] %v1444_v24  ;;  %1957 = vst [vmem:[%s2687_s24 + $0x690] sm:$0xff] %v1445_v25  ;;  %v1449_v35 = vadd.f32 %v2658_v5, %v936_v26  ;;  %v939_v37 = vmul.f32 %v2653_v1, %v426_v21  ;;  %v940_v38 = vmul.f32 %v2653_v1, %v427_v22  ;;  %v448_v25 = vld [vmem:[%s2646_s13 + $0x778] sm:$0xff] }
  0xca   : > { %1958 = vst [vmem:[%s2687_s24 + $0x698] sm:$0xff] %v1446_v30  ;;  %1959 = vst [vmem:[%s2687_s24 + $0x6a0] sm:$0xff] %v1447_v31  ;;  %v1450_v40 = vadd.f32 %v2658_v5, %v937_v33  ;;  %v941_v41 = vmul.f32 %v2653_v1, %v428_v27  ;;  %v942_v42 = vmul.f32 %v2653_v1, %v429_v28  ;;  %v449_v30 = vld [vmem:[%s2646_s13 + $0x780] sm:$0xff]  ;;  %v450_v31 = vld [vmem:[%s2646_s13 + $0x788] sm:$0xff] }
  0xcb   : > { %1960 = vst [vmem:[%s2687_s24 + $0x6a8] sm:$0xff] %v1448_v32  ;;  %v943_v43 = vmul.f32 %v2653_v1, %v430_v29  ;;  %1961 = vst [vmem:[%s2687_s24 + $0x6b0] sm:$0xff] %v1449_v35  ;;  %v1451_v47 = vadd.f32 %v2658_v5, %v938_v36  ;;  %v1452_v48 = vadd.f32 %v2658_v5, %v939_v37  ;;  %v451_v32 = vld [vmem:[%s2646_s13 + $0x790] sm:$0xff]  ;;  %v452_v37 = vld [vmem:[%s2646_s13 + $0x798] sm:$0xff] }
  0xcc   : > { %v1453_v49 = vadd.f32 %v2658_v5, %v940_v38  ;;  %v944_v50 = vmul.f32 %v2653_v1, %v431_v34  ;;  %1962 = vst [vmem:[%s2687_s24 + $0x6b8] sm:$0xff] %v1450_v40  ;;  %v1454_v54 = vadd.f32 %v2658_v5, %v941_v41  ;;  %v1455_v55 = vadd.f32 %v2658_v5, %v942_v42  ;;  %v453_v38 = vld [vmem:[%s2646_s13 + $0x7a0] sm:$0xff] }
  0xcd   : > { %v1456_v56 = vadd.f32 %v2658_v5, %v943_v43  ;;  %v945_v57 = vmul.f32 %v2653_v1, %v432_v39  ;;  %1963 = vst [vmem:[%s2687_s24 + $0x6c0] sm:$0xff] %v1451_v47  ;;  %1964 = vst [vmem:[%s2687_s24 + $0x6c8] sm:$0xff] %v1452_v48  ;;  %v946_v60 = vmul.f32 %v2653_v1, %v433_v44  ;;  %v454_v39 = vld [vmem:[%s2646_s13 + $0x7a8] sm:$0xff]  ;;  %v455_v44 = vld [vmem:[%s2646_s13 + $0x7b0] sm:$0xff] }
  0xce   : > { %1965 = vst [vmem:[%s2687_s24 + $0x6d0] sm:$0xff] %v1453_v49  ;;  %v1457_v59 = vadd.f32 %v2658_v5, %v944_v50  ;;  %v947_v61 = vmul.f32 %v2653_v1, %v434_v45  ;;  %v948_v62 = vmul.f32 %v2653_v1, %v435_v46  ;;  %1966 = vst [vmem:[%s2687_s24 + $0x6d8] sm:$0xff] %v1454_v54  ;;  %v456_v49 = vld [vmem:[%s2646_s13 + $0x7b8] sm:$0xff]  ;;  %v457_v54 = vld [vmem:[%s2646_s13 + $0x7c0] sm:$0xff] }
  0xcf   : > { %1967 = vst [vmem:[%s2687_s24 + $0x6e0] sm:$0xff] %v1455_v55  ;;  %1968 = vst [vmem:[%s2687_s24 + $0x6e8] sm:$0xff] %v1456_v56  ;;  %v1458_v0 = vadd.f32 %v2658_v5, %v945_v57  ;;  %v949_v2 = vmul.f32 %v2653_v1, %v436_v51  ;;  %v950_v3 = vmul.f32 %v2653_v1, %v437_v52  ;;  %v458_v55 = vld [vmem:[%s2646_s13 + $0x7c8] sm:$0xff]  ;;  %v459_v56 = vld [vmem:[%s2646_s13 + $0x7d0] sm:$0xff] }
  0xd0   : > { %v951_v4 = vmul.f32 %v2653_v1, %v438_v53  ;;  %1969 = vst [vmem:[%s2687_s24 + $0x6f0] sm:$0xff] %v1457_v59  ;;  %v1459_v9 = vadd.f32 %v2658_v5, %v946_v60  ;;  %v1460_v10 = vadd.f32 %v2658_v5, %v947_v61  ;;  %v1461_v11 = vadd.f32 %v2658_v5, %v948_v62  ;;  %v460_v61 = vld [vmem:[%s2646_s13 + $0x7d8] sm:$0xff]  ;;  %v461_v62 = vld [vmem:[%s2646_s13 + $0x7e0] sm:$0xff] }
  0xd1   : > { %v952_v12 = vmul.f32 %v2653_v1, %v439_v58  ;;  %1970 = vst [vmem:[%s2687_s24 + $0x6f8] sm:$0xff] %v1458_v0  ;;  %v1462_v16 = vadd.f32 %v2658_v5, %v949_v2  ;;  %v1463_v17 = vadd.f32 %v2658_v5, %v950_v3  ;;  %v953_v19 = vmul.f32 %v2653_v1, %v440_v63  ;;  %v462_v63 = vld [vmem:[%s2646_s13 + $0x7e8] sm:$0xff] }
  0xd2   : > { %v1464_v18 = vadd.f32 %v2658_v5, %v951_v4  ;;  %1971 = vst [vmem:[%s2687_s24 + $0x700] sm:$0xff] %v1459_v9  ;;  %1972 = vst [vmem:[%s2687_s24 + $0x708] sm:$0xff] %v1460_v10  ;;  %v954_v22 = vmul.f32 %v2653_v1, %v441_v6  ;;  %v955_v23 = vmul.f32 %v2653_v1, %v442_v7  ;;  %v463_v6 = vld [vmem:[%s2646_s13 + $0x7f0] sm:$0xff] }
  0xd3   : > { %1973 = vst [vmem:[%s2687_s24 + $0x710] sm:$0xff] %v1461_v11  ;;  %v1465_v21 = vadd.f32 %v2658_v5, %v952_v12  ;;  %v956_v24 = vmul.f32 %v2653_v1, %v443_v8  ;;  %1974 = vst [vmem:[%s2687_s24 + $0x718] sm:$0xff] %v1462_v16  ;;  %v1466_v26 = vadd.f32 %v2658_v5, %v953_v19  ;;  %v464_v11 = vld [vmem:[%s2646_s13 + $0x7f8] sm:$0xff]  ;;  %v465_v16 = vld [vmem:[%s2646_s13 + $0x800] sm:$0xff] }
  0xd4   : > { %1975 = vst [vmem:[%s2687_s24 + $0x720] sm:$0xff] %v1463_v17  ;;  %1976 = vst [vmem:[%s2687_s24 + $0x728] sm:$0xff] %v1464_v18  ;;  %v957_v27 = vmul.f32 %v2653_v1, %v444_v13  ;;  %v958_v28 = vmul.f32 %v2653_v1, %v445_v14  ;;  %v959_v29 = vmul.f32 %v2653_v1, %v446_v15  ;;  %v466_v17 = vld [vmem:[%s2646_s13 + $0x808] sm:$0xff]  ;;  %v467_v18 = vld [vmem:[%s2646_s13 + $0x810] sm:$0xff] }
  0xd5   : > { %1977 = vst [vmem:[%s2687_s24 + $0x730] sm:$0xff] %v1465_v21  ;;  %v1467_v33 = vadd.f32 %v2658_v5, %v954_v22  ;;  %v1468_v34 = vadd.f32 %v2658_v5, %v955_v23  ;;  %v1469_v35 = vadd.f32 %v2658_v5, %v956_v24  ;;  %v960_v36 = vmul.f32 %v2653_v1, %v447_v20  ;;  %v468_v23 = vld [vmem:[%s2646_s13 + $0x818] sm:$0xff]  ;;  %v469_v24 = vld [vmem:[%s2646_s13 + $0x820] sm:$0xff] }
  0xd6   : > { %1978 = vst [vmem:[%s2687_s24 + $0x738] sm:$0xff] %v1466_v26  ;;  %v1470_v40 = vadd.f32 %v2658_v5, %v957_v27  ;;  %v1471_v41 = vadd.f32 %v2658_v5, %v958_v28  ;;  %v1472_v42 = vadd.f32 %v2658_v5, %v959_v29  ;;  %v961_v43 = vmul.f32 %v2653_v1, %v448_v25  ;;  %v470_v25 = vld [vmem:[%s2646_s13 + $0x828] sm:$0xff] }
  0xd7   : > { %1979 = vst [vmem:[%s2687_s24 + $0x740] sm:$0xff] %v1467_v33  ;;  %1980 = vst [vmem:[%s2687_s24 + $0x748] sm:$0xff] %v1468_v34  ;;  %v1473_v45 = vadd.f32 %v2658_v5, %v960_v36  ;;  %v962_v46 = vmul.f32 %v2653_v1, %v449_v30  ;;  %v963_v47 = vmul.f32 %v2653_v1, %v450_v31  ;;  %v471_v30 = vld [vmem:[%s2646_s13 + $0x830] sm:$0xff] }
  0xd8   : > { %1981 = vst [vmem:[%s2687_s24 + $0x750] sm:$0xff] %v1469_v35  ;;  %v964_v48 = vmul.f32 %v2653_v1, %v451_v32  ;;  %1982 = vst [vmem:[%s2687_s24 + $0x758] sm:$0xff] %v1470_v40  ;;  %v1474_v50 = vadd.f32 %v2658_v5, %v961_v43  ;;  %v965_v51 = vmul.f32 %v2653_v1, %v452_v37  ;;  %v472_v35 = vld [vmem:[%s2646_s13 + $0x838] sm:$0xff]  ;;  %v473_v40 = vld [vmem:[%s2646_s13 + $0x840] sm:$0xff] }
  0xd9   : > { %1983 = vst [vmem:[%s2687_s24 + $0x760] sm:$0xff] %v1471_v41  ;;  %1984 = vst [vmem:[%s2687_s24 + $0x768] sm:$0xff] %v1472_v42  ;;  %v966_v52 = vmul.f32 %v2653_v1, %v453_v38  ;;  %v967_v53 = vmul.f32 %v2653_v1, %v454_v39  ;;  %v1475_v57 = vadd.f32 %v2658_v5, %v962_v46  ;;  %v474_v41 = vld [vmem:[%s2646_s13 + $0x848] sm:$0xff]  ;;  %v475_v42 = vld [vmem:[%s2646_s13 + $0x850] sm:$0xff] }
  0xda   : > { %1985 = vst [vmem:[%s2687_s24 + $0x770] sm:$0xff] %v1473_v45  ;;  %v1476_v58 = vadd.f32 %v2658_v5, %v963_v47  ;;  %v1477_v59 = vadd.f32 %v2658_v5, %v964_v48  ;;  %v968_v60 = vmul.f32 %v2653_v1, %v455_v44  ;;  %1986 = vst [vmem:[%s2687_s24 + $0x778] sm:$0xff] %v1474_v50  ;;  %v476_v47 = vld [vmem:[%s2646_s13 + $0x858] sm:$0xff]  ;;  %v477_v48 = vld [vmem:[%s2646_s13 + $0x860] sm:$0xff] }
  0xdb   : > { %v1478_v0 = vadd.f32 %v2658_v5, %v965_v51  ;;  %v1479_v2 = vadd.f32 %v2658_v5, %v966_v52  ;;  %v1480_v3 = vadd.f32 %v2658_v5, %v967_v53  ;;  %v969_v4 = vmul.f32 %v2653_v1, %v456_v49  ;;  %1987 = vst [vmem:[%s2687_s24 + $0x780] sm:$0xff] %v1475_v57  ;;  %v478_v49 = vld [vmem:[%s2646_s13 + $0x868] sm:$0xff] }
  0xdc   : > { %1988 = vst [vmem:[%s2687_s24 + $0x788] sm:$0xff] %v1476_v58  ;;  %1989 = vst [vmem:[%s2687_s24 + $0x790] sm:$0xff] %v1477_v59  ;;  %v1481_v7 = vadd.f32 %v2658_v5, %v968_v60  ;;  %v970_v8 = vmul.f32 %v2653_v1, %v457_v54  ;;  %v971_v9 = vmul.f32 %v2653_v1, %v458_v55  ;;  %v479_v54 = vld [vmem:[%s2646_s13 + $0x870] sm:$0xff]  ;;  %v480_v59 = vld [vmem:[%s2646_s13 + $0x878] sm:$0xff] }
  0xdd   : > { %v972_v10 = vmul.f32 %v2653_v1, %v459_v56  ;;  %1990 = vst [vmem:[%s2687_s24 + $0x798] sm:$0xff] %v1478_v0  ;;  %1991 = vst [vmem:[%s2687_s24 + $0x7a0] sm:$0xff] %v1479_v2  ;;  %v1482_v12 = vadd.f32 %v2658_v5, %v969_v4  ;;  %v973_v13 = vmul.f32 %v2653_v1, %v460_v61  ;;  %v481_v0 = vld [vmem:[%s2646_s13 + $0x880] sm:$0xff]  ;;  %v482_v2 = vld [vmem:[%s2646_s13 + $0x888] sm:$0xff] }
  0xde   : > { %1992 = vst [vmem:[%s2687_s24 + $0x7a8] sm:$0xff] %v1480_v3  ;;  %v974_v14 = vmul.f32 %v2653_v1, %v461_v62  ;;  %v975_v15 = vmul.f32 %v2653_v1, %v462_v63  ;;  %1993 = vst [vmem:[%s2687_s24 + $0x7b0] sm:$0xff] %v1481_v7  ;;  %v1483_v19 = vadd.f32 %v2658_v5, %v970_v8  ;;  %v483_v3 = vld [vmem:[%s2646_s13 + $0x890] sm:$0xff] }
  0xdf   : > { %v1484_v20 = vadd.f32 %v2658_v5, %v971_v9  ;;  %v1485_v21 = vadd.f32 %v2658_v5, %v972_v10  ;;  %v976_v22 = vmul.f32 %v2653_v1, %v463_v6  ;;  %1994 = vst [vmem:[%s2687_s24 + $0x7b8] sm:$0xff] %v1482_v12  ;;  %v1486_v26 = vadd.f32 %v2658_v5, %v973_v13  ;;  %v484_v9 = vld [vmem:[%s2646_s13 + $0x898] sm:$0xff]  ;;  %v485_v10 = vld [vmem:[%s2646_s13 + $0x8a0] sm:$0xff] }
  0xe0   : > { %v1487_v27 = vadd.f32 %v2658_v5, %v974_v14  ;;  %v1488_v28 = vadd.f32 %v2658_v5, %v975_v15  ;;  %v977_v29 = vmul.f32 %v2653_v1, %v464_v11  ;;  %1995 = vst [vmem:[%s2687_s24 + $0x7c0] sm:$0xff] %v1483_v19  ;;  %v978_v32 = vmul.f32 %v2653_v1, %v465_v16  ;;  %v486_v11 = vld [vmem:[%s2646_s13 + $0x8a8] sm:$0xff]  ;;  %v487_v16 = vld [vmem:[%s2646_s13 + $0x8b0] sm:$0xff] }
  0xe1   : > { %1996 = vst [vmem:[%s2687_s24 + $0x7c8] sm:$0xff] %v1484_v20  ;;  %1997 = vst [vmem:[%s2687_s24 + $0x7d0] sm:$0xff] %v1485_v21  ;;  %v1489_v31 = vadd.f32 %v2658_v5, %v976_v22  ;;  %v979_v33 = vmul.f32 %v2653_v1, %v466_v17  ;;  %v980_v34 = vmul.f32 %v2653_v1, %v467_v18  ;;  %v488_v21 = vld [vmem:[%s2646_s13 + $0x8b8] sm:$0xff] }
  0xe2   : > { %1998 = vst [vmem:[%s2687_s24 + $0x7d8] sm:$0xff] %v1486_v26  ;;  %1999 = vst [vmem:[%s2687_s24 + $0x7e0] sm:$0xff] %v1487_v27  ;;  %v1490_v36 = vadd.f32 %v2658_v5, %v977_v29  ;;  %v981_v37 = vmul.f32 %v2653_v1, %v468_v23  ;;  %v982_v38 = vmul.f32 %v2653_v1, %v469_v24  ;;  %v489_v26 = vld [vmem:[%s2646_s13 + $0x8c0] sm:$0xff]  ;;  %v490_v27 = vld [vmem:[%s2646_s13 + $0x8c8] sm:$0xff] }
  0xe3   : > { %2000 = vst [vmem:[%s2687_s24 + $0x7e8] sm:$0xff] %v1488_v28  ;;  %v983_v39 = vmul.f32 %v2653_v1, %v470_v25  ;;  %2001 = vst [vmem:[%s2687_s24 + $0x7f0] sm:$0xff] %v1489_v31  ;;  %v1491_v43 = vadd.f32 %v2658_v5, %v978_v32  ;;  %v1492_v44 = vadd.f32 %v2658_v5, %v979_v33  ;;  %v491_v28 = vld [vmem:[%s2646_s13 + $0x8d0] sm:$0xff]  ;;  %v492_v33 = vld [vmem:[%s2646_s13 + $0x8d8] sm:$0xff] }
  0xe4   : > { %v1493_v45 = vadd.f32 %v2658_v5, %v980_v34  ;;  %v984_v46 = vmul.f32 %v2653_v1, %v471_v30  ;;  %2002 = vst [vmem:[%s2687_s24 + $0x7f8] sm:$0xff] %v1490_v36  ;;  %v1494_v50 = vadd.f32 %v2658_v5, %v981_v37  ;;  %v1495_v51 = vadd.f32 %v2658_v5, %v982_v38  ;;  %v493_v34 = vld [vmem:[%s2646_s13 + $0x8e0] sm:$0xff] }
  0xe5   : > { %v1496_v52 = vadd.f32 %v2658_v5, %v983_v39  ;;  %v985_v53 = vmul.f32 %v2653_v1, %v472_v35  ;;  %2003 = vst [vmem:[%s2687_s24 + $0x800] sm:$0xff] %v1491_v43  ;;  %2004 = vst [vmem:[%s2687_s24 + $0x808] sm:$0xff] %v1492_v44  ;;  %v986_v56 = vmul.f32 %v2653_v1, %v473_v40  ;;  %v494_v35 = vld [vmem:[%s2646_s13 + $0x8e8] sm:$0xff]  ;;  %v495_v40 = vld [vmem:[%s2646_s13 + $0x8f0] sm:$0xff] }
  0xe6   : > { %2005 = vst [vmem:[%s2687_s24 + $0x810] sm:$0xff] %v1493_v45  ;;  %v1497_v55 = vadd.f32 %v2658_v5, %v984_v46  ;;  %v987_v57 = vmul.f32 %v2653_v1, %v474_v41  ;;  %v988_v58 = vmul.f32 %v2653_v1, %v475_v42  ;;  %2006 = vst [vmem:[%s2687_s24 + $0x818] sm:$0xff] %v1494_v50  ;;  %v496_v45 = vld [vmem:[%s2646_s13 + $0x8f8] sm:$0xff]  ;;  %v497_v50 = vld [vmem:[%s2646_s13 + $0x900] sm:$0xff] }
  0xe7   : > { %2007 = vst [vmem:[%s2687_s24 + $0x820] sm:$0xff] %v1495_v51  ;;  %2008 = vst [vmem:[%s2687_s24 + $0x828] sm:$0xff] %v1496_v52  ;;  %v1498_v60 = vadd.f32 %v2658_v5, %v985_v53  ;;  %v989_v61 = vmul.f32 %v2653_v1, %v476_v47  ;;  %v990_v62 = vmul.f32 %v2653_v1, %v477_v48  ;;  %v498_v51 = vld [vmem:[%s2646_s13 + $0x908] sm:$0xff]  ;;  %v499_v52 = vld [vmem:[%s2646_s13 + $0x910] sm:$0xff] }
  0xe8   : > { %v991_v63 = vmul.f32 %v2653_v1, %v478_v49  ;;  %2009 = vst [vmem:[%s2687_s24 + $0x830] sm:$0xff] %v1497_v55  ;;  %v1499_v4 = vadd.f32 %v2658_v5, %v986_v56  ;;  %v1500_v6 = vadd.f32 %v2658_v5, %v987_v57  ;;  %v1501_v7 = vadd.f32 %v2658_v5, %v988_v58  ;;  %v500_v57 = vld [vmem:[%s2646_s13 + $0x918] sm:$0xff]  ;;  %v501_v58 = vld [vmem:[%s2646_s13 + $0x920] sm:$0xff] }
  0xe9   : > { %v992_v8 = vmul.f32 %v2653_v1, %v479_v54  ;;  %2010 = vst [vmem:[%s2687_s24 + $0x838] sm:$0xff] %v1498_v60  ;;  %v1502_v12 = vadd.f32 %v2658_v5, %v989_v61  ;;  %v1503_v13 = vadd.f32 %v2658_v5, %v990_v62  ;;  %v993_v15 = vmul.f32 %v2653_v1, %v480_v59  ;;  %v502_v59 = vld [vmem:[%s2646_s13 + $0x928] sm:$0xff] }
  0xea   : > { %v1504_v14 = vadd.f32 %v2658_v5, %v991_v63  ;;  %2011 = vst [vmem:[%s2687_s24 + $0x840] sm:$0xff] %v1499_v4  ;;  %2012 = vst [vmem:[%s2687_s24 + $0x848] sm:$0xff] %v1500_v6  ;;  %v994_v18 = vmul.f32 %v2653_v1, %v481_v0  ;;  %v995_v19 = vmul.f32 %v2653_v1, %v482_v2  ;;  %v503_v0 = vld [vmem:[%s2646_s13 + $0x930] sm:$0xff] }
  0xeb   : > { %2013 = vst [vmem:[%s2687_s24 + $0x850] sm:$0xff] %v1501_v7  ;;  %v1505_v17 = vadd.f32 %v2658_v5, %v992_v8  ;;  %v996_v20 = vmul.f32 %v2653_v1, %v483_v3  ;;  %2014 = vst [vmem:[%s2687_s24 + $0x858] sm:$0xff] %v1502_v12  ;;  %v1506_v22 = vadd.f32 %v2658_v5, %v993_v15  ;;  %v504_v7 = vld [vmem:[%s2646_s13 + $0x938] sm:$0xff]  ;;  %v505_v12 = vld [vmem:[%s2646_s13 + $0x940] sm:$0xff] }
  0xec   : > { %2015 = vst [vmem:[%s2687_s24 + $0x860] sm:$0xff] %v1503_v13  ;;  %2016 = vst [vmem:[%s2687_s24 + $0x868] sm:$0xff] %v1504_v14  ;;  %v997_v23 = vmul.f32 %v2653_v1, %v484_v9  ;;  %v998_v24 = vmul.f32 %v2653_v1, %v485_v10  ;;  %v999_v25 = vmul.f32 %v2653_v1, %v486_v11  ;;  %v506_v13 = vld [vmem:[%s2646_s13 + $0x948] sm:$0xff]  ;;  %v507_v14 = vld [vmem:[%s2646_s13 + $0x950] sm:$0xff] }
  0xed   : > { %2017 = vst [vmem:[%s2687_s24 + $0x870] sm:$0xff] %v1505_v17  ;;  %v1507_v29 = vadd.f32 %v2658_v5, %v994_v18  ;;  %v1508_v30 = vadd.f32 %v2658_v5, %v995_v19  ;;  %v1509_v31 = vadd.f32 %v2658_v5, %v996_v20  ;;  %v1000_v32 = vmul.f32 %v2653_v1, %v487_v16  ;;  %v508_v19 = vld [vmem:[%s2646_s13 + $0x958] sm:$0xff]  ;;  %v509_v20 = vld [vmem:[%s2646_s13 + $0x960] sm:$0xff] }
  0xee   : > { %2018 = vst [vmem:[%s2687_s24 + $0x878] sm:$0xff] %v1506_v22  ;;  %v1510_v36 = vadd.f32 %v2658_v5, %v997_v23  ;;  %v1511_v37 = vadd.f32 %v2658_v5, %v998_v24  ;;  %v1512_v38 = vadd.f32 %v2658_v5, %v999_v25  ;;  %v1001_v39 = vmul.f32 %v2653_v1, %v488_v21  ;;  %v510_v21 = vld [vmem:[%s2646_s13 + $0x968] sm:$0xff] }
  0xef   : > { %2019 = vst [vmem:[%s2687_s24 + $0x880] sm:$0xff] %v1507_v29  ;;  %2020 = vst [vmem:[%s2687_s24 + $0x888] sm:$0xff] %v1508_v30  ;;  %v1513_v41 = vadd.f32 %v2658_v5, %v1000_v32  ;;  %v1002_v42 = vmul.f32 %v2653_v1, %v489_v26  ;;  %v1003_v43 = vmul.f32 %v2653_v1, %v490_v27  ;;  %v511_v26 = vld [vmem:[%s2646_s13 + $0x970] sm:$0xff] }
  0xf0   : > { %2021 = vst [vmem:[%s2687_s24 + $0x890] sm:$0xff] %v1509_v31  ;;  %v1004_v44 = vmul.f32 %v2653_v1, %v491_v28  ;;  %2022 = vst [vmem:[%s2687_s24 + $0x898] sm:$0xff] %v1510_v36  ;;  %v1514_v46 = vadd.f32 %v2658_v5, %v1001_v39  ;;  %v1005_v47 = vmul.f32 %v2653_v1, %v492_v33  ;;  %v512_v31 = vld [vmem:[%s2646_s13 + $0x978] sm:$0xff]  ;;  %v513_v36 = vld [vmem:[%s2646_s13 + $0x980] sm:$0xff] }
  0xf1   : > { %2023 = vst [vmem:[%s2687_s24 + $0x8a0] sm:$0xff] %v1511_v37  ;;  %2024 = vst [vmem:[%s2687_s24 + $0x8a8] sm:$0xff] %v1512_v38  ;;  %v1006_v48 = vmul.f32 %v2653_v1, %v493_v34  ;;  %v1007_v49 = vmul.f32 %v2653_v1, %v494_v35  ;;  %v1515_v53 = vadd.f32 %v2658_v5, %v1002_v42  ;;  %v514_v37 = vld [vmem:[%s2646_s13 + $0x988] sm:$0xff]  ;;  %v515_v38 = vld [vmem:[%s2646_s13 + $0x990] sm:$0xff] }
  0xf2   : > { %2025 = vst [vmem:[%s2687_s24 + $0x8b0] sm:$0xff] %v1513_v41  ;;  %v1516_v54 = vadd.f32 %v2658_v5, %v1003_v43  ;;  %v1517_v55 = vadd.f32 %v2658_v5, %v1004_v44  ;;  %v1008_v56 = vmul.f32 %v2653_v1, %v495_v40  ;;  %2026 = vst [vmem:[%s2687_s24 + $0x8b8] sm:$0xff] %v1514_v46  ;;  %v516_v43 = vld [vmem:[%s2646_s13 + $0x998] sm:$0xff]  ;;  %v517_v44 = vld [vmem:[%s2646_s13 + $0x9a0] sm:$0xff] }
  0xf3   : > { %v1518_v60 = vadd.f32 %v2658_v5, %v1005_v47  ;;  %v1519_v61 = vadd.f32 %v2658_v5, %v1006_v48  ;;  %v1520_v62 = vadd.f32 %v2658_v5, %v1007_v49  ;;  %v1009_v63 = vmul.f32 %v2653_v1, %v496_v45  ;;  %2027 = vst [vmem:[%s2687_s24 + $0x8c0] sm:$0xff] %v1515_v53  ;;  %v518_v45 = vld [vmem:[%s2646_s13 + $0x9a8] sm:$0xff] }
  0xf4   : > { %2028 = vst [vmem:[%s2687_s24 + $0x8c8] sm:$0xff] %v1516_v54  ;;  %2029 = vst [vmem:[%s2687_s24 + $0x8d0] sm:$0xff] %v1517_v55  ;;  %v1521_v2 = vadd.f32 %v2658_v5, %v1008_v56  ;;  %v1010_v3 = vmul.f32 %v2653_v1, %v497_v50  ;;  %v1011_v4 = vmul.f32 %v2653_v1, %v498_v51  ;;  %v519_v50 = vld [vmem:[%s2646_s13 + $0x9b0] sm:$0xff]  ;;  %v520_v55 = vld [vmem:[%s2646_s13 + $0x9b8] sm:$0xff] }
  0xf5   : > { %v1012_v6 = vmul.f32 %v2653_v1, %v499_v52  ;;  %2030 = vst [vmem:[%s2687_s24 + $0x8d8] sm:$0xff] %v1518_v60  ;;  %2031 = vst [vmem:[%s2687_s24 + $0x8e0] sm:$0xff] %v1519_v61  ;;  %v1522_v8 = vadd.f32 %v2658_v5, %v1009_v63  ;;  %v1013_v9 = vmul.f32 %v2653_v1, %v500_v57  ;;  %v521_v60 = vld [vmem:[%s2646_s13 + $0x9c0] sm:$0xff]  ;;  %v522_v61 = vld [vmem:[%s2646_s13 + $0x9c8] sm:$0xff] }
  0xf6   : > { %2032 = vst [vmem:[%s2687_s24 + $0x8e8] sm:$0xff] %v1520_v62  ;;  %v1014_v10 = vmul.f32 %v2653_v1, %v501_v58  ;;  %v1015_v11 = vmul.f32 %v2653_v1, %v502_v59  ;;  %2033 = vst [vmem:[%s2687_s24 + $0x8f0] sm:$0xff] %v1521_v2  ;;  %v1523_v15 = vadd.f32 %v2658_v5, %v1010_v3  ;;  %v523_v62 = vld [vmem:[%s2646_s13 + $0x9d0] sm:$0xff] }
  0xf7   : > { %v1524_v16 = vadd.f32 %v2658_v5, %v1011_v4  ;;  %v1525_v17 = vadd.f32 %v2658_v5, %v1012_v6  ;;  %v1016_v18 = vmul.f32 %v2653_v1, %v503_v0  ;;  %2034 = vst [vmem:[%s2687_s24 + $0x8f8] sm:$0xff] %v1522_v8  ;;  %v1526_v22 = vadd.f32 %v2658_v5, %v1013_v9  ;;  %v524_v4 = vld [vmem:[%s2646_s13 + $0x9d8] sm:$0xff]  ;;  %v525_v6 = vld [vmem:[%s2646_s13 + $0x9e0] sm:$0xff] }
  0xf8   : > { %v1527_v23 = vadd.f32 %v2658_v5, %v1014_v10  ;;  %v1528_v24 = vadd.f32 %v2658_v5, %v1015_v11  ;;  %v1017_v25 = vmul.f32 %v2653_v1, %v504_v7  ;;  %2035 = vst [vmem:[%s2687_s24 + $0x900] sm:$0xff] %v1523_v15  ;;  %v1018_v28 = vmul.f32 %v2653_v1, %v505_v12  ;;  %v526_v7 = vld [vmem:[%s2646_s13 + $0x9e8] sm:$0xff]  ;;  %v527_v12 = vld [vmem:[%s2646_s13 + $0x9f0] sm:$0xff] }
  0xf9   : > { %2036 = vst [vmem:[%s2687_s24 + $0x908] sm:$0xff] %v1524_v16  ;;  %2037 = vst [vmem:[%s2687_s24 + $0x910] sm:$0xff] %v1525_v17  ;;  %v1529_v27 = vadd.f32 %v2658_v5, %v1016_v18  ;;  %v1019_v29 = vmul.f32 %v2653_v1, %v506_v13  ;;  %v1020_v30 = vmul.f32 %v2653_v1, %v507_v14  ;;  %v528_v17 = vld [vmem:[%s2646_s13 + $0x9f8] sm:$0xff] }
  0xfa   : > { %2038 = vst [vmem:[%s2687_s24 + $0x918] sm:$0xff] %v1526_v22  ;;  %2039 = vst [vmem:[%s2687_s24 + $0x920] sm:$0xff] %v1527_v23  ;;  %v1530_v32 = vadd.f32 %v2658_v5, %v1017_v25  ;;  %v1021_v33 = vmul.f32 %v2653_v1, %v508_v19  ;;  %v1022_v34 = vmul.f32 %v2653_v1, %v509_v20  ;;  %v529_v22 = vld [vmem:[%s2646_s13 + $0xa00] sm:$0xff]  ;;  %v530_v23 = vld [vmem:[%s2646_s13 + $0xa08] sm:$0xff] }
  0xfb   : > { %2040 = vst [vmem:[%s2687_s24 + $0x928] sm:$0xff] %v1528_v24  ;;  %v1023_v35 = vmul.f32 %v2653_v1, %v510_v21  ;;  %2041 = vst [vmem:[%s2687_s24 + $0x930] sm:$0xff] %v1529_v27  ;;  %v1531_v39 = vadd.f32 %v2658_v5, %v1018_v28  ;;  %v1532_v40 = vadd.f32 %v2658_v5, %v1019_v29  ;;  %v531_v24 = vld [vmem:[%s2646_s13 + $0xa10] sm:$0xff]  ;;  %v532_v29 = vld [vmem:[%s2646_s13 + $0xa18] sm:$0xff] }
  0xfc   : > { %v1533_v41 = vadd.f32 %v2658_v5, %v1020_v30  ;;  %v1024_v42 = vmul.f32 %v2653_v1, %v511_v26  ;;  %2042 = vst [vmem:[%s2687_s24 + $0x938] sm:$0xff] %v1530_v32  ;;  %v1534_v46 = vadd.f32 %v2658_v5, %v1021_v33  ;;  %v1535_v47 = vadd.f32 %v2658_v5, %v1022_v34  ;;  %v533_v30 = vld [vmem:[%s2646_s13 + $0xa20] sm:$0xff] }
  0xfd   : > { %v1536_v48 = vadd.f32 %v2658_v5, %v1023_v35  ;;  %v1025_v49 = vmul.f32 %v2653_v1, %v512_v31  ;;  %2043 = vst [vmem:[%s2687_s24 + $0x940] sm:$0xff] %v1531_v39  ;;  %2044 = vst [vmem:[%s2687_s24 + $0x948] sm:$0xff] %v1532_v40  ;;  %v1026_v52 = vmul.f32 %v2653_v1, %v513_v36  ;;  %v534_v31 = vld [vmem:[%s2646_s13 + $0xa28] sm:$0xff]  ;;  %v535_v36 = vld [vmem:[%s2646_s13 + $0xa30] sm:$0xff] }
  0xfe   : > { %2045 = vst [vmem:[%s2687_s24 + $0x950] sm:$0xff] %v1533_v41  ;;  %v1537_v51 = vadd.f32 %v2658_v5, %v1024_v42  ;;  %v1027_v53 = vmul.f32 %v2653_v1, %v514_v37  ;;  %v1028_v54 = vmul.f32 %v2653_v1, %v515_v38  ;;  %2046 = vst [vmem:[%s2687_s24 + $0x958] sm:$0xff] %v1534_v46  ;;  %v536_v41 = vld [vmem:[%s2646_s13 + $0xa38] sm:$0xff]  ;;  %v537_v46 = vld [vmem:[%s2646_s13 + $0xa40] sm:$0xff] }
  0xff   : > { %2047 = vst [vmem:[%s2687_s24 + $0x960] sm:$0xff] %v1535_v47  ;;  %2048 = vst [vmem:[%s2687_s24 + $0x968] sm:$0xff] %v1536_v48  ;;  %v1538_v56 = vadd.f32 %v2658_v5, %v1025_v49  ;;  %v1029_v57 = vmul.f32 %v2653_v1, %v516_v43  ;;  %v1030_v58 = vmul.f32 %v2653_v1, %v517_v44  ;;  %v538_v47 = vld [vmem:[%s2646_s13 + $0xa48] sm:$0xff]  ;;  %v539_v48 = vld [vmem:[%s2646_s13 + $0xa50] sm:$0xff] }
 0x100   : > { %v1031_v59 = vmul.f32 %v2653_v1, %v518_v45  ;;  %2049 = vst [vmem:[%s2687_s24 + $0x970] sm:$0xff] %v1537_v51  ;;  %v1539_v63 = vadd.f32 %v2658_v5, %v1026_v52  ;;  %v1540_v0 = vadd.f32 %v2658_v5, %v1027_v53  ;;  %v1541_v2 = vadd.f32 %v2658_v5, %v1028_v54  ;;  %v540_v53 = vld [vmem:[%s2646_s13 + $0xa58] sm:$0xff]  ;;  %v541_v54 = vld [vmem:[%s2646_s13 + $0xa60] sm:$0xff] }
 0x101   : > { %v1032_v3 = vmul.f32 %v2653_v1, %v519_v50  ;;  %2050 = vst [vmem:[%s2687_s24 + $0x978] sm:$0xff] %v1538_v56  ;;  %v1542_v8 = vadd.f32 %v2658_v5, %v1029_v57  ;;  %v1543_v9 = vadd.f32 %v2658_v5, %v1030_v58  ;;  %v1033_v11 = vmul.f32 %v2653_v1, %v520_v55  ;;  %v542_v55 = vld [vmem:[%s2646_s13 + $0xa68] sm:$0xff] }
 0x102   : > { %v1544_v10 = vadd.f32 %v2658_v5, %v1031_v59  ;;  %2051 = vst [vmem:[%s2687_s24 + $0x980] sm:$0xff] %v1539_v63  ;;  %2052 = vst [vmem:[%s2687_s24 + $0x988] sm:$0xff] %v1540_v0  ;;  %v1034_v14 = vmul.f32 %v2653_v1, %v521_v60  ;;  %v1035_v15 = vmul.f32 %v2653_v1, %v522_v61  ;;  %v543_v60 = vld [vmem:[%s2646_s13 + $0xa70] sm:$0xff] }
 0x103   : > { %2053 = vst [vmem:[%s2687_s24 + $0x990] sm:$0xff] %v1541_v2  ;;  %v1545_v13 = vadd.f32 %v2658_v5, %v1032_v3  ;;  %v1036_v16 = vmul.f32 %v2653_v1, %v523_v62  ;;  %2054 = vst [vmem:[%s2687_s24 + $0x998] sm:$0xff] %v1542_v8  ;;  %v1546_v18 = vadd.f32 %v2658_v5, %v1033_v11  ;;  %v544_v2 = vld [vmem:[%s2646_s13 + $0xa78] sm:$0xff]  ;;  %v545_v8 = vld [vmem:[%s2646_s13 + $0xa80] sm:$0xff] }
 0x104   : > { %2055 = vst [vmem:[%s2687_s24 + $0x9a0] sm:$0xff] %v1543_v9  ;;  %2056 = vst [vmem:[%s2687_s24 + $0x9a8] sm:$0xff] %v1544_v10  ;;  %v1037_v19 = vmul.f32 %v2653_v1, %v524_v4  ;;  %v1038_v20 = vmul.f32 %v2653_v1, %v525_v6  ;;  %v1039_v21 = vmul.f32 %v2653_v1, %v526_v7  ;;  %v546_v9 = vld [vmem:[%s2646_s13 + $0xa88] sm:$0xff]  ;;  %v547_v10 = vld [vmem:[%s2646_s13 + $0xa90] sm:$0xff] }
 0x105   : > { %2057 = vst [vmem:[%s2687_s24 + $0x9b0] sm:$0xff] %v1545_v13  ;;  %v1547_v25 = vadd.f32 %v2658_v5, %v1034_v14  ;;  %v1548_v26 = vadd.f32 %v2658_v5, %v1035_v15  ;;  %v1549_v27 = vadd.f32 %v2658_v5, %v1036_v16  ;;  %v1040_v28 = vmul.f32 %v2653_v1, %v527_v12  ;;  %v548_v15 = vld [vmem:[%s2646_s13 + $0xa98] sm:$0xff]  ;;  %v549_v16 = vld [vmem:[%s2646_s13 + $0xaa0] sm:$0xff] }
 0x106   : > { %2058 = vst [vmem:[%s2687_s24 + $0x9b8] sm:$0xff] %v1546_v18  ;;  %v1550_v32 = vadd.f32 %v2658_v5, %v1037_v19  ;;  %v1551_v33 = vadd.f32 %v2658_v5, %v1038_v20  ;;  %v1552_v34 = vadd.f32 %v2658_v5, %v1039_v21  ;;  %v1041_v35 = vmul.f32 %v2653_v1, %v528_v17  ;;  %v550_v17 = vld [vmem:[%s2646_s13 + $0xaa8] sm:$0xff] }
 0x107   : > { %2059 = vst [vmem:[%s2687_s24 + $0x9c0] sm:$0xff] %v1547_v25  ;;  %2060 = vst [vmem:[%s2687_s24 + $0x9c8] sm:$0xff] %v1548_v26  ;;  %v1553_v37 = vadd.f32 %v2658_v5, %v1040_v28  ;;  %v1042_v38 = vmul.f32 %v2653_v1, %v529_v22  ;;  %v1043_v39 = vmul.f32 %v2653_v1, %v530_v23  ;;  %v551_v22 = vld [vmem:[%s2646_s13 + $0xab0] sm:$0xff] }
 0x108   : > { %2061 = vst [vmem:[%s2687_s24 + $0x9d0] sm:$0xff] %v1549_v27  ;;  %v1044_v40 = vmul.f32 %v2653_v1, %v531_v24  ;;  %2062 = vst [vmem:[%s2687_s24 + $0x9d8] sm:$0xff] %v1550_v32  ;;  %v1554_v42 = vadd.f32 %v2658_v5, %v1041_v35  ;;  %v1045_v43 = vmul.f32 %v2653_v1, %v532_v29  ;;  %v552_v27 = vld [vmem:[%s2646_s13 + $0xab8] sm:$0xff]  ;;  %v553_v32 = vld [vmem:[%s2646_s13 + $0xac0] sm:$0xff] }
 0x109   : > { %2063 = vst [vmem:[%s2687_s24 + $0x9e0] sm:$0xff] %v1551_v33  ;;  %2064 = vst [vmem:[%s2687_s24 + $0x9e8] sm:$0xff] %v1552_v34  ;;  %v1046_v44 = vmul.f32 %v2653_v1, %v533_v30  ;;  %v1047_v45 = vmul.f32 %v2653_v1, %v534_v31  ;;  %v1555_v49 = vadd.f32 %v2658_v5, %v1042_v38  ;;  %v554_v33 = vld [vmem:[%s2646_s13 + $0xac8] sm:$0xff]  ;;  %v555_v34 = vld [vmem:[%s2646_s13 + $0xad0] sm:$0xff] }
 0x10a   : > { %2065 = vst [vmem:[%s2687_s24 + $0x9f0] sm:$0xff] %v1553_v37  ;;  %v1556_v50 = vadd.f32 %v2658_v5, %v1043_v39  ;;  %v1557_v51 = vadd.f32 %v2658_v5, %v1044_v40  ;;  %v1048_v52 = vmul.f32 %v2653_v1, %v535_v36  ;;  %2066 = vst [vmem:[%s2687_s24 + $0x9f8] sm:$0xff] %v1554_v42  ;;  %v556_v39 = vld [vmem:[%s2646_s13 + $0xad8] sm:$0xff]  ;;  %v557_v40 = vld [vmem:[%s2646_s13 + $0xae0] sm:$0xff] }
 0x10b   : > { %v1558_v56 = vadd.f32 %v2658_v5, %v1045_v43  ;;  %v1559_v57 = vadd.f32 %v2658_v5, %v1046_v44  ;;  %v1560_v58 = vadd.f32 %v2658_v5, %v1047_v45  ;;  %v1049_v59 = vmul.f32 %v2653_v1, %v536_v41  ;;  %2067 = vst [vmem:[%s2687_s24 + $0xa00] sm:$0xff] %v1555_v49  ;;  %v558_v41 = vld [vmem:[%s2646_s13 + $0xae8] sm:$0xff] }
 0x10c   : > { %2068 = vst [vmem:[%s2687_s24 + $0xa08] sm:$0xff] %v1556_v50  ;;  %2069 = vst [vmem:[%s2687_s24 + $0xa10] sm:$0xff] %v1557_v51  ;;  %v1561_v61 = vadd.f32 %v2658_v5, %v1048_v52  ;;  %v1050_v62 = vmul.f32 %v2653_v1, %v537_v46  ;;  %v1051_v63 = vmul.f32 %v2653_v1, %v538_v47  ;;  %v559_v46 = vld [vmem:[%s2646_s13 + $0xaf0] sm:$0xff]  ;;  %v560_v51 = vld [vmem:[%s2646_s13 + $0xaf8] sm:$0xff] }
 0x10d   : > { %v1052_v0 = vmul.f32 %v2653_v1, %v539_v48  ;;  %2070 = vst [vmem:[%s2687_s24 + $0xa18] sm:$0xff] %v1558_v56  ;;  %2071 = vst [vmem:[%s2687_s24 + $0xa20] sm:$0xff] %v1559_v57  ;;  %v1562_v3 = vadd.f32 %v2658_v5, %v1049_v59  ;;  %v1053_v4 = vmul.f32 %v2653_v1, %v540_v53  ;;  %v561_v56 = vld [vmem:[%s2646_s13 + $0xb00] sm:$0xff]  ;;  %v562_v57 = vld [vmem:[%s2646_s13 + $0xb08] sm:$0xff] }
 0x10e   : > { %2072 = vst [vmem:[%s2687_s24 + $0xa28] sm:$0xff] %v1560_v58  ;;  %v1054_v6 = vmul.f32 %v2653_v1, %v541_v54  ;;  %v1055_v7 = vmul.f32 %v2653_v1, %v542_v55  ;;  %2073 = vst [vmem:[%s2687_s24 + $0xa30] sm:$0xff] %v1561_v61  ;;  %v1563_v11 = vadd.f32 %v2658_v5, %v1050_v62  ;;  %v563_v58 = vld [vmem:[%s2646_s13 + $0xb10] sm:$0xff] }
 0x10f   : > { %v1564_v12 = vadd.f32 %v2658_v5, %v1051_v63  ;;  %v1565_v13 = vadd.f32 %v2658_v5, %v1052_v0  ;;  %v1056_v14 = vmul.f32 %v2653_v1, %v543_v60  ;;  %2074 = vst [vmem:[%s2687_s24 + $0xa38] sm:$0xff] %v1562_v3  ;;  %v1566_v18 = vadd.f32 %v2658_v5, %v1053_v4  ;;  %v564_v63 = vld [vmem:[%s2646_s13 + $0xb18] sm:$0xff]  ;;  %v565_v0 = vld [vmem:[%s2646_s13 + $0xb20] sm:$0xff] }
 0x110   : > { %v1567_v19 = vadd.f32 %v2658_v5, %v1054_v6  ;;  %v1568_v20 = vadd.f32 %v2658_v5, %v1055_v7  ;;  %v1057_v21 = vmul.f32 %v2653_v1, %v544_v2  ;;  %2075 = vst [vmem:[%s2687_s24 + $0xa40] sm:$0xff] %v1563_v11  ;;  %v1058_v24 = vmul.f32 %v2653_v1, %v545_v8  ;;  %v566_v2 = vld [vmem:[%s2646_s13 + $0xb28] sm:$0xff]  ;;  %v567_v8 = vld [vmem:[%s2646_s13 + $0xb30] sm:$0xff] }
 0x111   : > { %2076 = vst [vmem:[%s2687_s24 + $0xa48] sm:$0xff] %v1564_v12  ;;  %2077 = vst [vmem:[%s2687_s24 + $0xa50] sm:$0xff] %v1565_v13  ;;  %v1569_v23 = vadd.f32 %v2658_v5, %v1056_v14  ;;  %v1059_v25 = vmul.f32 %v2653_v1, %v546_v9  ;;  %v1060_v26 = vmul.f32 %v2653_v1, %v547_v10  ;;  %v568_v13 = vld [vmem:[%s2646_s13 + $0xb38] sm:$0xff] }
 0x112   : > { %2078 = vst [vmem:[%s2687_s24 + $0xa58] sm:$0xff] %v1566_v18  ;;  %2079 = vst [vmem:[%s2687_s24 + $0xa60] sm:$0xff] %v1567_v19  ;;  %v1570_v28 = vadd.f32 %v2658_v5, %v1057_v21  ;;  %v1061_v29 = vmul.f32 %v2653_v1, %v548_v15  ;;  %v1062_v30 = vmul.f32 %v2653_v1, %v549_v16  ;;  %v569_v18 = vld [vmem:[%s2646_s13 + $0xb40] sm:$0xff]  ;;  %v570_v19 = vld [vmem:[%s2646_s13 + $0xb48] sm:$0xff] }
 0x113   : > { %2080 = vst [vmem:[%s2687_s24 + $0xa68] sm:$0xff] %v1568_v20  ;;  %v1063_v31 = vmul.f32 %v2653_v1, %v550_v17  ;;  %2081 = vst [vmem:[%s2687_s24 + $0xa70] sm:$0xff] %v1569_v23  ;;  %v1571_v35 = vadd.f32 %v2658_v5, %v1058_v24  ;;  %v1572_v36 = vadd.f32 %v2658_v5, %v1059_v25  ;;  %v571_v20 = vld [vmem:[%s2646_s13 + $0xb50] sm:$0xff]  ;;  %v572_v25 = vld [vmem:[%s2646_s13 + $0xb58] sm:$0xff] }
 0x114   : > { %v1573_v37 = vadd.f32 %v2658_v5, %v1060_v26  ;;  %v1064_v38 = vmul.f32 %v2653_v1, %v551_v22  ;;  %2082 = vst [vmem:[%s2687_s24 + $0xa78] sm:$0xff] %v1570_v28  ;;  %v1574_v42 = vadd.f32 %v2658_v5, %v1061_v29  ;;  %v1575_v43 = vadd.f32 %v2658_v5, %v1062_v30  ;;  %v573_v26 = vld [vmem:[%s2646_s13 + $0xb60] sm:$0xff] }
 0x115   : > { %v1576_v44 = vadd.f32 %v2658_v5, %v1063_v31  ;;  %v1065_v45 = vmul.f32 %v2653_v1, %v552_v27  ;;  %2083 = vst [vmem:[%s2687_s24 + $0xa80] sm:$0xff] %v1571_v35  ;;  %2084 = vst [vmem:[%s2687_s24 + $0xa88] sm:$0xff] %v1572_v36  ;;  %v1066_v48 = vmul.f32 %v2653_v1, %v553_v32  ;;  %v574_v27 = vld [vmem:[%s2646_s13 + $0xb68] sm:$0xff]  ;;  %v575_v32 = vld [vmem:[%s2646_s13 + $0xb70] sm:$0xff] }
 0x116   : > { %2085 = vst [vmem:[%s2687_s24 + $0xa90] sm:$0xff] %v1573_v37  ;;  %v1577_v47 = vadd.f32 %v2658_v5, %v1064_v38  ;;  %v1067_v49 = vmul.f32 %v2653_v1, %v554_v33  ;;  %v1068_v50 = vmul.f32 %v2653_v1, %v555_v34  ;;  %2086 = vst [vmem:[%s2687_s24 + $0xa98] sm:$0xff] %v1574_v42  ;;  %v576_v37 = vld [vmem:[%s2646_s13 + $0xb78] sm:$0xff]  ;;  %v577_v42 = vld [vmem:[%s2646_s13 + $0xb80] sm:$0xff] }
 0x117   : > { %2087 = vst [vmem:[%s2687_s24 + $0xaa0] sm:$0xff] %v1575_v43  ;;  %2088 = vst [vmem:[%s2687_s24 + $0xaa8] sm:$0xff] %v1576_v44  ;;  %v1578_v52 = vadd.f32 %v2658_v5, %v1065_v45  ;;  %v1069_v53 = vmul.f32 %v2653_v1, %v556_v39  ;;  %v1070_v54 = vmul.f32 %v2653_v1, %v557_v40  ;;  %v578_v43 = vld [vmem:[%s2646_s13 + $0xb88] sm:$0xff]  ;;  %v579_v44 = vld [vmem:[%s2646_s13 + $0xb90] sm:$0xff] }
 0x118   : > { %v1071_v55 = vmul.f32 %v2653_v1, %v558_v41  ;;  %2089 = vst [vmem:[%s2687_s24 + $0xab0] sm:$0xff] %v1577_v47  ;;  %v1579_v59 = vadd.f32 %v2658_v5, %v1066_v48  ;;  %v1580_v60 = vadd.f32 %v2658_v5, %v1067_v49  ;;  %v1581_v61 = vadd.f32 %v2658_v5, %v1068_v50  ;;  %v580_v49 = vld [vmem:[%s2646_s13 + $0xb98] sm:$0xff]  ;;  %v581_v50 = vld [vmem:[%s2646_s13 + $0xba0] sm:$0xff] }
 0x119   : > { %v1072_v62 = vmul.f32 %v2653_v1, %v559_v46  ;;  %2090 = vst [vmem:[%s2687_s24 + $0xab8] sm:$0xff] %v1578_v52  ;;  %v1582_v3 = vadd.f32 %v2658_v5, %v1069_v53  ;;  %v1583_v4 = vadd.f32 %v2658_v5, %v1070_v54  ;;  %v1073_v7 = vmul.f32 %v2653_v1, %v560_v51  ;;  %v582_v51 = vld [vmem:[%s2646_s13 + $0xba8] sm:$0xff] }
 0x11a   : > { %v1584_v6 = vadd.f32 %v2658_v5, %v1071_v55  ;;  %2091 = vst [vmem:[%s2687_s24 + $0xac0] sm:$0xff] %v1579_v59  ;;  %2092 = vst [vmem:[%s2687_s24 + $0xac8] sm:$0xff] %v1580_v60  ;;  %v1074_v10 = vmul.f32 %v2653_v1, %v561_v56  ;;  %v1075_v11 = vmul.f32 %v2653_v1, %v562_v57  ;;  %v583_v56 = vld [vmem:[%s2646_s13 + $0xbb0] sm:$0xff] }
 0x11b   : > { %2093 = vst [vmem:[%s2687_s24 + $0xad0] sm:$0xff] %v1581_v61  ;;  %v1585_v9 = vadd.f32 %v2658_v5, %v1072_v62  ;;  %v1076_v12 = vmul.f32 %v2653_v1, %v563_v58  ;;  %2094 = vst [vmem:[%s2687_s24 + $0xad8] sm:$0xff] %v1582_v3  ;;  %v1586_v14 = vadd.f32 %v2658_v5, %v1073_v7  ;;  %v584_v61 = vld [vmem:[%s2646_s13 + $0xbb8] sm:$0xff]  ;;  %v585_v3 = vld [vmem:[%s2646_s13 + $0xbc0] sm:$0xff] }
 0x11c   : > { %2095 = vst [vmem:[%s2687_s24 + $0xae0] sm:$0xff] %v1583_v4  ;;  %2096 = vst [vmem:[%s2687_s24 + $0xae8] sm:$0xff] %v1584_v6  ;;  %v1077_v15 = vmul.f32 %v2653_v1, %v564_v63  ;;  %v1078_v16 = vmul.f32 %v2653_v1, %v565_v0  ;;  %v1079_v17 = vmul.f32 %v2653_v1, %v566_v2  ;;  %v586_v4 = vld [vmem:[%s2646_s13 + $0xbc8] sm:$0xff]  ;;  %v587_v6 = vld [vmem:[%s2646_s13 + $0xbd0] sm:$0xff] }
 0x11d   : > { %2097 = vst [vmem:[%s2687_s24 + $0xaf0] sm:$0xff] %v1585_v9  ;;  %v1587_v21 = vadd.f32 %v2658_v5, %v1074_v10  ;;  %v1588_v22 = vadd.f32 %v2658_v5, %v1075_v11  ;;  %v1589_v23 = vadd.f32 %v2658_v5, %v1076_v12  ;;  %v1080_v24 = vmul.f32 %v2653_v1, %v567_v8  ;;  %v588_v11 = vld [vmem:[%s2646_s13 + $0xbd8] sm:$0xff]  ;;  %v589_v12 = vld [vmem:[%s2646_s13 + $0xbe0] sm:$0xff] }
 0x11e   : > { %2098 = vst [vmem:[%s2687_s24 + $0xaf8] sm:$0xff] %v1586_v14  ;;  %v1590_v28 = vadd.f32 %v2658_v5, %v1077_v15  ;;  %v1591_v29 = vadd.f32 %v2658_v5, %v1078_v16  ;;  %v1592_v30 = vadd.f32 %v2658_v5, %v1079_v17  ;;  %v1081_v31 = vmul.f32 %v2653_v1, %v568_v13  ;;  %v590_v13 = vld [vmem:[%s2646_s13 + $0xbe8] sm:$0xff] }
 0x11f   : > { %2099 = vst [vmem:[%s2687_s24 + $0xb00] sm:$0xff] %v1587_v21  ;;  %2100 = vst [vmem:[%s2687_s24 + $0xb08] sm:$0xff] %v1588_v22  ;;  %v1593_v33 = vadd.f32 %v2658_v5, %v1080_v24  ;;  %v1082_v34 = vmul.f32 %v2653_v1, %v569_v18  ;;  %v1083_v35 = vmul.f32 %v2653_v1, %v570_v19  ;;  %v591_v18 = vld [vmem:[%s2646_s13 + $0xbf0] sm:$0xff] }
 0x120   : > { %2101 = vst [vmem:[%s2687_s24 + $0xb10] sm:$0xff] %v1589_v23  ;;  %v1084_v36 = vmul.f32 %v2653_v1, %v571_v20  ;;  %2102 = vst [vmem:[%s2687_s24 + $0xb18] sm:$0xff] %v1590_v28  ;;  %v1594_v38 = vadd.f32 %v2658_v5, %v1081_v31  ;;  %v1085_v39 = vmul.f32 %v2653_v1, %v572_v25  ;;  %v592_v23 = vld [vmem:[%s2646_s13 + $0xbf8] sm:$0xff]  ;;  %v593_v28 = vld [vmem:[%s2646_s13 + $0xc00] sm:$0xff] }
 0x121   : > { %2103 = vst [vmem:[%s2687_s24 + $0xb20] sm:$0xff] %v1591_v29  ;;  %2104 = vst [vmem:[%s2687_s24 + $0xb28] sm:$0xff] %v1592_v30  ;;  %v1086_v40 = vmul.f32 %v2653_v1, %v573_v26  ;;  %v1087_v41 = vmul.f32 %v2653_v1, %v574_v27  ;;  %v1595_v45 = vadd.f32 %v2658_v5, %v1082_v34  ;;  %v594_v29 = vld [vmem:[%s2646_s13 + $0xc08] sm:$0xff]  ;;  %v595_v30 = vld [vmem:[%s2646_s13 + $0xc10] sm:$0xff] }
 0x122   : > { %2105 = vst [vmem:[%s2687_s24 + $0xb30] sm:$0xff] %v1593_v33  ;;  %v1596_v46 = vadd.f32 %v2658_v5, %v1083_v35  ;;  %v1597_v47 = vadd.f32 %v2658_v5, %v1084_v36  ;;  %v1088_v48 = vmul.f32 %v2653_v1, %v575_v32  ;;  %2106 = vst [vmem:[%s2687_s24 + $0xb38] sm:$0xff] %v1594_v38  ;;  %v596_v35 = vld [vmem:[%s2646_s13 + $0xc18] sm:$0xff]  ;;  %v597_v36 = vld [vmem:[%s2646_s13 + $0xc20] sm:$0xff] }
 0x123   : > { %v1598_v52 = vadd.f32 %v2658_v5, %v1085_v39  ;;  %v1599_v53 = vadd.f32 %v2658_v5, %v1086_v40  ;;  %v1600_v54 = vadd.f32 %v2658_v5, %v1087_v41  ;;  %v1089_v55 = vmul.f32 %v2653_v1, %v576_v37  ;;  %2107 = vst [vmem:[%s2687_s24 + $0xb40] sm:$0xff] %v1595_v45  ;;  %v598_v37 = vld [vmem:[%s2646_s13 + $0xc28] sm:$0xff] }
 0x124   : > { %2108 = vst [vmem:[%s2687_s24 + $0xb48] sm:$0xff] %v1596_v46  ;;  %2109 = vst [vmem:[%s2687_s24 + $0xb50] sm:$0xff] %v1597_v47  ;;  %v1601_v57 = vadd.f32 %v2658_v5, %v1088_v48  ;;  %v1090_v58 = vmul.f32 %v2653_v1, %v577_v42  ;;  %v1091_v59 = vmul.f32 %v2653_v1, %v578_v43  ;;  %v599_v42 = vld [vmem:[%s2646_s13 + $0xc30] sm:$0xff]  ;;  %v600_v47 = vld [vmem:[%s2646_s13 + $0xc38] sm:$0xff] }
 0x125   : > { %v1092_v60 = vmul.f32 %v2653_v1, %v579_v44  ;;  %2110 = vst [vmem:[%s2687_s24 + $0xb58] sm:$0xff] %v1598_v52  ;;  %2111 = vst [vmem:[%s2687_s24 + $0xb60] sm:$0xff] %v1599_v53  ;;  %v1602_v62 = vadd.f32 %v2658_v5, %v1089_v55  ;;  %v1093_v63 = vmul.f32 %v2653_v1, %v580_v49  ;;  %v601_v52 = vld [vmem:[%s2646_s13 + $0xc40] sm:$0xff]  ;;  %v602_v53 = vld [vmem:[%s2646_s13 + $0xc48] sm:$0xff] }
 0x126   : > { %2112 = vst [vmem:[%s2687_s24 + $0xb68] sm:$0xff] %v1600_v54  ;;  %v1094_v0 = vmul.f32 %v2653_v1, %v581_v50  ;;  %v1095_v2 = vmul.f32 %v2653_v1, %v582_v51  ;;  %2113 = vst [vmem:[%s2687_s24 + $0xb70] sm:$0xff] %v1601_v57  ;;  %v1603_v7 = vadd.f32 %v2658_v5, %v1090_v58  ;;  %v603_v54 = vld [vmem:[%s2646_s13 + $0xc50] sm:$0xff] }
 0x127   : > { %v1604_v8 = vadd.f32 %v2658_v5, %v1091_v59  ;;  %v1605_v9 = vadd.f32 %v2658_v5, %v1092_v60  ;;  %v1096_v10 = vmul.f32 %v2653_v1, %v583_v56  ;;  %2114 = vst [vmem:[%s2687_s24 + $0xb78] sm:$0xff] %v1602_v62  ;;  %v1606_v14 = vadd.f32 %v2658_v5, %v1093_v63  ;;  %v604_v59 = vld [vmem:[%s2646_s13 + $0xc58] sm:$0xff]  ;;  %v605_v60 = vld [vmem:[%s2646_s13 + $0xc60] sm:$0xff] }
 0x128   : > { %v1607_v15 = vadd.f32 %v2658_v5, %v1094_v0  ;;  %v1608_v16 = vadd.f32 %v2658_v5, %v1095_v2  ;;  %v1097_v17 = vmul.f32 %v2653_v1, %v584_v61  ;;  %2115 = vst [vmem:[%s2687_s24 + $0xb80] sm:$0xff] %v1603_v7  ;;  %v1098_v20 = vmul.f32 %v2653_v1, %v585_v3  ;;  %v606_v61 = vld [vmem:[%s2646_s13 + $0xc68] sm:$0xff]  ;;  %v607_v3 = vld [vmem:[%s2646_s13 + $0xc70] sm:$0xff] }
 0x129   : > { %2116 = vst [vmem:[%s2687_s24 + $0xb88] sm:$0xff] %v1604_v8  ;;  %2117 = vst [vmem:[%s2687_s24 + $0xb90] sm:$0xff] %v1605_v9  ;;  %v1609_v19 = vadd.f32 %v2658_v5, %v1096_v10  ;;  %v1099_v21 = vmul.f32 %v2653_v1, %v586_v4  ;;  %v1100_v22 = vmul.f32 %v2653_v1, %v587_v6  ;;  %v608_v9 = vld [vmem:[%s2646_s13 + $0xc78] sm:$0xff] }
 0x12a   : > { %2118 = vst [vmem:[%s2687_s24 + $0xb98] sm:$0xff] %v1606_v14  ;;  %2119 = vst [vmem:[%s2687_s24 + $0xba0] sm:$0xff] %v1607_v15  ;;  %v1610_v24 = vadd.f32 %v2658_v5, %v1097_v17  ;;  %v1101_v25 = vmul.f32 %v2653_v1, %v588_v11  ;;  %v1102_v26 = vmul.f32 %v2653_v1, %v589_v12  ;;  %v609_v14 = vld [vmem:[%s2646_s13 + $0xc80] sm:$0xff]  ;;  %v610_v15 = vld [vmem:[%s2646_s13 + $0xc88] sm:$0xff] }
 0x12b   : > { %2120 = vst [vmem:[%s2687_s24 + $0xba8] sm:$0xff] %v1608_v16  ;;  %v1103_v27 = vmul.f32 %v2653_v1, %v590_v13  ;;  %2121 = vst [vmem:[%s2687_s24 + $0xbb0] sm:$0xff] %v1609_v19  ;;  %v1611_v31 = vadd.f32 %v2658_v5, %v1098_v20  ;;  %v1612_v32 = vadd.f32 %v2658_v5, %v1099_v21  ;;  %v611_v16 = vld [vmem:[%s2646_s13 + $0xc90] sm:$0xff]  ;;  %v612_v21 = vld [vmem:[%s2646_s13 + $0xc98] sm:$0xff] }
 0x12c   : > { %v1613_v33 = vadd.f32 %v2658_v5, %v1100_v22  ;;  %v1104_v34 = vmul.f32 %v2653_v1, %v591_v18  ;;  %2122 = vst [vmem:[%s2687_s24 + $0xbb8] sm:$0xff] %v1610_v24  ;;  %v1614_v38 = vadd.f32 %v2658_v5, %v1101_v25  ;;  %v1615_v39 = vadd.f32 %v2658_v5, %v1102_v26  ;;  %v613_v22 = vld [vmem:[%s2646_s13 + $0xca0] sm:$0xff] }
 0x12d   : > { %v1616_v40 = vadd.f32 %v2658_v5, %v1103_v27  ;;  %v1105_v41 = vmul.f32 %v2653_v1, %v592_v23  ;;  %2123 = vst [vmem:[%s2687_s24 + $0xbc0] sm:$0xff] %v1611_v31  ;;  %2124 = vst [vmem:[%s2687_s24 + $0xbc8] sm:$0xff] %v1612_v32  ;;  %v1106_v44 = vmul.f32 %v2653_v1, %v593_v28  ;;  %v614_v23 = vld [vmem:[%s2646_s13 + $0xca8] sm:$0xff]  ;;  %v615_v28 = vld [vmem:[%s2646_s13 + $0xcb0] sm:$0xff] }
 0x12e   : > { %2125 = vst [vmem:[%s2687_s24 + $0xbd0] sm:$0xff] %v1613_v33  ;;  %v1617_v43 = vadd.f32 %v2658_v5, %v1104_v34  ;;  %v1107_v45 = vmul.f32 %v2653_v1, %v594_v29  ;;  %v1108_v46 = vmul.f32 %v2653_v1, %v595_v30  ;;  %2126 = vst [vmem:[%s2687_s24 + $0xbd8] sm:$0xff] %v1614_v38  ;;  %v616_v33 = vld [vmem:[%s2646_s13 + $0xcb8] sm:$0xff]  ;;  %v617_v38 = vld [vmem:[%s2646_s13 + $0xcc0] sm:$0xff] }
 0x12f   : > { %2127 = vst [vmem:[%s2687_s24 + $0xbe0] sm:$0xff] %v1615_v39  ;;  %2128 = vst [vmem:[%s2687_s24 + $0xbe8] sm:$0xff] %v1616_v40  ;;  %v1618_v48 = vadd.f32 %v2658_v5, %v1105_v41  ;;  %v1109_v49 = vmul.f32 %v2653_v1, %v596_v35  ;;  %v1110_v50 = vmul.f32 %v2653_v1, %v597_v36  ;;  %v618_v39 = vld [vmem:[%s2646_s13 + $0xcc8] sm:$0xff]  ;;  %v619_v40 = vld [vmem:[%s2646_s13 + $0xcd0] sm:$0xff] }
 0x130   : > { %v1111_v51 = vmul.f32 %v2653_v1, %v598_v37  ;;  %2129 = vst [vmem:[%s2687_s24 + $0xbf0] sm:$0xff] %v1617_v43  ;;  %v1619_v55 = vadd.f32 %v2658_v5, %v1106_v44  ;;  %v1620_v56 = vadd.f32 %v2658_v5, %v1107_v45  ;;  %v1621_v57 = vadd.f32 %v2658_v5, %v1108_v46  ;;  %v620_v45 = vld [vmem:[%s2646_s13 + $0xcd8] sm:$0xff]  ;;  %v621_v46 = vld [vmem:[%s2646_s13 + $0xce0] sm:$0xff] }
 0x131   : > { %v1112_v58 = vmul.f32 %v2653_v1, %v599_v42  ;;  %2130 = vst [vmem:[%s2687_s24 + $0xbf8] sm:$0xff] %v1618_v48  ;;  %v1622_v62 = vadd.f32 %v2658_v5, %v1109_v49  ;;  %v1623_v63 = vadd.f32 %v2658_v5, %v1110_v50  ;;  %v1113_v2 = vmul.f32 %v2653_v1, %v600_v47  ;;  %v622_v47 = vld [vmem:[%s2646_s13 + $0xce8] sm:$0xff] }
 0x132   : > { %v1624_v0 = vadd.f32 %v2658_v5, %v1111_v51  ;;  %2131 = vst [vmem:[%s2687_s24 + $0xc00] sm:$0xff] %v1619_v55  ;;  %2132 = vst [vmem:[%s2687_s24 + $0xc08] sm:$0xff] %v1620_v56  ;;  %v1114_v6 = vmul.f32 %v2653_v1, %v601_v52  ;;  %v1115_v7 = vmul.f32 %v2653_v1, %v602_v53  ;;  %v623_v52 = vld [vmem:[%s2646_s13 + $0xcf0] sm:$0xff] }
 0x133   : > { %2133 = vst [vmem:[%s2687_s24 + $0xc10] sm:$0xff] %v1621_v57  ;;  %v1625_v4 = vadd.f32 %v2658_v5, %v1112_v58  ;;  %v1116_v8 = vmul.f32 %v2653_v1, %v603_v54  ;;  %2134 = vst [vmem:[%s2687_s24 + $0xc18] sm:$0xff] %v1622_v62  ;;  %v1626_v10 = vadd.f32 %v2658_v5, %v1113_v2  ;;  %v624_v57 = vld [vmem:[%s2646_s13 + $0xcf8] sm:$0xff]  ;;  %v625_v62 = vld [vmem:[%s2646_s13 + $0xd00] sm:$0xff] }
 0x134   : > { %2135 = vst [vmem:[%s2687_s24 + $0xc20] sm:$0xff] %v1623_v63  ;;  %2136 = vst [vmem:[%s2687_s24 + $0xc28] sm:$0xff] %v1624_v0  ;;  %v1117_v11 = vmul.f32 %v2653_v1, %v604_v59  ;;  %v1118_v12 = vmul.f32 %v2653_v1, %v605_v60  ;;  %v1119_v13 = vmul.f32 %v2653_v1, %v606_v61  ;;  %v626_v63 = vld [vmem:[%s2646_s13 + $0xd08] sm:$0xff]  ;;  %v627_v0 = vld [vmem:[%s2646_s13 + $0xd10] sm:$0xff] }
 0x135   : > { %2137 = vst [vmem:[%s2687_s24 + $0xc30] sm:$0xff] %v1625_v4  ;;  %v1627_v17 = vadd.f32 %v2658_v5, %v1114_v6  ;;  %v1628_v18 = vadd.f32 %v2658_v5, %v1115_v7  ;;  %v1629_v19 = vadd.f32 %v2658_v5, %v1116_v8  ;;  %v1120_v20 = vmul.f32 %v2653_v1, %v607_v3  ;;  %v628_v7 = vld [vmem:[%s2646_s13 + $0xd18] sm:$0xff]  ;;  %v629_v8 = vld [vmem:[%s2646_s13 + $0xd20] sm:$0xff] }
 0x136   : > { %2138 = vst [vmem:[%s2687_s24 + $0xc38] sm:$0xff] %v1626_v10  ;;  %v1630_v24 = vadd.f32 %v2658_v5, %v1117_v11  ;;  %v1631_v25 = vadd.f32 %v2658_v5, %v1118_v12  ;;  %v1632_v26 = vadd.f32 %v2658_v5, %v1119_v13  ;;  %v1121_v27 = vmul.f32 %v2653_v1, %v608_v9  ;;  %v630_v9 = vld [vmem:[%s2646_s13 + $0xd28] sm:$0xff] }
 0x137   : > { %2139 = vst [vmem:[%s2687_s24 + $0xc40] sm:$0xff] %v1627_v17  ;;  %2140 = vst [vmem:[%s2687_s24 + $0xc48] sm:$0xff] %v1628_v18  ;;  %v1633_v29 = vadd.f32 %v2658_v5, %v1120_v20  ;;  %v1122_v30 = vmul.f32 %v2653_v1, %v609_v14  ;;  %v1123_v31 = vmul.f32 %v2653_v1, %v610_v15  ;;  %v631_v14 = vld [vmem:[%s2646_s13 + $0xd30] sm:$0xff] }
 0x138   : > { %2141 = vst [vmem:[%s2687_s24 + $0xc50] sm:$0xff] %v1629_v19  ;;  %v1124_v32 = vmul.f32 %v2653_v1, %v611_v16  ;;  %2142 = vst [vmem:[%s2687_s24 + $0xc58] sm:$0xff] %v1630_v24  ;;  %v1634_v34 = vadd.f32 %v2658_v5, %v1121_v27  ;;  %v1125_v35 = vmul.f32 %v2653_v1, %v612_v21  ;;  %v632_v19 = vld [vmem:[%s2646_s13 + $0xd38] sm:$0xff]  ;;  %v633_v24 = vld [vmem:[%s2646_s13 + $0xd40] sm:$0xff] }
 0x139   : > { %2143 = vst [vmem:[%s2687_s24 + $0xc60] sm:$0xff] %v1631_v25  ;;  %2144 = vst [vmem:[%s2687_s24 + $0xc68] sm:$0xff] %v1632_v26  ;;  %v1126_v36 = vmul.f32 %v2653_v1, %v613_v22  ;;  %v1127_v37 = vmul.f32 %v2653_v1, %v614_v23  ;;  %v1635_v41 = vadd.f32 %v2658_v5, %v1122_v30  ;;  %v634_v25 = vld [vmem:[%s2646_s13 + $0xd48] sm:$0xff]  ;;  %v635_v26 = vld [vmem:[%s2646_s13 + $0xd50] sm:$0xff] }
 0x13a   : > { %2145 = vst [vmem:[%s2687_s24 + $0xc70] sm:$0xff] %v1633_v29  ;;  %v1636_v42 = vadd.f32 %v2658_v5, %v1123_v31  ;;  %v1637_v43 = vadd.f32 %v2658_v5, %v1124_v32  ;;  %v1128_v44 = vmul.f32 %v2653_v1, %v615_v28  ;;  %2146 = vst [vmem:[%s2687_s24 + $0xc78] sm:$0xff] %v1634_v34  ;;  %v636_v31 = vld [vmem:[%s2646_s13 + $0xd58] sm:$0xff]  ;;  %v637_v32 = vld [vmem:[%s2646_s13 + $0xd60] sm:$0xff] }
 0x13b   : > { %v1638_v48 = vadd.f32 %v2658_v5, %v1125_v35  ;;  %v1639_v49 = vadd.f32 %v2658_v5, %v1126_v36  ;;  %v1640_v50 = vadd.f32 %v2658_v5, %v1127_v37  ;;  %v1129_v51 = vmul.f32 %v2653_v1, %v616_v33  ;;  %2147 = vst [vmem:[%s2687_s24 + $0xc80] sm:$0xff] %v1635_v41  ;;  %v638_v33 = vld [vmem:[%s2646_s13 + $0xd68] sm:$0xff] }
 0x13c   : > { %2148 = vst [vmem:[%s2687_s24 + $0xc88] sm:$0xff] %v1636_v42  ;;  %2149 = vst [vmem:[%s2687_s24 + $0xc90] sm:$0xff] %v1637_v43  ;;  %v1641_v53 = vadd.f32 %v2658_v5, %v1128_v44  ;;  %v1130_v54 = vmul.f32 %v2653_v1, %v617_v38  ;;  %v1131_v55 = vmul.f32 %v2653_v1, %v618_v39  ;;  %v639_v38 = vld [vmem:[%s2646_s13 + $0xd70] sm:$0xff]  ;;  %v640_v43 = vld [vmem:[%s2646_s13 + $0xd78] sm:$0xff] }
 0x13d   : > { %v1132_v56 = vmul.f32 %v2653_v1, %v619_v40  ;;  %2150 = vst [vmem:[%s2687_s24 + $0xc98] sm:$0xff] %v1638_v48  ;;  %2151 = vst [vmem:[%s2687_s24 + $0xca0] sm:$0xff] %v1639_v49  ;;  %v1642_v58 = vadd.f32 %v2658_v5, %v1129_v51  ;;  %v1133_v59 = vmul.f32 %v2653_v1, %v620_v45  ;;  %v641_v48 = vld [vmem:[%s2646_s13 + $0xd80] sm:$0xff]  ;;  %v642_v49 = vld [vmem:[%s2646_s13 + $0xd88] sm:$0xff] }
 0x13e   : > { %2152 = vst [vmem:[%s2687_s24 + $0xca8] sm:$0xff] %v1640_v50  ;;  %v1134_v60 = vmul.f32 %v2653_v1, %v621_v46  ;;  %v1135_v61 = vmul.f32 %v2653_v1, %v622_v47  ;;  %2153 = vst [vmem:[%s2687_s24 + $0xcb0] sm:$0xff] %v1641_v53  ;;  %v1643_v2 = vadd.f32 %v2658_v5, %v1130_v54  ;;  %v643_v50 = vld [vmem:[%s2646_s13 + $0xd90] sm:$0xff] }
 0x13f   : > { %v1644_v3 = vadd.f32 %v2658_v5, %v1131_v55  ;;  %v1645_v4 = vadd.f32 %v2658_v5, %v1132_v56  ;;  %v1136_v6 = vmul.f32 %v2653_v1, %v623_v52  ;;  %2154 = vst [vmem:[%s2687_s24 + $0xcb8] sm:$0xff] %v1642_v58  ;;  %v1646_v10 = vadd.f32 %v2658_v5, %v1133_v59  ;;  %v644_v55 = vld [vmem:[%s2646_s13 + $0xd98] sm:$0xff]  ;;  %v645_v56 = vld [vmem:[%s2646_s13 + $0xda0] sm:$0xff] }
 0x140   : > { %v1647_v11 = vadd.f32 %v2658_v5, %v1134_v60  ;;  %v1648_v12 = vadd.f32 %v2658_v5, %v1135_v61  ;;  %v1137_v13 = vmul.f32 %v2653_v1, %v624_v57  ;;  %2155 = vst [vmem:[%s2687_s24 + $0xcc0] sm:$0xff] %v1643_v2  ;;  %v1138_v16 = vmul.f32 %v2653_v1, %v625_v62  ;;  %v646_v57 = vld [vmem:[%s2646_s13 + $0xda8] sm:$0xff]  ;;  %v647_v62 = vld [vmem:[%s2646_s13 + $0xdb0] sm:$0xff] }
 0x141   : > { %2156 = vst [vmem:[%s2687_s24 + $0xcc8] sm:$0xff] %v1644_v3  ;;  %2157 = vst [vmem:[%s2687_s24 + $0xcd0] sm:$0xff] %v1645_v4  ;;  %v1649_v15 = vadd.f32 %v2658_v5, %v1136_v6  ;;  %v1139_v17 = vmul.f32 %v2653_v1, %v626_v63  ;;  %v1140_v18 = vmul.f32 %v2653_v1, %v627_v0  ;;  %v648_v4 = vld [vmem:[%s2646_s13 + $0xdb8] sm:$0xff] }
 0x142   : > { %2158 = vst [vmem:[%s2687_s24 + $0xcd8] sm:$0xff] %v1646_v10  ;;  %2159 = vst [vmem:[%s2687_s24 + $0xce0] sm:$0xff] %v1647_v11  ;;  %v1650_v20 = vadd.f32 %v2658_v5, %v1137_v13  ;;  %v1141_v21 = vmul.f32 %v2653_v1, %v628_v7  ;;  %v1142_v22 = vmul.f32 %v2653_v1, %v629_v8  ;;  %v649_v10 = vld [vmem:[%s2646_s13 + $0xdc0] sm:$0xff]  ;;  %v650_v11 = vld [vmem:[%s2646_s13 + $0xdc8] sm:$0xff] }
 0x143   : > { %2160 = vst [vmem:[%s2687_s24 + $0xce8] sm:$0xff] %v1648_v12  ;;  %v1143_v23 = vmul.f32 %v2653_v1, %v630_v9  ;;  %2161 = vst [vmem:[%s2687_s24 + $0xcf0] sm:$0xff] %v1649_v15  ;;  %v1651_v27 = vadd.f32 %v2658_v5, %v1138_v16  ;;  %v1652_v28 = vadd.f32 %v2658_v5, %v1139_v17  ;;  %v651_v12 = vld [vmem:[%s2646_s13 + $0xdd0] sm:$0xff]  ;;  %v652_v17 = vld [vmem:[%s2646_s13 + $0xdd8] sm:$0xff] }
 0x144   : > { %v1653_v29 = vadd.f32 %v2658_v5, %v1140_v18  ;;  %v1144_v30 = vmul.f32 %v2653_v1, %v631_v14  ;;  %2162 = vst [vmem:[%s2687_s24 + $0xcf8] sm:$0xff] %v1650_v20  ;;  %v1654_v34 = vadd.f32 %v2658_v5, %v1141_v21  ;;  %v1655_v35 = vadd.f32 %v2658_v5, %v1142_v22  ;;  %v653_v18 = vld [vmem:[%s2646_s13 + $0xde0] sm:$0xff] }
 0x145   : > { %v1656_v36 = vadd.f32 %v2658_v5, %v1143_v23  ;;  %v1145_v37 = vmul.f32 %v2653_v1, %v632_v19  ;;  %2163 = vst [vmem:[%s2687_s24 + $0xd00] sm:$0xff] %v1651_v27  ;;  %2164 = vst [vmem:[%s2687_s24 + $0xd08] sm:$0xff] %v1652_v28  ;;  %v1146_v40 = vmul.f32 %v2653_v1, %v633_v24  ;;  %v654_v19 = vld [vmem:[%s2646_s13 + $0xde8] sm:$0xff]  ;;  %v655_v24 = vld [vmem:[%s2646_s13 + $0xdf0] sm:$0xff] }
 0x146   : > { %2165 = vst [vmem:[%s2687_s24 + $0xd10] sm:$0xff] %v1653_v29  ;;  %v1657_v39 = vadd.f32 %v2658_v5, %v1144_v30  ;;  %v1147_v41 = vmul.f32 %v2653_v1, %v634_v25  ;;  %v1148_v42 = vmul.f32 %v2653_v1, %v635_v26  ;;  %2166 = vst [vmem:[%s2687_s24 + $0xd18] sm:$0xff] %v1654_v34  ;;  %v656_v29 = vld [vmem:[%s2646_s13 + $0xdf8] sm:$0xff]  ;;  %v657_v34 = vld [vmem:[%s2646_s13 + $0xe00] sm:$0xff] }
 0x147   : > { %2167 = vst [vmem:[%s2687_s24 + $0xd20] sm:$0xff] %v1655_v35  ;;  %2168 = vst [vmem:[%s2687_s24 + $0xd28] sm:$0xff] %v1656_v36  ;;  %v1658_v44 = vadd.f32 %v2658_v5, %v1145_v37  ;;  %v1149_v45 = vmul.f32 %v2653_v1, %v636_v31  ;;  %v1150_v46 = vmul.f32 %v2653_v1, %v637_v32  ;;  %v658_v35 = vld [vmem:[%s2646_s13 + $0xe08] sm:$0xff]  ;;  %v659_v36 = vld [vmem:[%s2646_s13 + $0xe10] sm:$0xff] }
 0x148   : > { %v1151_v47 = vmul.f32 %v2653_v1, %v638_v33  ;;  %2169 = vst [vmem:[%s2687_s24 + $0xd30] sm:$0xff] %v1657_v39  ;;  %v1659_v51 = vadd.f32 %v2658_v5, %v1146_v40  ;;  %v1660_v52 = vadd.f32 %v2658_v5, %v1147_v41  ;;  %v1661_v53 = vadd.f32 %v2658_v5, %v1148_v42  ;;  %v660_v41 = vld [vmem:[%s2646_s13 + $0xe18] sm:$0xff]  ;;  %v661_v42 = vld [vmem:[%s2646_s13 + $0xe20] sm:$0xff] }
 0x149   : > { %v1152_v54 = vmul.f32 %v2653_v1, %v639_v38  ;;  %2170 = vst [vmem:[%s2687_s24 + $0xd38] sm:$0xff] %v1658_v44  ;;  %v1662_v58 = vadd.f32 %v2658_v5, %v1149_v45  ;;  %v1663_v59 = vadd.f32 %v2658_v5, %v1150_v46  ;;  %v1153_v61 = vmul.f32 %v2653_v1, %v640_v43  ;;  %v662_v43 = vld [vmem:[%s2646_s13 + $0xe28] sm:$0xff] }
 0x14a   : > { %v1664_v60 = vadd.f32 %v2658_v5, %v1151_v47  ;;  %2171 = vst [vmem:[%s2687_s24 + $0xd40] sm:$0xff] %v1659_v51  ;;  %2172 = vst [vmem:[%s2687_s24 + $0xd48] sm:$0xff] %v1660_v52  ;;  %v1154_v0 = vmul.f32 %v2653_v1, %v641_v48  ;;  %v1155_v2 = vmul.f32 %v2653_v1, %v642_v49  ;;  %v663_v48 = vld [vmem:[%s2646_s13 + $0xe30] sm:$0xff] }
 0x14b   : > { %2173 = vst [vmem:[%s2687_s24 + $0xd50] sm:$0xff] %v1661_v53  ;;  %v1665_v63 = vadd.f32 %v2658_v5, %v1152_v54  ;;  %v1156_v3 = vmul.f32 %v2653_v1, %v643_v50  ;;  %2174 = vst [vmem:[%s2687_s24 + $0xd58] sm:$0xff] %v1662_v58  ;;  %v1666_v6 = vadd.f32 %v2658_v5, %v1153_v61  ;;  %v664_v53 = vld [vmem:[%s2646_s13 + $0xe38] sm:$0xff]  ;;  %v665_v58 = vld [vmem:[%s2646_s13 + $0xe40] sm:$0xff] }
 0x14c   : > { %2175 = vst [vmem:[%s2687_s24 + $0xd60] sm:$0xff] %v1663_v59  ;;  %2176 = vst [vmem:[%s2687_s24 + $0xd68] sm:$0xff] %v1664_v60  ;;  %v1157_v7 = vmul.f32 %v2653_v1, %v644_v55  ;;  %v1158_v8 = vmul.f32 %v2653_v1, %v645_v56  ;;  %v1159_v9 = vmul.f32 %v2653_v1, %v646_v57  ;;  %v666_v59 = vld [vmem:[%s2646_s13 + $0xe48] sm:$0xff]  ;;  %v667_v60 = vld [vmem:[%s2646_s13 + $0xe50] sm:$0xff] }
 0x14d   : > { %2177 = vst [vmem:[%s2687_s24 + $0xd70] sm:$0xff] %v1665_v63  ;;  %v1667_v13 = vadd.f32 %v2658_v5, %v1154_v0  ;;  %v1668_v14 = vadd.f32 %v2658_v5, %v1155_v2  ;;  %v1669_v15 = vadd.f32 %v2658_v5, %v1156_v3  ;;  %v1160_v16 = vmul.f32 %v2653_v1, %v647_v62  ;;  %v668_v2 = vld [vmem:[%s2646_s13 + $0xe58] sm:$0xff]  ;;  %v669_v3 = vld [vmem:[%s2646_s13 + $0xe60] sm:$0xff] }
 0x14e   : > { %2178 = vst [vmem:[%s2687_s24 + $0xd78] sm:$0xff] %v1666_v6  ;;  %v1670_v20 = vadd.f32 %v2658_v5, %v1157_v7  ;;  %v1671_v21 = vadd.f32 %v2658_v5, %v1158_v8  ;;  %v1672_v22 = vadd.f32 %v2658_v5, %v1159_v9  ;;  %v1161_v23 = vmul.f32 %v2653_v1, %v648_v4  ;;  %v670_v4 = vld [vmem:[%s2646_s13 + $0xe68] sm:$0xff] }
 0x14f   : > { %2179 = vst [vmem:[%s2687_s24 + $0xd80] sm:$0xff] %v1667_v13  ;;  %2180 = vst [vmem:[%s2687_s24 + $0xd88] sm:$0xff] %v1668_v14  ;;  %v1673_v25 = vadd.f32 %v2658_v5, %v1160_v16  ;;  %v1162_v26 = vmul.f32 %v2653_v1, %v649_v10  ;;  %v1163_v27 = vmul.f32 %v2653_v1, %v650_v11  ;;  %v671_v10 = vld [vmem:[%s2646_s13 + $0xe70] sm:$0xff] }
 0x150   : > { %2181 = vst [vmem:[%s2687_s24 + $0xd90] sm:$0xff] %v1669_v15  ;;  %v1164_v28 = vmul.f32 %v2653_v1, %v651_v12  ;;  %2182 = vst [vmem:[%s2687_s24 + $0xd98] sm:$0xff] %v1670_v20  ;;  %v1674_v30 = vadd.f32 %v2658_v5, %v1161_v23  ;;  %v1165_v31 = vmul.f32 %v2653_v1, %v652_v17  ;;  %v672_v15 = vld [vmem:[%s2646_s13 + $0xe78] sm:$0xff]  ;;  %v673_v20 = vld [vmem:[%s2646_s13 + $0xe80] sm:$0xff] }
 0x151   : > { %2183 = vst [vmem:[%s2687_s24 + $0xda0] sm:$0xff] %v1671_v21  ;;  %2184 = vst [vmem:[%s2687_s24 + $0xda8] sm:$0xff] %v1672_v22  ;;  %v1166_v32 = vmul.f32 %v2653_v1, %v653_v18  ;;  %v1167_v33 = vmul.f32 %v2653_v1, %v654_v19  ;;  %v1675_v37 = vadd.f32 %v2658_v5, %v1162_v26  ;;  %v674_v21 = vld [vmem:[%s2646_s13 + $0xe88] sm:$0xff]  ;;  %v675_v22 = vld [vmem:[%s2646_s13 + $0xe90] sm:$0xff] }
 0x152   : > { %2185 = vst [vmem:[%s2687_s24 + $0xdb0] sm:$0xff] %v1673_v25  ;;  %v1676_v38 = vadd.f32 %v2658_v5, %v1163_v27  ;;  %v1677_v39 = vadd.f32 %v2658_v5, %v1164_v28  ;;  %v1168_v40 = vmul.f32 %v2653_v1, %v655_v24  ;;  %2186 = vst [vmem:[%s2687_s24 + $0xdb8] sm:$0xff] %v1674_v30  ;;  %v676_v27 = vld [vmem:[%s2646_s13 + $0xe98] sm:$0xff]  ;;  %v677_v28 = vld [vmem:[%s2646_s13 + $0xea0] sm:$0xff] }
 0x153   : > { %v1678_v44 = vadd.f32 %v2658_v5, %v1165_v31  ;;  %v1679_v45 = vadd.f32 %v2658_v5, %v1166_v32  ;;  %v1680_v46 = vadd.f32 %v2658_v5, %v1167_v33  ;;  %v1169_v47 = vmul.f32 %v2653_v1, %v656_v29  ;;  %2187 = vst [vmem:[%s2687_s24 + $0xdc0] sm:$0xff] %v1675_v37  ;;  %v678_v29 = vld [vmem:[%s2646_s13 + $0xea8] sm:$0xff] }
 0x154   : > { %2188 = vst [vmem:[%s2687_s24 + $0xdc8] sm:$0xff] %v1676_v38  ;;  %2189 = vst [vmem:[%s2687_s24 + $0xdd0] sm:$0xff] %v1677_v39  ;;  %v1681_v49 = vadd.f32 %v2658_v5, %v1168_v40  ;;  %v1170_v50 = vmul.f32 %v2653_v1, %v657_v34  ;;  %v1171_v51 = vmul.f32 %v2653_v1, %v658_v35  ;;  %v679_v34 = vld [vmem:[%s2646_s13 + $0xeb0] sm:$0xff]  ;;  %v680_v39 = vld [vmem:[%s2646_s13 + $0xeb8] sm:$0xff] }
 0x155   : > { %v1172_v52 = vmul.f32 %v2653_v1, %v659_v36  ;;  %2190 = vst [vmem:[%s2687_s24 + $0xdd8] sm:$0xff] %v1678_v44  ;;  %2191 = vst [vmem:[%s2687_s24 + $0xde0] sm:$0xff] %v1679_v45  ;;  %v1682_v54 = vadd.f32 %v2658_v5, %v1169_v47  ;;  %v1173_v55 = vmul.f32 %v2653_v1, %v660_v41  ;;  %v681_v44 = vld [vmem:[%s2646_s13 + $0xec0] sm:$0xff]  ;;  %v682_v45 = vld [vmem:[%s2646_s13 + $0xec8] sm:$0xff] }
 0x156   : > { %2192 = vst [vmem:[%s2687_s24 + $0xde8] sm:$0xff] %v1680_v46  ;;  %v1174_v56 = vmul.f32 %v2653_v1, %v661_v42  ;;  %v1175_v57 = vmul.f32 %v2653_v1, %v662_v43  ;;  %2193 = vst [vmem:[%s2687_s24 + $0xdf0] sm:$0xff] %v1681_v49  ;;  %v1683_v61 = vadd.f32 %v2658_v5, %v1170_v50  ;;  %v683_v46 = vld [vmem:[%s2646_s13 + $0xed0] sm:$0xff] }
 0x157   : > { %v1684_v62 = vadd.f32 %v2658_v5, %v1171_v51  ;;  %v1685_v63 = vadd.f32 %v2658_v5, %v1172_v52  ;;  %v1176_v0 = vmul.f32 %v2653_v1, %v663_v48  ;;  %2194 = vst [vmem:[%s2687_s24 + $0xdf8] sm:$0xff] %v1682_v54  ;;  %v1686_v6 = vadd.f32 %v2658_v5, %v1173_v55  ;;  %v684_v51 = vld [vmem:[%s2646_s13 + $0xed8] sm:$0xff]  ;;  %v685_v52 = vld [vmem:[%s2646_s13 + $0xee0] sm:$0xff] }
 0x158   : > { %v1687_v7 = vadd.f32 %v2658_v5, %v1174_v56  ;;  %v1688_v8 = vadd.f32 %v2658_v5, %v1175_v57  ;;  %v1177_v9 = vmul.f32 %v2653_v1, %v664_v53  ;;  %2195 = vst [vmem:[%s2687_s24 + $0xe00] sm:$0xff] %v1683_v61  ;;  %v1178_v12 = vmul.f32 %v2653_v1, %v665_v58  ;;  %v686_v53 = vld [vmem:[%s2646_s13 + $0xee8] sm:$0xff]  ;;  %v687_v58 = vld [vmem:[%s2646_s13 + $0xef0] sm:$0xff] }
 0x159   : > { %2196 = vst [vmem:[%s2687_s24 + $0xe08] sm:$0xff] %v1684_v62  ;;  %2197 = vst [vmem:[%s2687_s24 + $0xe10] sm:$0xff] %v1685_v63  ;;  %v1689_v11 = vadd.f32 %v2658_v5, %v1176_v0  ;;  %v1179_v13 = vmul.f32 %v2653_v1, %v666_v59  ;;  %v1180_v14 = vmul.f32 %v2653_v1, %v667_v60  ;;  %v688_v63 = vld [vmem:[%s2646_s13 + $0xef8] sm:$0xff] }
 0x15a   : > { %2198 = vst [vmem:[%s2687_s24 + $0xe18] sm:$0xff] %v1686_v6  ;;  %2199 = vst [vmem:[%s2687_s24 + $0xe20] sm:$0xff] %v1687_v7  ;;  %v1690_v16 = vadd.f32 %v2658_v5, %v1177_v9  ;;  %v1181_v17 = vmul.f32 %v2653_v1, %v668_v2  ;;  %v1182_v18 = vmul.f32 %v2653_v1, %v669_v3  ;;  %v689_v6 = vld [vmem:[%s2646_s13 + $0xf00] sm:$0xff]  ;;  %v690_v7 = vld [vmem:[%s2646_s13 + $0xf08] sm:$0xff] }
 0x15b   : > { %2200 = vst [vmem:[%s2687_s24 + $0xe28] sm:$0xff] %v1688_v8  ;;  %v1183_v19 = vmul.f32 %v2653_v1, %v670_v4  ;;  %2201 = vst [vmem:[%s2687_s24 + $0xe30] sm:$0xff] %v1689_v11  ;;  %v1691_v23 = vadd.f32 %v2658_v5, %v1178_v12  ;;  %v1692_v24 = vadd.f32 %v2658_v5, %v1179_v13  ;;  %v691_v8 = vld [vmem:[%s2646_s13 + $0xf10] sm:$0xff]  ;;  %v692_v13 = vld [vmem:[%s2646_s13 + $0xf18] sm:$0xff] }
 0x15c   : > { %v1693_v25 = vadd.f32 %v2658_v5, %v1180_v14  ;;  %v1184_v26 = vmul.f32 %v2653_v1, %v671_v10  ;;  %2202 = vst [vmem:[%s2687_s24 + $0xe38] sm:$0xff] %v1690_v16  ;;  %v1694_v30 = vadd.f32 %v2658_v5, %v1181_v17  ;;  %v1695_v31 = vadd.f32 %v2658_v5, %v1182_v18  ;;  %v693_v14 = vld [vmem:[%s2646_s13 + $0xf20] sm:$0xff] }
 0x15d   : > { %v1696_v32 = vadd.f32 %v2658_v5, %v1183_v19  ;;  %v1185_v33 = vmul.f32 %v2653_v1, %v672_v15  ;;  %2203 = vst [vmem:[%s2687_s24 + $0xe40] sm:$0xff] %v1691_v23  ;;  %2204 = vst [vmem:[%s2687_s24 + $0xe48] sm:$0xff] %v1692_v24  ;;  %v1186_v36 = vmul.f32 %v2653_v1, %v673_v20  ;;  %v694_v15 = vld [vmem:[%s2646_s13 + $0xf28] sm:$0xff]  ;;  %v695_v20 = vld [vmem:[%s2646_s13 + $0xf30] sm:$0xff] }
 0x15e   : > { %2205 = vst [vmem:[%s2687_s24 + $0xe50] sm:$0xff] %v1693_v25  ;;  %v1697_v35 = vadd.f32 %v2658_v5, %v1184_v26  ;;  %v1187_v37 = vmul.f32 %v2653_v1, %v674_v21  ;;  %v1188_v38 = vmul.f32 %v2653_v1, %v675_v22  ;;  %2206 = vst [vmem:[%s2687_s24 + $0xe58] sm:$0xff] %v1694_v30  ;;  %v696_v25 = vld [vmem:[%s2646_s13 + $0xf38] sm:$0xff]  ;;  %v697_v30 = vld [vmem:[%s2646_s13 + $0xf40] sm:$0xff] }
 0x15f   : > { %2207 = vst [vmem:[%s2687_s24 + $0xe60] sm:$0xff] %v1695_v31  ;;  %2208 = vst [vmem:[%s2687_s24 + $0xe68] sm:$0xff] %v1696_v32  ;;  %v1698_v40 = vadd.f32 %v2658_v5, %v1185_v33  ;;  %v1189_v41 = vmul.f32 %v2653_v1, %v676_v27  ;;  %v1190_v42 = vmul.f32 %v2653_v1, %v677_v28  ;;  %v698_v31 = vld [vmem:[%s2646_s13 + $0xf48] sm:$0xff]  ;;  %v699_v32 = vld [vmem:[%s2646_s13 + $0xf50] sm:$0xff] }
 0x160   : > { %v1191_v43 = vmul.f32 %v2653_v1, %v678_v29  ;;  %2209 = vst [vmem:[%s2687_s24 + $0xe70] sm:$0xff] %v1697_v35  ;;  %v1699_v47 = vadd.f32 %v2658_v5, %v1186_v36  ;;  %v1700_v48 = vadd.f32 %v2658_v5, %v1187_v37  ;;  %v1701_v49 = vadd.f32 %v2658_v5, %v1188_v38  ;;  %v700_v37 = vld [vmem:[%s2646_s13 + $0xf58] sm:$0xff]  ;;  %v701_v38 = vld [vmem:[%s2646_s13 + $0xf60] sm:$0xff] }
 0x161   : > { %v1192_v50 = vmul.f32 %v2653_v1, %v679_v34  ;;  %2210 = vst [vmem:[%s2687_s24 + $0xe78] sm:$0xff] %v1698_v40  ;;  %v1702_v54 = vadd.f32 %v2658_v5, %v1189_v41  ;;  %v1703_v55 = vadd.f32 %v2658_v5, %v1190_v42  ;;  %v1193_v57 = vmul.f32 %v2653_v1, %v680_v39  ;;  %v702_v39 = vld [vmem:[%s2646_s13 + $0xf68] sm:$0xff] }
 0x162   : > { %v1704_v56 = vadd.f32 %v2658_v5, %v1191_v43  ;;  %2211 = vst [vmem:[%s2687_s24 + $0xe80] sm:$0xff] %v1699_v47  ;;  %2212 = vst [vmem:[%s2687_s24 + $0xe88] sm:$0xff] %v1700_v48  ;;  %v1194_v60 = vmul.f32 %v2653_v1, %v681_v44  ;;  %v1195_v61 = vmul.f32 %v2653_v1, %v682_v45  ;;  %v703_v44 = vld [vmem:[%s2646_s13 + $0xf70] sm:$0xff] }
 0x163   : > { %2213 = vst [vmem:[%s2687_s24 + $0xe90] sm:$0xff] %v1701_v49  ;;  %v1705_v59 = vadd.f32 %v2658_v5, %v1192_v50  ;;  %v1196_v62 = vmul.f32 %v2653_v1, %v683_v46  ;;  %2214 = vst [vmem:[%s2687_s24 + $0xe98] sm:$0xff] %v1702_v54  ;;  %v1706_v0 = vadd.f32 %v2658_v5, %v1193_v57  ;;  %v704_v49 = vld [vmem:[%s2646_s13 + $0xf78] sm:$0xff]  ;;  %v705_v54 = vld [vmem:[%s2646_s13 + $0xf80] sm:$0xff] }
 0x164   : > { %2215 = vst [vmem:[%s2687_s24 + $0xea0] sm:$0xff] %v1703_v55  ;;  %2216 = vst [vmem:[%s2687_s24 + $0xea8] sm:$0xff] %v1704_v56  ;;  %v1197_v2 = vmul.f32 %v2653_v1, %v684_v51  ;;  %v1198_v3 = vmul.f32 %v2653_v1, %v685_v52  ;;  %v1199_v4 = vmul.f32 %v2653_v1, %v686_v53  ;;  %v706_v55 = vld [vmem:[%s2646_s13 + $0xf88] sm:$0xff]  ;;  %v707_v56 = vld [vmem:[%s2646_s13 + $0xf90] sm:$0xff] }
 0x165   : > { %2217 = vst [vmem:[%s2687_s24 + $0xeb0] sm:$0xff] %v1705_v59  ;;  %v1707_v9 = vadd.f32 %v2658_v5, %v1194_v60  ;;  %v1708_v10 = vadd.f32 %v2658_v5, %v1195_v61  ;;  %v1709_v11 = vadd.f32 %v2658_v5, %v1196_v62  ;;  %v1200_v12 = vmul.f32 %v2653_v1, %v687_v58  ;;  %v708_v61 = vld [vmem:[%s2646_s13 + $0xf98] sm:$0xff]  ;;  %v709_v62 = vld [vmem:[%s2646_s13 + $0xfa0] sm:$0xff] }
 0x166   : > { %2218 = vst [vmem:[%s2687_s24 + $0xeb8] sm:$0xff] %v1706_v0  ;;  %v1710_v16 = vadd.f32 %v2658_v5, %v1197_v2  ;;  %v1711_v17 = vadd.f32 %v2658_v5, %v1198_v3  ;;  %v1712_v18 = vadd.f32 %v2658_v5, %v1199_v4  ;;  %v1201_v19 = vmul.f32 %v2653_v1, %v688_v63  ;;  %v710_v63 = vld [vmem:[%s2646_s13 + $0xfa8] sm:$0xff] }
 0x167   : > { %2219 = vst [vmem:[%s2687_s24 + $0xec0] sm:$0xff] %v1707_v9  ;;  %2220 = vst [vmem:[%s2687_s24 + $0xec8] sm:$0xff] %v1708_v10  ;;  %v1713_v21 = vadd.f32 %v2658_v5, %v1200_v12  ;;  %v1202_v22 = vmul.f32 %v2653_v1, %v689_v6  ;;  %v1203_v23 = vmul.f32 %v2653_v1, %v690_v7  ;;  %v711_v6 = vld [vmem:[%s2646_s13 + $0xfb0] sm:$0xff] }
 0x168   : > { %2221 = vst [vmem:[%s2687_s24 + $0xed0] sm:$0xff] %v1709_v11  ;;  %v1204_v24 = vmul.f32 %v2653_v1, %v691_v8  ;;  %2222 = vst [vmem:[%s2687_s24 + $0xed8] sm:$0xff] %v1710_v16  ;;  %v1714_v26 = vadd.f32 %v2658_v5, %v1201_v19  ;;  %v1205_v27 = vmul.f32 %v2653_v1, %v692_v13  ;;  %v712_v11 = vld [vmem:[%s2646_s13 + $0xfb8] sm:$0xff]  ;;  %v713_v16 = vld [vmem:[%s2646_s13 + $0xfc0] sm:$0xff] }
 0x169   : > { %2223 = vst [vmem:[%s2687_s24 + $0xee0] sm:$0xff] %v1711_v17  ;;  %2224 = vst [vmem:[%s2687_s24 + $0xee8] sm:$0xff] %v1712_v18  ;;  %v1206_v28 = vmul.f32 %v2653_v1, %v693_v14  ;;  %v1207_v29 = vmul.f32 %v2653_v1, %v694_v15  ;;  %v1715_v33 = vadd.f32 %v2658_v5, %v1202_v22  ;;  %v714_v17 = vld [vmem:[%s2646_s13 + $0xfc8] sm:$0xff]  ;;  %v715_v18 = vld [vmem:[%s2646_s13 + $0xfd0] sm:$0xff] }
 0x16a   : > { %2225 = vst [vmem:[%s2687_s24 + $0xef0] sm:$0xff] %v1713_v21  ;;  %v1716_v34 = vadd.f32 %v2658_v5, %v1203_v23  ;;  %v1717_v35 = vadd.f32 %v2658_v5, %v1204_v24  ;;  %v1208_v36 = vmul.f32 %v2653_v1, %v695_v20  ;;  %2226 = vst [vmem:[%s2687_s24 + $0xef8] sm:$0xff] %v1714_v26  ;;  %v716_v23 = vld [vmem:[%s2646_s13 + $0xfd8] sm:$0xff]  ;;  %v717_v24 = vld [vmem:[%s2646_s13 + $0xfe0] sm:$0xff] }
 0x16b   : > { %v1718_v40 = vadd.f32 %v2658_v5, %v1205_v27  ;;  %v1719_v41 = vadd.f32 %v2658_v5, %v1206_v28  ;;  %v1720_v42 = vadd.f32 %v2658_v5, %v1207_v29  ;;  %v1209_v43 = vmul.f32 %v2653_v1, %v696_v25  ;;  %2227 = vst [vmem:[%s2687_s24 + $0xf00] sm:$0xff] %v1715_v33  ;;  %v718_v25 = vld [vmem:[%s2646_s13 + $0xfe8] sm:$0xff] }
 0x16c   : > { %2228 = vst [vmem:[%s2687_s24 + $0xf08] sm:$0xff] %v1716_v34  ;;  %2229 = vst [vmem:[%s2687_s24 + $0xf10] sm:$0xff] %v1717_v35  ;;  %v1721_v45 = vadd.f32 %v2658_v5, %v1208_v36  ;;  %v1210_v46 = vmul.f32 %v2653_v1, %v697_v30  ;;  %v1211_v47 = vmul.f32 %v2653_v1, %v698_v31  ;;  %v719_v30 = vld [vmem:[%s2646_s13 + $0xff0] sm:$0xff]  ;;  %v720_v35 = vld [vmem:[%s2646_s13 + $0xff8] sm:$0xff] }
 0x16d   : > { %v1212_v48 = vmul.f32 %v2653_v1, %v699_v32  ;;  %2230 = vst [vmem:[%s2687_s24 + $0xf18] sm:$0xff] %v1718_v40  ;;  %2231 = vst [vmem:[%s2687_s24 + $0xf20] sm:$0xff] %v1719_v41  ;;  %v1722_v50 = vadd.f32 %v2658_v5, %v1209_v43  ;;  %v1213_v51 = vmul.f32 %v2653_v1, %v700_v37 }
 0x16e   : > { %2232 = vst [vmem:[%s2687_s24 + $0xf28] sm:$0xff] %v1720_v42  ;;  %v1214_v52 = vmul.f32 %v2653_v1, %v701_v38  ;;  %v1215_v53 = vmul.f32 %v2653_v1, %v702_v39  ;;  %2233 = vst [vmem:[%s2687_s24 + $0xf30] sm:$0xff] %v1721_v45  ;;  %v1723_v57 = vadd.f32 %v2658_v5, %v1210_v46 }
 0x16f   : > { %v1724_v58 = vadd.f32 %v2658_v5, %v1211_v47  ;;  %v1725_v59 = vadd.f32 %v2658_v5, %v1212_v48  ;;  %v1216_v60 = vmul.f32 %v2653_v1, %v703_v44  ;;  %2234 = vst [vmem:[%s2687_s24 + $0xf38] sm:$0xff] %v1722_v50  ;;  %v1726_v0 = vadd.f32 %v2658_v5, %v1213_v51 }
 0x170   : > { %v1727_v2 = vadd.f32 %v2658_v5, %v1214_v52  ;;  %v1728_v3 = vadd.f32 %v2658_v5, %v1215_v53  ;;  %v1217_v4 = vmul.f32 %v2653_v1, %v704_v49  ;;  %2235 = vst [vmem:[%s2687_s24 + $0xf40] sm:$0xff] %v1723_v57  ;;  %v1218_v8 = vmul.f32 %v2653_v1, %v705_v54 }
 0x171   : > { %2236 = vst [vmem:[%s2687_s24 + $0xf48] sm:$0xff] %v1724_v58  ;;  %2237 = vst [vmem:[%s2687_s24 + $0xf50] sm:$0xff] %v1725_v59  ;;  %v1729_v7 = vadd.f32 %v2658_v5, %v1216_v60  ;;  %v1219_v9 = vmul.f32 %v2653_v1, %v706_v55  ;;  %v1220_v10 = vmul.f32 %v2653_v1, %v707_v56 }
 0x172   : > { %2238 = vst [vmem:[%s2687_s24 + $0xf58] sm:$0xff] %v1726_v0  ;;  %2239 = vst [vmem:[%s2687_s24 + $0xf60] sm:$0xff] %v1727_v2  ;;  %v1730_v12 = vadd.f32 %v2658_v5, %v1217_v4  ;;  %v1221_v13 = vmul.f32 %v2653_v1, %v708_v61  ;;  %v1222_v14 = vmul.f32 %v2653_v1, %v709_v62 }
 0x173   : > { %2240 = vst [vmem:[%s2687_s24 + $0xf68] sm:$0xff] %v1728_v3  ;;  %v1223_v15 = vmul.f32 %v2653_v1, %v710_v63  ;;  %2241 = vst [vmem:[%s2687_s24 + $0xf70] sm:$0xff] %v1729_v7  ;;  %v1731_v19 = vadd.f32 %v2658_v5, %v1218_v8  ;;  %v1732_v20 = vadd.f32 %v2658_v5, %v1219_v9 }
 0x174   : > { %v1733_v21 = vadd.f32 %v2658_v5, %v1220_v10  ;;  %v1224_v22 = vmul.f32 %v2653_v1, %v711_v6  ;;  %2242 = vst [vmem:[%s2687_s24 + $0xf78] sm:$0xff] %v1730_v12  ;;  %v1734_v26 = vadd.f32 %v2658_v5, %v1221_v13  ;;  %v1735_v27 = vadd.f32 %v2658_v5, %v1222_v14 }
 0x175   : > { %v1736_v28 = vadd.f32 %v2658_v5, %v1223_v15  ;;  %v1225_v29 = vmul.f32 %v2653_v1, %v712_v11  ;;  %2243 = vst [vmem:[%s2687_s24 + $0xf80] sm:$0xff] %v1731_v19  ;;  %2244 = vst [vmem:[%s2687_s24 + $0xf88] sm:$0xff] %v1732_v20  ;;  %v1226_v32 = vmul.f32 %v2653_v1, %v713_v16 }
 0x176   : > { %2245 = vst [vmem:[%s2687_s24 + $0xf90] sm:$0xff] %v1733_v21  ;;  %v1737_v31 = vadd.f32 %v2658_v5, %v1224_v22  ;;  %v1227_v33 = vmul.f32 %v2653_v1, %v714_v17  ;;  %v1228_v34 = vmul.f32 %v2653_v1, %v715_v18  ;;  %2246 = vst [vmem:[%s2687_s24 + $0xf98] sm:$0xff] %v1734_v26 }
 0x177   : > { %2247 = vst [vmem:[%s2687_s24 + $0xfa0] sm:$0xff] %v1735_v27  ;;  %2248 = vst [vmem:[%s2687_s24 + $0xfa8] sm:$0xff] %v1736_v28  ;;  %v1738_v36 = vadd.f32 %v2658_v5, %v1225_v29  ;;  %v1229_v37 = vmul.f32 %v2653_v1, %v716_v23  ;;  %v1230_v38 = vmul.f32 %v2653_v1, %v717_v24 }
 0x178   : > { %v1231_v39 = vmul.f32 %v2653_v1, %v718_v25  ;;  %2249 = vst [vmem:[%s2687_s24 + $0xfb0] sm:$0xff] %v1737_v31  ;;  %v1739_v40 = vadd.f32 %v2658_v5, %v1226_v32  ;;  %v1740_v41 = vadd.f32 %v2658_v5, %v1227_v33  ;;  %v1741_v42 = vadd.f32 %v2658_v5, %v1228_v34 }
 0x179   : > { %v1232_v43 = vmul.f32 %v2653_v1, %v719_v30  ;;  %2250 = vst [vmem:[%s2687_s24 + $0xfb8] sm:$0xff] %v1738_v36  ;;  %v1742_v44 = vadd.f32 %v2658_v5, %v1229_v37  ;;  %v1743_v45 = vadd.f32 %v2658_v5, %v1230_v38  ;;  %v1233_v47 = vmul.f32 %v2653_v1, %v720_v35  ;;  %2266 = sbr.rel (!%p2587_p9) target bundleno = 409 (0x199), region = 40 }
 0x17a   : > { %v1744_v46 = vadd.f32 %v2658_v5, %v1231_v39  ;;  %2251 = vst [vmem:[%s2687_s24 + $0xfc0] sm:$0xff] %v1739_v40  ;;  %2252 = vst [vmem:[%s2687_s24 + $0xfc8] sm:$0xff] %v1740_v41 }
 0x17b   : > { %2253 = vst [vmem:[%s2687_s24 + $0xfd0] sm:$0xff] %v1741_v42  ;;  %v1745_v48 = vadd.f32 %v2658_v5, %v1232_v43  ;;  %2254 = vst [vmem:[%s2687_s24 + $0xfd8] sm:$0xff] %v1742_v44  ;;  %v1746_v49 = vadd.f32 %v2658_v5, %v1233_v47 }
 0x17c   : > { %2255 = vst [vmem:[%s2687_s24 + $0xfe0] sm:$0xff] %v1743_v45  ;;  %2256 = vst [vmem:[%s2687_s24 + $0xfe8] sm:$0xff] %v1744_v46 }
 0x17d   : > { %2257 = vst [vmem:[%s2687_s24 + $0xff0] sm:$0xff] %v1745_v48  ;;  %2258 = vst [vmem:[%s2687_s24 + $0xff8] sm:$0xff] %v1746_v49 }
 0x17e   : > { %s4784_s14 = smov (!%p2269_p6, %s2268_s14), 512 }
 0x17f   : > { %s4712_s15 = sshll.u32 %s4784_s14, 7 }
 0x180   : > { %s2273_s1 = ssub.s32 65536, %s4712_s15 }
 0x181   : > { %2274 = vsyncadd %s2260_s11, %s2273_s1  ;;  %p2368_p10 = scmp.ne.s32.totalorder %s4712_s15, 0  ;;  %s2375_s25 = sshll.u32 %s2564_s0, 16 }
 0x182   : > { %s4722_s27 = scalar_lea.hbm %s4772_s3, %s2375_s25  ;;  %s2279_s28 = sshll.u32 %s2687_s24, 4  ;;  %s4725_s28 = int_to_ptr.vmem [resolvable:$true] %s2279_s28 }
 0x183   : > { %s2445_s29 = scalar_lea.vmem %s4725_s28, %s4712_s15  ;;  %s2514_s30 = smov [#allocation7]  }
 0x184   : > { %p2446_p9 = scmp.ne.s32.totalorder %s4725_s28, %s2445_s29  ;;  %s2449_s5 = sshll.u32 %s2514_s30, 4  ;;  %s2450_s5 = int_to_ptr.vmem [resolvable:$false] %s2449_s5 }
 0x185   : > { %s2451_s0 = scalar_lea.vmem %s2450_s5, 131072  ;;  %p2452_p8 = scmp.lt.s32.totalorder %s4725_s28, %s2450_s5 }
 0x186   : > { %p2447_p13 = pnand %p2446_p9, %p2368_p10  ;;  %p2453_p11 = scmp.lt.s32.totalorder %s2451_s0, %s2445_s29 }
 0x188   : > { %p2448_p7 = pneg %p2447_p13  ;;  %p2454_p12 = por %p2453_p11, %p2452_p8 }
 0x18a   : > { %p2455_p0 = pnand %p2454_p12, %p2448_p7 }
 0x18c   : > { %2458 = shalt.err (!%p2455_p0)
}
 0x18d   : > { %s2459_s7 = scalar_lea.hbm %s4722_s27, %s4712_s15  ;;  %s2463_s13 = scalar_lea.hbm %s4772_s3, 294912 }
 0x18e   : > { %p2460_p1 = scmp.ne.s32.totalorder %s4722_s27, %s2459_s7  ;;  %p2464_p4 = scmp.lt.s32.totalorder %s4722_s27, %s4772_s3 }
 0x18f   : > { %p2465_p5 = scmp.lt.s32.totalorder %s2463_s13, %s2459_s7 }
 0x190   : > { %p2461_p3 = pnand %p2460_p1, %p2368_p10 }
 0x191   : > { %p2466_p6 = por %p2465_p5, %p2464_p4 }
 0x192   : > { %p2462_p2 = pneg %p2461_p3 }
 0x194   : > { %p2467_p9 = pnand %p2466_p6, %p2462_p2 }
 0x196   : > { %2470 = shalt.err (!%p2467_p9)
}
 0x197   : > { %s2515_s24 = smov 128   ;;  %s2516_s12 = smov 8  }
 0x198   : > { %2285 = dma.vmem_to_hbm [thread:$0]  (%p2368_p10), %s4725_s28, %s4712_s15, %s4722_s27, %s2260_s11, %s2515_s24, %s2515_s24, %s2516_s12  }
 0x199 PF: > { %p2382_p13 = scmp.ge.s32.totalorder %s2509_s19, 2  ;;  %s2294_s14 = sand.u32 1, %s2497_s16  }
 0x19a   : > { %p4776_p7 = scmp.ne.s32.totalorder %s4775_s26, 0  ;;  %s2295_s1 = scalar_lea.sflag [#allocation6], %s2294_s14 }
 0x19c   : > { %p2379_p8 = pnand %p2382_p13, %p4776_p7 }
 0x19e   : > { %p2380_p11 = pneg %p2379_p8 }
 0x1a0   : > { %2492 = dma.done.wait (%p2380_p11), %s2295_s1, 65536  }
 0x1a1   : > { %2494 = vsyncadd (%p2380_p11), %s2295_s1, 4294901760  ;;  %p18_p12 = scmp.ge.s32.totalorder %s2568_s20, 7   ;;  %s4777_s16 = smov %s2501_s17 }
 0x1a2   : > { %s4778_s17 = smov %s2505_s18  ;;  %s4779_s18 = smov %s2580_s23 }
 0x1a3   : > { %s4780_s19 = smov %s2568_s20  ;;  %20 = sbr.rel (!%p18_p12) target bundleno = 8 (0x8), region = 77 }
 0x1a8   :  { %2300 = vsyncpa [#allocation5], 1 }
 0x1a9   :  { %2302 = vsyncpa [#allocation5 + $0x1], 1 }
 0x1aa   :  { %2303 = vsyncpa [#allocation6], 1 }
 0x1ab   :  { %2305 = vsyncpa [#allocation6 + $0x1], 1 }

</bundles_post_ra>
